<compile_context>
chip_gen: v7x
topology: tpu7x:2x2x1
jax: 0.10.0
libtpu: 0.0.40
codegen_flags: <defaults>
</compile_context>

<pallas_src>
import jax
import jax.numpy as jnp
from jax.experimental import pallas as pl
from jax.experimental.pallas import tpu as pltpu

# ----------------------------- static geometry ------------------------------
H1, W1 = 32, 32                       # conv1 input (Cin = 1)
KS = 5                                # conv kernel size
C1_OUT = 6
OH1, OW1 = H1 - KS + 1, W1 - KS + 1   # 28, 28
PH1, PW1 = OH1 // 2, OW1 // 2         # 14, 14

C2_IN, C2_OUT = 6, 16
H2, W2 = PH1, PW1                     # 14, 14
OH2, OW2 = H2 - KS + 1, W2 - KS + 1   # 10, 10
PH2, PW2 = OH2 // 2, OW2 // 2         # 5, 5

FEAT = C2_OUT * PH2 * PW2             # 400
FC_PAD = 128

X1_FLAT = H1 * W1                     # 1024
X1_PAD = 1280                         # >= 1024 + max conv1 tap shift (4*32+4)
X2_FLAT = H2 * W2                     # 196
X2_PAD = 256                          # >= 196 + max conv2 tap shift (4*14+4)
NTAP = KS * KS                        # 25

# Shifted-max widths for the pools.  Chosen so that
#   (a) every selected pooled position (max flat index 858 / 120) is covered,
#   (b) the largest shifted read (width + 33 / + 15) stays inside the valid
#       conv output (1024 / 196 lanes) -> no garbage lanes ever read.
M1W = 896                             # 858 < 896 <= 1024 - 33
M2W = 128                             # 120 < 128 <= 196 - 15


# ------------------------------ host-side wrapper ----------------------------
def net_forward(x_nchw, params, tile_b=8):
    N = x_nchw.shape[0]
    TB = min(tile_b, N)
    N_pad = ((N + TB - 1) // TB) * TB
    f32 = jnp.float32

    # Input: (N,1,32,32) -> flat (N,1024) -> zero-pad lanes to 1280 (tap shifts)
    # and pad batch to a multiple of TB.
    x_flat = x_nchw.astype(f32).reshape(N, X1_FLAT)
    x_pad = jnp.zeros((N_pad, X1_PAD), f32).at[:N, :X1_FLAT].set(x_flat)

    eyeb = jnp.eye(TB, dtype=f32)

    # conv1 block-diagonal weights: rows = b*6+o, cols = t*TB+b'
    w1 = params["conv1_w"].astype(f32).reshape(C1_OUT, NTAP)                  # (6,25)
    w1big = (w1[None, :, :, None] * eyeb[:, None, None, :]).reshape(
        TB * C1_OUT, NTAP * TB)
    b1big = jnp.tile(params["conv1_b"].astype(f32), TB).reshape(TB * C1_OUT, 1)

    # conv2 block-diagonal weights: rows = o*TB+b, cols = t*(TB*6)+b'*6+c
    w2r = jnp.transpose(params["conv2_w"].astype(f32), (0, 2, 3, 1)).reshape(
        C2_OUT, NTAP, C2_IN)                                                  # (16,25,6)
    w2big = (w2r[:, None, :, None, :] * eyeb[None, :, None, :, None]).reshape(
        C2_OUT * TB, NTAP * TB * C2_IN)
    b2big = jnp.repeat(params["conv2_b"].astype(f32), TB).reshape(C2_OUT * TB, 1)

    # Pool selection matrices (pick even-row/even-col pooled positions).
    r1 = (2 * jnp.arange(PH1)[:, None] * W1 + 2 * jnp.arange(PW1)[None, :]).reshape(-1)
    c1 = (jnp.arange(PH1)[:, None] * PW1 + jnp.arange(PW1)[None, :]).reshape(-1)
    sel1 = jnp.zeros((M1W, X2_PAD), f32).at[r1, c1].set(1.0)                  # (896,256)
    r2 = (2 * jnp.arange(PH2)[:, None] * W2 + 2 * jnp.arange(PW2)[None, :]).reshape(-1)
    c2 = (jnp.arange(PH2)[:, None] * PW2 + jnp.arange(PW2)[None, :]).reshape(-1)
    sel2 = jnp.zeros((M2W, PH2 * PW2), f32).at[r2, c2].set(1.0)               # (128,25)

    # Classifier weights, transposed to (in,out) and zero-padded to 128 lanes.
    fc1w = jnp.zeros((FEAT, FC_PAD), f32).at[:, :120].set(params["fc1_w"].astype(f32).T)
    fc1b = jnp.zeros((1, FC_PAD), f32).at[0, :120].set(params["fc1_b"].astype(f32))
    fc2w = jnp.zeros((FC_PAD, FC_PAD), f32).at[:120, :84].set(params["fc2_w"].astype(f32).T)
    fc2b = jnp.zeros((1, FC_PAD), f32).at[0, :84].set(params["fc2_b"].astype(f32))
    fc3w = jnp.zeros((FC_PAD, FC_PAD), f32).at[:84, :10].set(params["fc3_w"].astype(f32).T)
    fc3b = jnp.zeros((1, FC_PAD), f32).at[0, :10].set(params["fc3_b"].astype(f32))

    # ------------------------------- fused kernel ----------------------------
    def kernel(x_ref, w1_ref, b1_ref, w2_ref, b2_ref, sel1_ref, sel2_ref,
               fc1w_ref, fc1b_ref, fc2w_ref, fc2b_ref, fc3w_ref, fc3b_ref,
               o_ref,
               p1_ref, y1_ref, x2_ref, p2_ref, y2_ref, f_ref, feat_ref):
        # conv1 im2col: one (TB,1024) shifted copy per tap -> (25*TB, 1024)
        for t in range(NTAP):
            kh, kw = divmod(t, KS)
            s = kh * W1 + kw
            p1_ref[pl.ds(t * TB, TB), :] = x_ref[:, pl.ds(s, X1_FLAT)]
        a1 = jnp.dot(w1_ref[...], p1_ref[...], preferred_element_type=jnp.float32)
        y1_ref[...] = jnp.maximum(a1 + b1_ref[...], 0.0)        # (TB*6, 1024)

        # maxpool1: 4 shifted whole-tile loads, 3 maxes, 1 selection matmul
        m1 = jnp.maximum(
            jnp.maximum(y1_ref[:, pl.ds(0, M1W)], y1_ref[:, pl.ds(1, M1W)]),
            jnp.maximum(y1_ref[:, pl.ds(W1, M1W)], y1_ref[:, pl.ds(W1 + 1, M1W)]))
        x2_ref[...] = jnp.dot(m1, sel1_ref[...],
                              preferred_element_type=jnp.float32)  # (TB*6, 256)

        # conv2 im2col: one (TB*6,196) shifted copy per tap -> (25*TB*6, 196)
        for t in range(NTAP):
            kh, kw = divmod(t, KS)
            s = kh * W2 + kw
            p2_ref[pl.ds(t * TB * C2_IN, TB * C2_IN), :] = x2_ref[:, pl.ds(s, X2_FLAT)]
        a2 = jnp.dot(w2_ref[...], p2_ref[...], preferred_element_type=jnp.float32)
        y2_ref[...] = jnp.maximum(a2 + b2_ref[...], 0.0)        # (16*TB, 196)

        # maxpool2
        m2 = jnp.maximum(
            jnp.maximum(y2_ref[:, pl.ds(0, M2W)], y2_ref[:, pl.ds(1, M2W)]),
            jnp.maximum(y2_ref[:, pl.ds(W2, M2W)], y2_ref[:, pl.ds(W2 + 1, M2W)]))
        f_ref[...] = jnp.dot(m2, sel2_ref[...],
                             preferred_element_type=jnp.float32)   # (16*TB, 25)

        # flatten to PyTorch (C,H,W) order: one (TB,25) copy per channel
        for c in range(C2_OUT):
            feat_ref[:, pl.ds(c * PH2 * PW2, PH2 * PW2)] = f_ref[pl.ds(c * TB, TB), :]

        # classifier (lane-padded to 128)
        h = jnp.dot(feat_ref[...], fc1w_ref[...],
                    preferred_element_type=jnp.float32) + fc1b_ref[...]
        # TODO(synk): nn.Dropout(p=0.5) is identity here (eval/inference semantics).
        h = jnp.dot(h, fc2w_ref[...], preferred_element_type=jnp.float32) + fc2b_ref[...]
        h = jnp.dot(h, fc3w_ref[...], preferred_element_type=jnp.float32) + fc3b_ref[...]
        o_ref[...] = h[:, 0:10]

    def bcast(arr):  # full-array block, same for every batch step (stays in VMEM)
        return pl.BlockSpec(arr.shape, lambda n: (0, 0))

    out = pl.pallas_call(
        kernel,
        out_shape=jax.ShapeDtypeStruct((N_pad, 10), jnp.float32),
        grid_spec=pltpu.PrefetchScalarGridSpec(
            num_scalar_prefetch=0,
            grid=(N_pad // TB,),
            in_specs=[
                pl.BlockSpec((TB, X1_PAD), lambda n: (n, 0)),
                bcast(w1big), bcast(b1big), bcast(w2big), bcast(b2big),
                bcast(sel1), bcast(sel2),
                bcast(fc1w), bcast(fc1b), bcast(fc2w), bcast(fc2b),
                bcast(fc3w), bcast(fc3b),
            ],
            out_specs=pl.BlockSpec((TB, 10), lambda n: (n, 0)),
            scratch_shapes=[
                pltpu.VMEM((NTAP * TB, X1_FLAT), jnp.float32),            # p1
                pltpu.VMEM((TB * C1_OUT, X1_FLAT), jnp.float32),          # y1
                pltpu.VMEM((TB * C2_IN, X2_PAD), jnp.float32),            # x2
                pltpu.VMEM((NTAP * TB * C2_IN, X2_FLAT), jnp.float32),    # p2
                pltpu.VMEM((C2_OUT * TB, X2_FLAT), jnp.float32),          # y2
                pltpu.VMEM((C2_OUT * TB, PH2 * PW2), jnp.float32),        # f
                pltpu.VMEM((TB, FEAT), jnp.float32),                      # feat
            ],
        ),
        compiler_params=pltpu.CompilerParams(dimension_semantics=("parallel",)),
    )(x_pad, w1big, b1big, w2big, b2big, sel1, sel2,
      fc1w, fc1b, fc2w, fc2b, fc3w, fc3b)
    return out[:N]


# --------------------------- pure-JAX reference ------------------------------
def reference_forward(x_nchw, params):
    hp = jax.lax.Precision.HIGHEST
    x = jax.lax.conv_general_dilated(
        x_nchw, params["conv1_w"], (1, 1), "VALID",
        dimension_numbers=("NCHW", "OIHW", "NCHW"), precision=hp)
    x = jnp.maximum(x + params["conv1_b"][None, :, None, None], 0.0)
    n, c, h, w = x.shape
    x = x.reshape(n, c, h // 2, 2, w // 2, 2).max(axis=(3, 5))
    x = jax.lax.conv_general_dilated(
        x, params["conv2_w"], (1, 1), "VALID",
        dimension_numbers=("NCHW", "OIHW", "NCHW"), precision=hp)
    x = jnp.maximum(x + params["conv2_b"][None, :, None, None], 0.0)
    n, c, h, w = x.shape
    x = x.reshape(n, c, h // 2, 2, w // 2, 2).max(axis=(3, 5))
    x = x.reshape(n, -1)
    x = jnp.dot(x, params["fc1_w"].T, precision=hp) + params["fc1_b"]
    x = jnp.dot(x, params["fc2_w"].T, precision=hp) + params["fc2_b"]
    x = jnp.dot(x, params["fc3_w"].T, precision=hp) + params["fc3_b"]
    return x


if __name__ == "__main__":
    key = jax.random.PRNGKey(0)
    ks = jax.random.split(key, 11)

    # Deterministic synthetic parameters, PyTorch-convention shapes.
    params = {
        "conv1_w": jax.random.normal(ks[0], (6, 1, 5, 5), jnp.float32) * 0.2,
        "conv1_b": jax.random.normal(ks[1], (6,), jnp.float32) * 0.1,
        "conv2_w": jax.random.normal(ks[2], (16, 6, 5, 5), jnp.float32) * 0.1,
        "conv2_b": jax.random.normal(ks[3], (16,), jnp.float32) * 0.1,
        "fc1_w": jax.random.normal(ks[4], (120, 400), jnp.float32) * 0.05,
        "fc1_b": jax.random.normal(ks[5], (120,), jnp.float32) * 0.05,
        "fc2_w": jax.random.normal(ks[6], (84, 120), jnp.float32) * 0.05,
        "fc2_b": jax.random.normal(ks[7], (84,), jnp.float32) * 0.05,
        "fc3_w": jax.random.normal(ks[8], (10, 84), jnp.float32) * 0.05,
        "fc3_b": jax.random.normal(ks[9], (10,), jnp.float32) * 0.05,
    }

    # Input consistent with the module: 1x32x32 images (16*5*5 = 400 features).
    x = jax.random.normal(ks[10], (2, 1, 32, 32), jnp.float32)

    out = jax.jit(net_forward)(x, params)
    out = jax.block_until_ready(out)

    assert out.shape == (2, 10), out.shape
    assert bool(jnp.all(jnp.isfinite(out)))

    ref = jax.block_until_ready(jax.jit(reference_forward)(x, params))
    err = float(jnp.max(jnp.abs(out - ref)))
    assert err < 2e-2, f"mismatch vs reference: {err}"

    print("KERNEL_OK")
</pallas_src>

<mosaic_0001>
module attributes {stable_mosaic.version = 11 : i64} {
  func.func @kernel(%arg0: i32, %arg1: memref<2x1280xf32, #tpu.memory_space<vmem>>, %arg2: memref<12x50xf32, #tpu.memory_space<vmem>>, %arg3: memref<12x1xf32, #tpu.memory_space<vmem>>, %arg4: memref<32x300xf32, #tpu.memory_space<vmem>>, %arg5: memref<32x1xf32, #tpu.memory_space<vmem>>, %arg6: memref<896x256xf32, #tpu.memory_space<vmem>>, %arg7: memref<128x25xf32, #tpu.memory_space<vmem>>, %arg8: memref<400x128xf32, #tpu.memory_space<vmem>>, %arg9: memref<1x128xf32, #tpu.memory_space<vmem>>, %arg10: memref<128x128xf32, #tpu.memory_space<vmem>>, %arg11: memref<1x128xf32, #tpu.memory_space<vmem>>, %arg12: memref<128x128xf32, #tpu.memory_space<vmem>>, %arg13: memref<1x128xf32, #tpu.memory_space<vmem>>, %arg14: memref<2x10xf32, #tpu.memory_space<vmem>>, %arg15: memref<50x1024xf32, #tpu.memory_space<vmem>>, %arg16: memref<12x1024xf32, #tpu.memory_space<vmem>>, %arg17: memref<12x256xf32, #tpu.memory_space<vmem>>, %arg18: memref<300x196xf32, #tpu.memory_space<vmem>>, %arg19: memref<32x196xf32, #tpu.memory_space<vmem>>, %arg20: memref<32x25xf32, #tpu.memory_space<vmem>>, %arg21: memref<2x400xf32, #tpu.memory_space<vmem>>) attributes {dimension_semantics = [#tpu.dimension_semantics<parallel>], iteration_bounds = array<i64: 1>, scalar_prefetch = 0 : i64, scratch_operands = 7 : i64, tpu.core_type = #tpu.core_type<tc>, window_params = [{transform_indices = @transform_0, window_bounds = array<i64: 2, 1280>}, {pipeline_mode = #tpu.pipeline_mode<synchronous>, transform_indices = @transform_1, window_bounds = array<i64: 12, 50>}, {pipeline_mode = #tpu.pipeline_mode<synchronous>, transform_indices = @transform_2, window_bounds = array<i64: 12, 1>}, {pipeline_mode = #tpu.pipeline_mode<synchronous>, transform_indices = @transform_3, window_bounds = array<i64: 32, 300>}, {pipeline_mode = #tpu.pipeline_mode<synchronous>, transform_indices = @transform_4, window_bounds = array<i64: 32, 1>}, {pipeline_mode = #tpu.pipeline_mode<synchronous>, transform_indices = @transform_5, window_bounds = array<i64: 896, 256>}, {pipeline_mode = #tpu.pipeline_mode<synchronous>, transform_indices = @transform_6, window_bounds = array<i64: 128, 25>}, {pipeline_mode = #tpu.pipeline_mode<synchronous>, transform_indices = @transform_7, window_bounds = array<i64: 400, 128>}, {pipeline_mode = #tpu.pipeline_mode<synchronous>, transform_indices = @transform_8, window_bounds = array<i64: 1, 128>}, {pipeline_mode = #tpu.pipeline_mode<synchronous>, transform_indices = @transform_9, window_bounds = array<i64: 128, 128>}, {pipeline_mode = #tpu.pipeline_mode<synchronous>, transform_indices = @transform_10, window_bounds = array<i64: 1, 128>}, {pipeline_mode = #tpu.pipeline_mode<synchronous>, transform_indices = @transform_11, window_bounds = array<i64: 128, 128>}, {pipeline_mode = #tpu.pipeline_mode<synchronous>, transform_indices = @transform_12, window_bounds = array<i64: 1, 128>}, {transform_indices = @transform_13, window_bounds = array<i64: 2, 10>}]} {
    %c0 = arith.constant 0 : index
    %c0_0 = arith.constant 0 : index
    %0 = vector.load %arg1[%c0, %c0_0] : memref<2x1280xf32, #tpu.memory_space<vmem>>, vector<2x1024xf32>
    %c0_1 = arith.constant 0 : index
    %c0_2 = arith.constant 0 : index
    %1 = vector.load %arg15[%c0_1, %c0_2] : memref<50x1024xf32, #tpu.memory_space<vmem>>, vector<2x1024xf32>
    tpu.vector_store %arg15[%c0_1, %c0_2], %0 {strides = array<i32>} : memref<50x1024xf32, #tpu.memory_space<vmem>>, vector<2x1024xf32>,
    %c0_3 = arith.constant 0 : index
    %c1 = arith.constant 1 : index
    %2 = vector.load %arg1[%c0_3, %c1] : memref<2x1280xf32, #tpu.memory_space<vmem>>, vector<2x1024xf32>
    %c2 = arith.constant 2 : index
    %c0_4 = arith.constant 0 : index
    %3 = vector.load %arg15[%c2, %c0_4] : memref<50x1024xf32, #tpu.memory_space<vmem>>, vector<2x1024xf32>
    tpu.vector_store %arg15[%c2, %c0_4], %2 {strides = array<i32>} : memref<50x1024xf32, #tpu.memory_space<vmem>>, vector<2x1024xf32>,
    %c0_5 = arith.constant 0 : index
    %c2_6 = arith.constant 2 : index
    %4 = vector.load %arg1[%c0_5, %c2_6] : memref<2x1280xf32, #tpu.memory_space<vmem>>, vector<2x1024xf32>
    %c4 = arith.constant 4 : index
    %c0_7 = arith.constant 0 : index
    %5 = vector.load %arg15[%c4, %c0_7] : memref<50x1024xf32, #tpu.memory_space<vmem>>, vector<2x1024xf32>
    tpu.vector_store %arg15[%c4, %c0_7], %4 {strides = array<i32>} : memref<50x1024xf32, #tpu.memory_space<vmem>>, vector<2x1024xf32>,
    %c0_8 = arith.constant 0 : index
    %c3 = arith.constant 3 : index
    %6 = vector.load %arg1[%c0_8, %c3] : memref<2x1280xf32, #tpu.memory_space<vmem>>, vector<2x1024xf32>
    %c6 = arith.constant 6 : index
    %c0_9 = arith.constant 0 : index
    %7 = vector.load %arg15[%c6, %c0_9] : memref<50x1024xf32, #tpu.memory_space<vmem>>, vector<2x1024xf32>
    tpu.vector_store %arg15[%c6, %c0_9], %6 {strides = array<i32>} : memref<50x1024xf32, #tpu.memory_space<vmem>>, vector<2x1024xf32>,
    %c0_10 = arith.constant 0 : index
    %c4_11 = arith.constant 4 : index
    %8 = vector.load %arg1[%c0_10, %c4_11] : memref<2x1280xf32, #tpu.memory_space<vmem>>, vector<2x1024xf32>
    %c8 = arith.constant 8 : index
    %c0_12 = arith.constant 0 : index
    %9 = vector.load %arg15[%c8, %c0_12] : memref<50x1024xf32, #tpu.memory_space<vmem>>, vector<2x1024xf32>
    tpu.vector_store %arg15[%c8, %c0_12], %8 {strides = array<i32>} : memref<50x1024xf32, #tpu.memory_space<vmem>>, vector<2x1024xf32>,
    %c0_13 = arith.constant 0 : index
    %c32 = arith.constant 32 : index
    %10 = vector.load %arg1[%c0_13, %c32] : memref<2x1280xf32, #tpu.memory_space<vmem>>, vector<2x1024xf32>
    %c10 = arith.constant 10 : index
    %c0_14 = arith.constant 0 : index
    %11 = vector.load %arg15[%c10, %c0_14] : memref<50x1024xf32, #tpu.memory_space<vmem>>, vector<2x1024xf32>
    tpu.vector_store %arg15[%c10, %c0_14], %10 {strides = array<i32>} : memref<50x1024xf32, #tpu.memory_space<vmem>>, vector<2x1024xf32>,
    %c0_15 = arith.constant 0 : index
    %c33 = arith.constant 33 : index
    %12 = vector.load %arg1[%c0_15, %c33] : memref<2x1280xf32, #tpu.memory_space<vmem>>, vector<2x1024xf32>
    %c12 = arith.constant 12 : index
    %c0_16 = arith.constant 0 : index
    %13 = vector.load %arg15[%c12, %c0_16] : memref<50x1024xf32, #tpu.memory_space<vmem>>, vector<2x1024xf32>
    tpu.vector_store %arg15[%c12, %c0_16], %12 {strides = array<i32>} : memref<50x1024xf32, #tpu.memory_space<vmem>>, vector<2x1024xf32>,
    %c0_17 = arith.constant 0 : index
    %c34 = arith.constant 34 : index
    %14 = vector.load %arg1[%c0_17, %c34] : memref<2x1280xf32, #tpu.memory_space<vmem>>, vector<2x1024xf32>
    %c14 = arith.constant 14 : index
    %c0_18 = arith.constant 0 : index
    %15 = vector.load %arg15[%c14, %c0_18] : memref<50x1024xf32, #tpu.memory_space<vmem>>, vector<2x1024xf32>
    tpu.vector_store %arg15[%c14, %c0_18], %14 {strides = array<i32>} : memref<50x1024xf32, #tpu.memory_space<vmem>>, vector<2x1024xf32>,
    %c0_19 = arith.constant 0 : index
    %c35 = arith.constant 35 : index
    %16 = vector.load %arg1[%c0_19, %c35] : memref<2x1280xf32, #tpu.memory_space<vmem>>, vector<2x1024xf32>
    %c16 = arith.constant 16 : index
    %c0_20 = arith.constant 0 : index
    %17 = vector.load %arg15[%c16, %c0_20] : memref<50x1024xf32, #tpu.memory_space<vmem>>, vector<2x1024xf32>
    tpu.vector_store %arg15[%c16, %c0_20], %16 {strides = array<i32>} : memref<50x1024xf32, #tpu.memory_space<vmem>>, vector<2x1024xf32>,
    %c0_21 = arith.constant 0 : index
    %c36 = arith.constant 36 : index
    %18 = vector.load %arg1[%c0_21, %c36] : memref<2x1280xf32, #tpu.memory_space<vmem>>, vector<2x1024xf32>
    %c18 = arith.constant 18 : index
    %c0_22 = arith.constant 0 : index
    %19 = vector.load %arg15[%c18, %c0_22] : memref<50x1024xf32, #tpu.memory_space<vmem>>, vector<2x1024xf32>
    tpu.vector_store %arg15[%c18, %c0_22], %18 {strides = array<i32>} : memref<50x1024xf32, #tpu.memory_space<vmem>>, vector<2x1024xf32>,
    %c0_23 = arith.constant 0 : index
    %c64 = arith.constant 64 : index
    %20 = vector.load %arg1[%c0_23, %c64] : memref<2x1280xf32, #tpu.memory_space<vmem>>, vector<2x1024xf32>
    %c20 = arith.constant 20 : index
    %c0_24 = arith.constant 0 : index
    %21 = vector.load %arg15[%c20, %c0_24] : memref<50x1024xf32, #tpu.memory_space<vmem>>, vector<2x1024xf32>
    tpu.vector_store %arg15[%c20, %c0_24], %20 {strides = array<i32>} : memref<50x1024xf32, #tpu.memory_space<vmem>>, vector<2x1024xf32>,
    %c0_25 = arith.constant 0 : index
    %c65 = arith.constant 65 : index
    %22 = vector.load %arg1[%c0_25, %c65] : memref<2x1280xf32, #tpu.memory_space<vmem>>, vector<2x1024xf32>
    %c22 = arith.constant 22 : index
    %c0_26 = arith.constant 0 : index
    %23 = vector.load %arg15[%c22, %c0_26] : memref<50x1024xf32, #tpu.memory_space<vmem>>, vector<2x1024xf32>
    tpu.vector_store %arg15[%c22, %c0_26], %22 {strides = array<i32>} : memref<50x1024xf32, #tpu.memory_space<vmem>>, vector<2x1024xf32>,
    %c0_27 = arith.constant 0 : index
    %c66 = arith.constant 66 : index
    %24 = vector.load %arg1[%c0_27, %c66] : memref<2x1280xf32, #tpu.memory_space<vmem>>, vector<2x1024xf32>
    %c24 = arith.constant 24 : index
    %c0_28 = arith.constant 0 : index
    %25 = vector.load %arg15[%c24, %c0_28] : memref<50x1024xf32, #tpu.memory_space<vmem>>, vector<2x1024xf32>
    tpu.vector_store %arg15[%c24, %c0_28], %24 {strides = array<i32>} : memref<50x1024xf32, #tpu.memory_space<vmem>>, vector<2x1024xf32>,
    %c0_29 = arith.constant 0 : index
    %c67 = arith.constant 67 : index
    %26 = vector.load %arg1[%c0_29, %c67] : memref<2x1280xf32, #tpu.memory_space<vmem>>, vector<2x1024xf32>
    %c26 = arith.constant 26 : index
    %c0_30 = arith.constant 0 : index
    %27 = vector.load %arg15[%c26, %c0_30] : memref<50x1024xf32, #tpu.memory_space<vmem>>, vector<2x1024xf32>
    tpu.vector_store %arg15[%c26, %c0_30], %26 {strides = array<i32>} : memref<50x1024xf32, #tpu.memory_space<vmem>>, vector<2x1024xf32>,
    %c0_31 = arith.constant 0 : index
    %c68 = arith.constant 68 : index
    %28 = vector.load %arg1[%c0_31, %c68] : memref<2x1280xf32, #tpu.memory_space<vmem>>, vector<2x1024xf32>
    %c28 = arith.constant 28 : index
    %c0_32 = arith.constant 0 : index
    %29 = vector.load %arg15[%c28, %c0_32] : memref<50x1024xf32, #tpu.memory_space<vmem>>, vector<2x1024xf32>
    tpu.vector_store %arg15[%c28, %c0_32], %28 {strides = array<i32>} : memref<50x1024xf32, #tpu.memory_space<vmem>>, vector<2x1024xf32>,
    %c0_33 = arith.constant 0 : index
    %c96 = arith.constant 96 : index
    %30 = vector.load %arg1[%c0_33, %c96] : memref<2x1280xf32, #tpu.memory_space<vmem>>, vector<2x1024xf32>
    %c30 = arith.constant 30 : index
    %c0_34 = arith.constant 0 : index
    %31 = vector.load %arg15[%c30, %c0_34] : memref<50x1024xf32, #tpu.memory_space<vmem>>, vector<2x1024xf32>
    tpu.vector_store %arg15[%c30, %c0_34], %30 {strides = array<i32>} : memref<50x1024xf32, #tpu.memory_space<vmem>>, vector<2x1024xf32>,
    %c0_35 = arith.constant 0 : index
    %c97 = arith.constant 97 : index
    %32 = vector.load %arg1[%c0_35, %c97] : memref<2x1280xf32, #tpu.memory_space<vmem>>, vector<2x1024xf32>
    %c32_36 = arith.constant 32 : index
    %c0_37 = arith.constant 0 : index
    %33 = vector.load %arg15[%c32_36, %c0_37] : memref<50x1024xf32, #tpu.memory_space<vmem>>, vector<2x1024xf32>
    tpu.vector_store %arg15[%c32_36, %c0_37], %32 {strides = array<i32>} : memref<50x1024xf32, #tpu.memory_space<vmem>>, vector<2x1024xf32>,
    %c0_38 = arith.constant 0 : index
    %c98 = arith.constant 98 : index
    %34 = vector.load %arg1[%c0_38, %c98] : memref<2x1280xf32, #tpu.memory_space<vmem>>, vector<2x1024xf32>
    %c34_39 = arith.constant 34 : index
    %c0_40 = arith.constant 0 : index
    %35 = vector.load %arg15[%c34_39, %c0_40] : memref<50x1024xf32, #tpu.memory_space<vmem>>, vector<2x1024xf32>
    tpu.vector_store %arg15[%c34_39, %c0_40], %34 {strides = array<i32>} : memref<50x1024xf32, #tpu.memory_space<vmem>>, vector<2x1024xf32>,
    %c0_41 = arith.constant 0 : index
    %c99 = arith.constant 99 : index
    %36 = vector.load %arg1[%c0_41, %c99] : memref<2x1280xf32, #tpu.memory_space<vmem>>, vector<2x1024xf32>
    %c36_42 = arith.constant 36 : index
    %c0_43 = arith.constant 0 : index
    %37 = vector.load %arg15[%c36_42, %c0_43] : memref<50x1024xf32, #tpu.memory_space<vmem>>, vector<2x1024xf32>
    tpu.vector_store %arg15[%c36_42, %c0_43], %36 {strides = array<i32>} : memref<50x1024xf32, #tpu.memory_space<vmem>>, vector<2x1024xf32>,
    %c0_44 = arith.constant 0 : index
    %c100 = arith.constant 100 : index
    %38 = vector.load %arg1[%c0_44, %c100] : memref<2x1280xf32, #tpu.memory_space<vmem>>, vector<2x1024xf32>
    %c38 = arith.constant 38 : index
    %c0_45 = arith.constant 0 : index
    %39 = vector.load %arg15[%c38, %c0_45] : memref<50x1024xf32, #tpu.memory_space<vmem>>, vector<2x1024xf32>
    tpu.vector_store %arg15[%c38, %c0_45], %38 {strides = array<i32>} : memref<50x1024xf32, #tpu.memory_space<vmem>>, vector<2x1024xf32>,
    %c0_46 = arith.constant 0 : index
    %c128 = arith.constant 128 : index
    %40 = vector.load %arg1[%c0_46, %c128] : memref<2x1280xf32, #tpu.memory_space<vmem>>, vector<2x1024xf32>
    %c40 = arith.constant 40 : index
    %c0_47 = arith.constant 0 : index
    %41 = vector.load %arg15[%c40, %c0_47] : memref<50x1024xf32, #tpu.memory_space<vmem>>, vector<2x1024xf32>
    tpu.vector_store %arg15[%c40, %c0_47], %40 {strides = array<i32>} : memref<50x1024xf32, #tpu.memory_space<vmem>>, vector<2x1024xf32>,
    %c0_48 = arith.constant 0 : index
    %c129 = arith.constant 129 : index
    %42 = vector.load %arg1[%c0_48, %c129] : memref<2x1280xf32, #tpu.memory_space<vmem>>, vector<2x1024xf32>
    %c42 = arith.constant 42 : index
    %c0_49 = arith.constant 0 : index
    %43 = vector.load %arg15[%c42, %c0_49] : memref<50x1024xf32, #tpu.memory_space<vmem>>, vector<2x1024xf32>
    tpu.vector_store %arg15[%c42, %c0_49], %42 {strides = array<i32>} : memref<50x1024xf32, #tpu.memory_space<vmem>>, vector<2x1024xf32>,
    %c0_50 = arith.constant 0 : index
    %c130 = arith.constant 130 : index
    %44 = vector.load %arg1[%c0_50, %c130] : memref<2x1280xf32, #tpu.memory_space<vmem>>, vector<2x1024xf32>
    %c44 = arith.constant 44 : index
    %c0_51 = arith.constant 0 : index
    %45 = vector.load %arg15[%c44, %c0_51] : memref<50x1024xf32, #tpu.memory_space<vmem>>, vector<2x1024xf32>
    tpu.vector_store %arg15[%c44, %c0_51], %44 {strides = array<i32>} : memref<50x1024xf32, #tpu.memory_space<vmem>>, vector<2x1024xf32>,
    %c0_52 = arith.constant 0 : index
    %c131 = arith.constant 131 : index
    %46 = vector.load %arg1[%c0_52, %c131] : memref<2x1280xf32, #tpu.memory_space<vmem>>, vector<2x1024xf32>
    %c46 = arith.constant 46 : index
    %c0_53 = arith.constant 0 : index
    %47 = vector.load %arg15[%c46, %c0_53] : memref<50x1024xf32, #tpu.memory_space<vmem>>, vector<2x1024xf32>
    tpu.vector_store %arg15[%c46, %c0_53], %46 {strides = array<i32>} : memref<50x1024xf32, #tpu.memory_space<vmem>>, vector<2x1024xf32>,
    %c0_54 = arith.constant 0 : index
    %c132 = arith.constant 132 : index
    %48 = vector.load %arg1[%c0_54, %c132] : memref<2x1280xf32, #tpu.memory_space<vmem>>, vector<2x1024xf32>
    %c48 = arith.constant 48 : index
    %c0_55 = arith.constant 0 : index
    %49 = vector.load %arg15[%c48, %c0_55] : memref<50x1024xf32, #tpu.memory_space<vmem>>, vector<2x1024xf32>
    tpu.vector_store %arg15[%c48, %c0_55], %48 {strides = array<i32>} : memref<50x1024xf32, #tpu.memory_space<vmem>>, vector<2x1024xf32>,
    %c0_56 = arith.constant 0 : index
    %c0_57 = arith.constant 0 : index
    %50 = vector.load %arg2[%c0_56, %c0_57] : memref<12x50xf32, #tpu.memory_space<vmem>>, vector<12x50xf32>
    %c0_58 = arith.constant 0 : index
    %c0_59 = arith.constant 0 : index
    %51 = vector.load %arg15[%c0_58, %c0_59] : memref<50x1024xf32, #tpu.memory_space<vmem>>, vector<50x1024xf32>
    %cst = arith.constant dense<0.000000e+00> : vector<12x1024xf32>
    %52 = tpu.matmul %50, %51, %cst {dimension_numbers = #tpu.dot_dimension_numbers<[1], [0], [0], [1], [0, 0, 1, 1], [], []>} : vector<12x50xf32>, vector<50x1024xf32>, vector<12x1024xf32> -> vector<12x1024xf32>
    %c0_60 = arith.constant 0 : index
    %c0_61 = arith.constant 0 : index
    %53 = vector.load %arg3[%c0_60, %c0_61] : memref<12x1xf32, #tpu.memory_space<vmem>>, vector<12x1xf32>
    %54 = vector.broadcast %53 : vector<12x1xf32> to vector<12x1024xf32>
    %55 = arith.addf %52, %54 : vector<12x1024xf32>
    %cst_62 = arith.constant 0.000000e+00 : f32
    %56 = vector.broadcast %cst_62 : f32 to vector<12x1024xf32>
    %57 = arith.maximumf %55, %56 : vector<12x1024xf32>
    %c0_63 = arith.constant 0 : index
    %c0_64 = arith.constant 0 : index
    %58 = vector.load %arg16[%c0_63, %c0_64] : memref<12x1024xf32, #tpu.memory_space<vmem>>, vector<12x1024xf32>
    tpu.vector_store %arg16[%c0_63, %c0_64], %57 {strides = array<i32>} : memref<12x1024xf32, #tpu.memory_space<vmem>>, vector<12x1024xf32>,
    %c0_65 = arith.constant 0 : index
    %c0_66 = arith.constant 0 : index
    %59 = vector.load %arg16[%c0_65, %c0_66] : memref<12x1024xf32, #tpu.memory_space<vmem>>, vector<12x896xf32>
    %c0_67 = arith.constant 0 : index
    %c1_68 = arith.constant 1 : index
    %60 = vector.load %arg16[%c0_67, %c1_68] : memref<12x1024xf32, #tpu.memory_space<vmem>>, vector<12x896xf32>
    %61 = arith.maximumf %59, %60 : vector<12x896xf32>
    %c0_69 = arith.constant 0 : index
    %c32_70 = arith.constant 32 : index
    %62 = vector.load %arg16[%c0_69, %c32_70] : memref<12x1024xf32, #tpu.memory_space<vmem>>, vector<12x896xf32>
    %c0_71 = arith.constant 0 : index
    %c33_72 = arith.constant 33 : index
    %63 = vector.load %arg16[%c0_71, %c33_72] : memref<12x1024xf32, #tpu.memory_space<vmem>>, vector<12x896xf32>
    %64 = arith.maximumf %62, %63 : vector<12x896xf32>
    %65 = arith.maximumf %61, %64 : vector<12x896xf32>
    %c0_73 = arith.constant 0 : index
    %c0_74 = arith.constant 0 : index
    %66 = vector.load %arg6[%c0_73, %c0_74] : memref<896x256xf32, #tpu.memory_space<vmem>>, vector<896x256xf32>
    %cst_75 = arith.constant dense<0.000000e+00> : vector<12x256xf32>
    %67 = tpu.matmul %65, %66, %cst_75 {dimension_numbers = #tpu.dot_dimension_numbers<[1], [0], [0], [1], [0, 0, 1, 1], [], []>} : vector<12x896xf32>, vector<896x256xf32>, vector<12x256xf32> -> vector<12x256xf32>
    %c0_76 = arith.constant 0 : index
    %c0_77 = arith.constant 0 : index
    %68 = vector.load %arg17[%c0_76, %c0_77] : memref<12x256xf32, #tpu.memory_space<vmem>>, vector<12x256xf32>
    tpu.vector_store %arg17[%c0_76, %c0_77], %67 {strides = array<i32>} : memref<12x256xf32, #tpu.memory_space<vmem>>, vector<12x256xf32>,
    %c0_78 = arith.constant 0 : index
    %c0_79 = arith.constant 0 : index
    %69 = vector.load %arg17[%c0_78, %c0_79] : memref<12x256xf32, #tpu.memory_space<vmem>>, vector<12x196xf32>
    %c0_80 = arith.constant 0 : index
    %c0_81 = arith.constant 0 : index
    %70 = vector.load %arg18[%c0_80, %c0_81] : memref<300x196xf32, #tpu.memory_space<vmem>>, vector<12x196xf32>
    tpu.vector_store %arg18[%c0_80, %c0_81], %69 {strides = array<i32>} : memref<300x196xf32, #tpu.memory_space<vmem>>, vector<12x196xf32>,
    %c0_82 = arith.constant 0 : index
    %c1_83 = arith.constant 1 : index
    %71 = vector.load %arg17[%c0_82, %c1_83] : memref<12x256xf32, #tpu.memory_space<vmem>>, vector<12x196xf32>
    %c12_84 = arith.constant 12 : index
    %c0_85 = arith.constant 0 : index
    %72 = vector.load %arg18[%c12_84, %c0_85] : memref<300x196xf32, #tpu.memory_space<vmem>>, vector<12x196xf32>
    tpu.vector_store %arg18[%c12_84, %c0_85], %71 {strides = array<i32>} : memref<300x196xf32, #tpu.memory_space<vmem>>, vector<12x196xf32>,
    %c0_86 = arith.constant 0 : index
    %c2_87 = arith.constant 2 : index
    %73 = vector.load %arg17[%c0_86, %c2_87] : memref<12x256xf32, #tpu.memory_space<vmem>>, vector<12x196xf32>
    %c24_88 = arith.constant 24 : index
    %c0_89 = arith.constant 0 : index
    %74 = vector.load %arg18[%c24_88, %c0_89] : memref<300x196xf32, #tpu.memory_space<vmem>>, vector<12x196xf32>
    tpu.vector_store %arg18[%c24_88, %c0_89], %73 {strides = array<i32>} : memref<300x196xf32, #tpu.memory_space<vmem>>, vector<12x196xf32>,
    %c0_90 = arith.constant 0 : index
    %c3_91 = arith.constant 3 : index
    %75 = vector.load %arg17[%c0_90, %c3_91] : memref<12x256xf32, #tpu.memory_space<vmem>>, vector<12x196xf32>
    %c36_92 = arith.constant 36 : index
    %c0_93 = arith.constant 0 : index
    %76 = vector.load %arg18[%c36_92, %c0_93] : memref<300x196xf32, #tpu.memory_space<vmem>>, vector<12x196xf32>
    tpu.vector_store %arg18[%c36_92, %c0_93], %75 {strides = array<i32>} : memref<300x196xf32, #tpu.memory_space<vmem>>, vector<12x196xf32>,
    %c0_94 = arith.constant 0 : index
    %c4_95 = arith.constant 4 : index
    %77 = vector.load %arg17[%c0_94, %c4_95] : memref<12x256xf32, #tpu.memory_space<vmem>>, vector<12x196xf32>
    %c48_96 = arith.constant 48 : index
    %c0_97 = arith.constant 0 : index
    %78 = vector.load %arg18[%c48_96, %c0_97] : memref<300x196xf32, #tpu.memory_space<vmem>>, vector<12x196xf32>
    tpu.vector_store %arg18[%c48_96, %c0_97], %77 {strides = array<i32>} : memref<300x196xf32, #tpu.memory_space<vmem>>, vector<12x196xf32>,
    %c0_98 = arith.constant 0 : index
    %c14_99 = arith.constant 14 : index
    %79 = vector.load %arg17[%c0_98, %c14_99] : memref<12x256xf32, #tpu.memory_space<vmem>>, vector<12x196xf32>
    %c60 = arith.constant 60 : index
    %c0_100 = arith.constant 0 : index
    %80 = vector.load %arg18[%c60, %c0_100] : memref<300x196xf32, #tpu.memory_space<vmem>>, vector<12x196xf32>
    tpu.vector_store %arg18[%c60, %c0_100], %79 {strides = array<i32>} : memref<300x196xf32, #tpu.memory_space<vmem>>, vector<12x196xf32>,
    %c0_101 = arith.constant 0 : index
    %c15 = arith.constant 15 : index
    %81 = vector.load %arg17[%c0_101, %c15] : memref<12x256xf32, #tpu.memory_space<vmem>>, vector<12x196xf32>
    %c72 = arith.constant 72 : index
    %c0_102 = arith.constant 0 : index
    %82 = vector.load %arg18[%c72, %c0_102] : memref<300x196xf32, #tpu.memory_space<vmem>>, vector<12x196xf32>
    tpu.vector_store %arg18[%c72, %c0_102], %81 {strides = array<i32>} : memref<300x196xf32, #tpu.memory_space<vmem>>, vector<12x196xf32>,
    %c0_103 = arith.constant 0 : index
    %c16_104 = arith.constant 16 : index
    %83 = vector.load %arg17[%c0_103, %c16_104] : memref<12x256xf32, #tpu.memory_space<vmem>>, vector<12x196xf32>
    %c84 = arith.constant 84 : index
    %c0_105 = arith.constant 0 : index
    %84 = vector.load %arg18[%c84, %c0_105] : memref<300x196xf32, #tpu.memory_space<vmem>>, vector<12x196xf32>
    tpu.vector_store %arg18[%c84, %c0_105], %83 {strides = array<i32>} : memref<300x196xf32, #tpu.memory_space<vmem>>, vector<12x196xf32>,
    %c0_106 = arith.constant 0 : index
    %c17 = arith.constant 17 : index
    %85 = vector.load %arg17[%c0_106, %c17] : memref<12x256xf32, #tpu.memory_space<vmem>>, vector<12x196xf32>
    %c96_107 = arith.constant 96 : index
    %c0_108 = arith.constant 0 : index
    %86 = vector.load %arg18[%c96_107, %c0_108] : memref<300x196xf32, #tpu.memory_space<vmem>>, vector<12x196xf32>
    tpu.vector_store %arg18[%c96_107, %c0_108], %85 {strides = array<i32>} : memref<300x196xf32, #tpu.memory_space<vmem>>, vector<12x196xf32>,
    %c0_109 = arith.constant 0 : index
    %c18_110 = arith.constant 18 : index
    %87 = vector.load %arg17[%c0_109, %c18_110] : memref<12x256xf32, #tpu.memory_space<vmem>>, vector<12x196xf32>
    %c108 = arith.constant 108 : index
    %c0_111 = arith.constant 0 : index
    %88 = vector.load %arg18[%c108, %c0_111] : memref<300x196xf32, #tpu.memory_space<vmem>>, vector<12x196xf32>
    tpu.vector_store %arg18[%c108, %c0_111], %87 {strides = array<i32>} : memref<300x196xf32, #tpu.memory_space<vmem>>, vector<12x196xf32>,
    %c0_112 = arith.constant 0 : index
    %c28_113 = arith.constant 28 : index
    %89 = vector.load %arg17[%c0_112, %c28_113] : memref<12x256xf32, #tpu.memory_space<vmem>>, vector<12x196xf32>
    %c120 = arith.constant 120 : index
    %c0_114 = arith.constant 0 : index
    %90 = vector.load %arg18[%c120, %c0_114] : memref<300x196xf32, #tpu.memory_space<vmem>>, vector<12x196xf32>
    tpu.vector_store %arg18[%c120, %c0_114], %89 {strides = array<i32>} : memref<300x196xf32, #tpu.memory_space<vmem>>, vector<12x196xf32>,
    %c0_115 = arith.constant 0 : index
    %c29 = arith.constant 29 : index
    %91 = vector.load %arg17[%c0_115, %c29] : memref<12x256xf32, #tpu.memory_space<vmem>>, vector<12x196xf32>
    %c132_116 = arith.constant 132 : index
    %c0_117 = arith.constant 0 : index
    %92 = vector.load %arg18[%c132_116, %c0_117] : memref<300x196xf32, #tpu.memory_space<vmem>>, vector<12x196xf32>
    tpu.vector_store %arg18[%c132_116, %c0_117], %91 {strides = array<i32>} : memref<300x196xf32, #tpu.memory_space<vmem>>, vector<12x196xf32>,
    %c0_118 = arith.constant 0 : index
    %c30_119 = arith.constant 30 : index
    %93 = vector.load %arg17[%c0_118, %c30_119] : memref<12x256xf32, #tpu.memory_space<vmem>>, vector<12x196xf32>
    %c144 = arith.constant 144 : index
    %c0_120 = arith.constant 0 : index
    %94 = vector.load %arg18[%c144, %c0_120] : memref<300x196xf32, #tpu.memory_space<vmem>>, vector<12x196xf32>
    tpu.vector_store %arg18[%c144, %c0_120], %93 {strides = array<i32>} : memref<300x196xf32, #tpu.memory_space<vmem>>, vector<12x196xf32>,
    %c0_121 = arith.constant 0 : index
    %c31 = arith.constant 31 : index
    %95 = vector.load %arg17[%c0_121, %c31] : memref<12x256xf32, #tpu.memory_space<vmem>>, vector<12x196xf32>
    %c156 = arith.constant 156 : index
    %c0_122 = arith.constant 0 : index
    %96 = vector.load %arg18[%c156, %c0_122] : memref<300x196xf32, #tpu.memory_space<vmem>>, vector<12x196xf32>
    tpu.vector_store %arg18[%c156, %c0_122], %95 {strides = array<i32>} : memref<300x196xf32, #tpu.memory_space<vmem>>, vector<12x196xf32>,
    %c0_123 = arith.constant 0 : index
    %c32_124 = arith.constant 32 : index
    %97 = vector.load %arg17[%c0_123, %c32_124] : memref<12x256xf32, #tpu.memory_space<vmem>>, vector<12x196xf32>
    %c168 = arith.constant 168 : index
    %c0_125 = arith.constant 0 : index
    %98 = vector.load %arg18[%c168, %c0_125] : memref<300x196xf32, #tpu.memory_space<vmem>>, vector<12x196xf32>
    tpu.vector_store %arg18[%c168, %c0_125], %97 {strides = array<i32>} : memref<300x196xf32, #tpu.memory_space<vmem>>, vector<12x196xf32>,
    %c0_126 = arith.constant 0 : index
    %c42_127 = arith.constant 42 : index
    %99 = vector.load %arg17[%c0_126, %c42_127] : memref<12x256xf32, #tpu.memory_space<vmem>>, vector<12x196xf32>
    %c180 = arith.constant 180 : index
    %c0_128 = arith.constant 0 : index
    %100 = vector.load %arg18[%c180, %c0_128] : memref<300x196xf32, #tpu.memory_space<vmem>>, vector<12x196xf32>
    tpu.vector_store %arg18[%c180, %c0_128], %99 {strides = array<i32>} : memref<300x196xf32, #tpu.memory_space<vmem>>, vector<12x196xf32>,
    %c0_129 = arith.constant 0 : index
    %c43 = arith.constant 43 : index
    %101 = vector.load %arg17[%c0_129, %c43] : memref<12x256xf32, #tpu.memory_space<vmem>>, vector<12x196xf32>
    %c192 = arith.constant 192 : index
    %c0_130 = arith.constant 0 : index
    %102 = vector.load %arg18[%c192, %c0_130] : memref<300x196xf32, #tpu.memory_space<vmem>>, vector<12x196xf32>
    tpu.vector_store %arg18[%c192, %c0_130], %101 {strides = array<i32>} : memref<300x196xf32, #tpu.memory_space<vmem>>, vector<12x196xf32>,
    %c0_131 = arith.constant 0 : index
    %c44_132 = arith.constant 44 : index
    %103 = vector.load %arg17[%c0_131, %c44_132] : memref<12x256xf32, #tpu.memory_space<vmem>>, vector<12x196xf32>
    %c204 = arith.constant 204 : index
    %c0_133 = arith.constant 0 : index
    %104 = vector.load %arg18[%c204, %c0_133] : memref<300x196xf32, #tpu.memory_space<vmem>>, vector<12x196xf32>
    tpu.vector_store %arg18[%c204, %c0_133], %103 {strides = array<i32>} : memref<300x196xf32, #tpu.memory_space<vmem>>, vector<12x196xf32>,
    %c0_134 = arith.constant 0 : index
    %c45 = arith.constant 45 : index
    %105 = vector.load %arg17[%c0_134, %c45] : memref<12x256xf32, #tpu.memory_space<vmem>>, vector<12x196xf32>
    %c216 = arith.constant 216 : index
    %c0_135 = arith.constant 0 : index
    %106 = vector.load %arg18[%c216, %c0_135] : memref<300x196xf32, #tpu.memory_space<vmem>>, vector<12x196xf32>
    tpu.vector_store %arg18[%c216, %c0_135], %105 {strides = array<i32>} : memref<300x196xf32, #tpu.memory_space<vmem>>, vector<12x196xf32>,
    %c0_136 = arith.constant 0 : index
    %c46_137 = arith.constant 46 : index
    %107 = vector.load %arg17[%c0_136, %c46_137] : memref<12x256xf32, #tpu.memory_space<vmem>>, vector<12x196xf32>
    %c228 = arith.constant 228 : index
    %c0_138 = arith.constant 0 : index
    %108 = vector.load %arg18[%c228, %c0_138] : memref<300x196xf32, #tpu.memory_space<vmem>>, vector<12x196xf32>
    tpu.vector_store %arg18[%c228, %c0_138], %107 {strides = array<i32>} : memref<300x196xf32, #tpu.memory_space<vmem>>, vector<12x196xf32>,
    %c0_139 = arith.constant 0 : index
    %c56 = arith.constant 56 : index
    %109 = vector.load %arg17[%c0_139, %c56] : memref<12x256xf32, #tpu.memory_space<vmem>>, vector<12x196xf32>
    %c240 = arith.constant 240 : index
    %c0_140 = arith.constant 0 : index
    %110 = vector.load %arg18[%c240, %c0_140] : memref<300x196xf32, #tpu.memory_space<vmem>>, vector<12x196xf32>
    tpu.vector_store %arg18[%c240, %c0_140], %109 {strides = array<i32>} : memref<300x196xf32, #tpu.memory_space<vmem>>, vector<12x196xf32>,
    %c0_141 = arith.constant 0 : index
    %c57 = arith.constant 57 : index
    %111 = vector.load %arg17[%c0_141, %c57] : memref<12x256xf32, #tpu.memory_space<vmem>>, vector<12x196xf32>
    %c252 = arith.constant 252 : index
    %c0_142 = arith.constant 0 : index
    %112 = vector.load %arg18[%c252, %c0_142] : memref<300x196xf32, #tpu.memory_space<vmem>>, vector<12x196xf32>
    tpu.vector_store %arg18[%c252, %c0_142], %111 {strides = array<i32>} : memref<300x196xf32, #tpu.memory_space<vmem>>, vector<12x196xf32>,
    %c0_143 = arith.constant 0 : index
    %c58 = arith.constant 58 : index
    %113 = vector.load %arg17[%c0_143, %c58] : memref<12x256xf32, #tpu.memory_space<vmem>>, vector<12x196xf32>
    %c264 = arith.constant 264 : index
    %c0_144 = arith.constant 0 : index
    %114 = vector.load %arg18[%c264, %c0_144] : memref<300x196xf32, #tpu.memory_space<vmem>>, vector<12x196xf32>
    tpu.vector_store %arg18[%c264, %c0_144], %113 {strides = array<i32>} : memref<300x196xf32, #tpu.memory_space<vmem>>, vector<12x196xf32>,
    %c0_145 = arith.constant 0 : index
    %c59 = arith.constant 59 : index
    %115 = vector.load %arg17[%c0_145, %c59] : memref<12x256xf32, #tpu.memory_space<vmem>>, vector<12x196xf32>
    %c276 = arith.constant 276 : index
    %c0_146 = arith.constant 0 : index
    %116 = vector.load %arg18[%c276, %c0_146] : memref<300x196xf32, #tpu.memory_space<vmem>>, vector<12x196xf32>
    tpu.vector_store %arg18[%c276, %c0_146], %115 {strides = array<i32>} : memref<300x196xf32, #tpu.memory_space<vmem>>, vector<12x196xf32>,
    %c0_147 = arith.constant 0 : index
    %c60_148 = arith.constant 60 : index
    %117 = vector.load %arg17[%c0_147, %c60_148] : memref<12x256xf32, #tpu.memory_space<vmem>>, vector<12x196xf32>
    %c288 = arith.constant 288 : index
    %c0_149 = arith.constant 0 : index
    %118 = vector.load %arg18[%c288, %c0_149] : memref<300x196xf32, #tpu.memory_space<vmem>>, vector<12x196xf32>
    tpu.vector_store %arg18[%c288, %c0_149], %117 {strides = array<i32>} : memref<300x196xf32, #tpu.memory_space<vmem>>, vector<12x196xf32>,
    %c0_150 = arith.constant 0 : index
    %c0_151 = arith.constant 0 : index
    %119 = vector.load %arg4[%c0_150, %c0_151] : memref<32x300xf32, #tpu.memory_space<vmem>>, vector<32x300xf32>
    %c0_152 = arith.constant 0 : index
    %c0_153 = arith.constant 0 : index
    %120 = vector.load %arg18[%c0_152, %c0_153] : memref<300x196xf32, #tpu.memory_space<vmem>>, vector<300x196xf32>
    %cst_154 = arith.constant dense<0.000000e+00> : vector<32x196xf32>
    %121 = tpu.matmul %119, %120, %cst_154 {dimension_numbers = #tpu.dot_dimension_numbers<[1], [0], [0], [1], [0, 0, 1, 1], [], []>} : vector<32x300xf32>, vector<300x196xf32>, vector<32x196xf32> -> vector<32x196xf32>
    %c0_155 = arith.constant 0 : index
    %c0_156 = arith.constant 0 : index
    %122 = vector.load %arg5[%c0_155, %c0_156] : memref<32x1xf32, #tpu.memory_space<vmem>>, vector<32x1xf32>
    %123 = vector.broadcast %122 : vector<32x1xf32> to vector<32x196xf32>
    %124 = arith.addf %121, %123 : vector<32x196xf32>
    %cst_157 = arith.constant 0.000000e+00 : f32
    %125 = vector.broadcast %cst_157 : f32 to vector<32x196xf32>
    %126 = arith.maximumf %124, %125 : vector<32x196xf32>
    %c0_158 = arith.constant 0 : index
    %c0_159 = arith.constant 0 : index
    %127 = vector.load %arg19[%c0_158, %c0_159] : memref<32x196xf32, #tpu.memory_space<vmem>>, vector<32x196xf32>
    tpu.vector_store %arg19[%c0_158, %c0_159], %126 {strides = array<i32>} : memref<32x196xf32, #tpu.memory_space<vmem>>, vector<32x196xf32>,
    %c0_160 = arith.constant 0 : index
    %c0_161 = arith.constant 0 : index
    %128 = vector.load %arg19[%c0_160, %c0_161] : memref<32x196xf32, #tpu.memory_space<vmem>>, vector<32x128xf32>
    %c0_162 = arith.constant 0 : index
    %c1_163 = arith.constant 1 : index
    %129 = vector.load %arg19[%c0_162, %c1_163] : memref<32x196xf32, #tpu.memory_space<vmem>>, vector<32x128xf32>
    %130 = arith.maximumf %128, %129 : vector<32x128xf32>
    %c0_164 = arith.constant 0 : index
    %c14_165 = arith.constant 14 : index
    %131 = vector.load %arg19[%c0_164, %c14_165] : memref<32x196xf32, #tpu.memory_space<vmem>>, vector<32x128xf32>
    %c0_166 = arith.constant 0 : index
    %c15_167 = arith.constant 15 : index
    %132 = vector.load %arg19[%c0_166, %c15_167] : memref<32x196xf32, #tpu.memory_space<vmem>>, vector<32x128xf32>
    %133 = arith.maximumf %131, %132 : vector<32x128xf32>
    %134 = arith.maximumf %130, %133 : vector<32x128xf32>
    %c0_168 = arith.constant 0 : index
    %c0_169 = arith.constant 0 : index
    %135 = vector.load %arg7[%c0_168, %c0_169] : memref<128x25xf32, #tpu.memory_space<vmem>>, vector<128x25xf32>
    %cst_170 = arith.constant dense<0.000000e+00> : vector<32x25xf32>
    %136 = tpu.matmul %134, %135, %cst_170 {dimension_numbers = #tpu.dot_dimension_numbers<[1], [0], [0], [1], [0, 0, 1, 1], [], []>} : vector<32x128xf32>, vector<128x25xf32>, vector<32x25xf32> -> vector<32x25xf32>
    %c0_171 = arith.constant 0 : index
    %c0_172 = arith.constant 0 : index
    %137 = vector.load %arg20[%c0_171, %c0_172] : memref<32x25xf32, #tpu.memory_space<vmem>>, vector<32x25xf32>
    tpu.vector_store %arg20[%c0_171, %c0_172], %136 {strides = array<i32>} : memref<32x25xf32, #tpu.memory_space<vmem>>, vector<32x25xf32>,
    %c0_173 = arith.constant 0 : index
    %c0_174 = arith.constant 0 : index
    %138 = vector.load %arg20[%c0_173, %c0_174] : memref<32x25xf32, #tpu.memory_space<vmem>>, vector<2x25xf32>
    %c0_175 = arith.constant 0 : index
    %c0_176 = arith.constant 0 : index
    %139 = vector.load %arg21[%c0_175, %c0_176] : memref<2x400xf32, #tpu.memory_space<vmem>>, vector<2x25xf32>
    tpu.vector_store %arg21[%c0_175, %c0_176], %138 {strides = array<i32>} : memref<2x400xf32, #tpu.memory_space<vmem>>, vector<2x25xf32>,
    %c2_177 = arith.constant 2 : index
    %c0_178 = arith.constant 0 : index
    %140 = vector.load %arg20[%c2_177, %c0_178] : memref<32x25xf32, #tpu.memory_space<vmem>>, vector<2x25xf32>
    %c0_179 = arith.constant 0 : index
    %c25 = arith.constant 25 : index
    %141 = vector.load %arg21[%c0_179, %c25] : memref<2x400xf32, #tpu.memory_space<vmem>>, vector<2x25xf32>
    tpu.vector_store %arg21[%c0_179, %c25], %140 {strides = array<i32>} : memref<2x400xf32, #tpu.memory_space<vmem>>, vector<2x25xf32>,
    %c4_180 = arith.constant 4 : index
    %c0_181 = arith.constant 0 : index
    %142 = vector.load %arg20[%c4_180, %c0_181] : memref<32x25xf32, #tpu.memory_space<vmem>>, vector<2x25xf32>
    %c0_182 = arith.constant 0 : index
    %c50 = arith.constant 50 : index
    %143 = vector.load %arg21[%c0_182, %c50] : memref<2x400xf32, #tpu.memory_space<vmem>>, vector<2x25xf32>
    tpu.vector_store %arg21[%c0_182, %c50], %142 {strides = array<i32>} : memref<2x400xf32, #tpu.memory_space<vmem>>, vector<2x25xf32>,
    %c6_183 = arith.constant 6 : index
    %c0_184 = arith.constant 0 : index
    %144 = vector.load %arg20[%c6_183, %c0_184] : memref<32x25xf32, #tpu.memory_space<vmem>>, vector<2x25xf32>
    %c0_185 = arith.constant 0 : index
    %c75 = arith.constant 75 : index
    %145 = vector.load %arg21[%c0_185, %c75] : memref<2x400xf32, #tpu.memory_space<vmem>>, vector<2x25xf32>
    tpu.vector_store %arg21[%c0_185, %c75], %144 {strides = array<i32>} : memref<2x400xf32, #tpu.memory_space<vmem>>, vector<2x25xf32>,
    %c8_186 = arith.constant 8 : index
    %c0_187 = arith.constant 0 : index
    %146 = vector.load %arg20[%c8_186, %c0_187] : memref<32x25xf32, #tpu.memory_space<vmem>>, vector<2x25xf32>
    %c0_188 = arith.constant 0 : index
    %c100_189 = arith.constant 100 : index
    %147 = vector.load %arg21[%c0_188, %c100_189] : memref<2x400xf32, #tpu.memory_space<vmem>>, vector<2x25xf32>
    tpu.vector_store %arg21[%c0_188, %c100_189], %146 {strides = array<i32>} : memref<2x400xf32, #tpu.memory_space<vmem>>, vector<2x25xf32>,
    %c10_190 = arith.constant 10 : index
    %c0_191 = arith.constant 0 : index
    %148 = vector.load %arg20[%c10_190, %c0_191] : memref<32x25xf32, #tpu.memory_space<vmem>>, vector<2x25xf32>
    %c0_192 = arith.constant 0 : index
    %c125 = arith.constant 125 : index
    %149 = vector.load %arg21[%c0_192, %c125] : memref<2x400xf32, #tpu.memory_space<vmem>>, vector<2x25xf32>
    tpu.vector_store %arg21[%c0_192, %c125], %148 {strides = array<i32>} : memref<2x400xf32, #tpu.memory_space<vmem>>, vector<2x25xf32>,
    %c12_193 = arith.constant 12 : index
    %c0_194 = arith.constant 0 : index
    %150 = vector.load %arg20[%c12_193, %c0_194] : memref<32x25xf32, #tpu.memory_space<vmem>>, vector<2x25xf32>
    %c0_195 = arith.constant 0 : index
    %c150 = arith.constant 150 : index
    %151 = vector.load %arg21[%c0_195, %c150] : memref<2x400xf32, #tpu.memory_space<vmem>>, vector<2x25xf32>
    tpu.vector_store %arg21[%c0_195, %c150], %150 {strides = array<i32>} : memref<2x400xf32, #tpu.memory_space<vmem>>, vector<2x25xf32>,
    %c14_196 = arith.constant 14 : index
    %c0_197 = arith.constant 0 : index
    %152 = vector.load %arg20[%c14_196, %c0_197] : memref<32x25xf32, #tpu.memory_space<vmem>>, vector<2x25xf32>
    %c0_198 = arith.constant 0 : index
    %c175 = arith.constant 175 : index
    %153 = vector.load %arg21[%c0_198, %c175] : memref<2x400xf32, #tpu.memory_space<vmem>>, vector<2x25xf32>
    tpu.vector_store %arg21[%c0_198, %c175], %152 {strides = array<i32>} : memref<2x400xf32, #tpu.memory_space<vmem>>, vector<2x25xf32>,
    %c16_199 = arith.constant 16 : index
    %c0_200 = arith.constant 0 : index
    %154 = vector.load %arg20[%c16_199, %c0_200] : memref<32x25xf32, #tpu.memory_space<vmem>>, vector<2x25xf32>
    %c0_201 = arith.constant 0 : index
    %c200 = arith.constant 200 : index
    %155 = vector.load %arg21[%c0_201, %c200] : memref<2x400xf32, #tpu.memory_space<vmem>>, vector<2x25xf32>
    tpu.vector_store %arg21[%c0_201, %c200], %154 {strides = array<i32>} : memref<2x400xf32, #tpu.memory_space<vmem>>, vector<2x25xf32>,
    %c18_202 = arith.constant 18 : index
    %c0_203 = arith.constant 0 : index
    %156 = vector.load %arg20[%c18_202, %c0_203] : memref<32x25xf32, #tpu.memory_space<vmem>>, vector<2x25xf32>
    %c0_204 = arith.constant 0 : index
    %c225 = arith.constant 225 : index
    %157 = vector.load %arg21[%c0_204, %c225] : memref<2x400xf32, #tpu.memory_space<vmem>>, vector<2x25xf32>
    tpu.vector_store %arg21[%c0_204, %c225], %156 {strides = array<i32>} : memref<2x400xf32, #tpu.memory_space<vmem>>, vector<2x25xf32>,
    %c20_205 = arith.constant 20 : index
    %c0_206 = arith.constant 0 : index
    %158 = vector.load %arg20[%c20_205, %c0_206] : memref<32x25xf32, #tpu.memory_space<vmem>>, vector<2x25xf32>
    %c0_207 = arith.constant 0 : index
    %c250 = arith.constant 250 : index
    %159 = vector.load %arg21[%c0_207, %c250] : memref<2x400xf32, #tpu.memory_space<vmem>>, vector<2x25xf32>
    tpu.vector_store %arg21[%c0_207, %c250], %158 {strides = array<i32>} : memref<2x400xf32, #tpu.memory_space<vmem>>, vector<2x25xf32>,
    %c22_208 = arith.constant 22 : index
    %c0_209 = arith.constant 0 : index
    %160 = vector.load %arg20[%c22_208, %c0_209] : memref<32x25xf32, #tpu.memory_space<vmem>>, vector<2x25xf32>
    %c0_210 = arith.constant 0 : index
    %c275 = arith.constant 275 : index
    %161 = vector.load %arg21[%c0_210, %c275] : memref<2x400xf32, #tpu.memory_space<vmem>>, vector<2x25xf32>
    tpu.vector_store %arg21[%c0_210, %c275], %160 {strides = array<i32>} : memref<2x400xf32, #tpu.memory_space<vmem>>, vector<2x25xf32>,
    %c24_211 = arith.constant 24 : index
    %c0_212 = arith.constant 0 : index
    %162 = vector.load %arg20[%c24_211, %c0_212] : memref<32x25xf32, #tpu.memory_space<vmem>>, vector<2x25xf32>
    %c0_213 = arith.constant 0 : index
    %c300 = arith.constant 300 : index
    %163 = vector.load %arg21[%c0_213, %c300] : memref<2x400xf32, #tpu.memory_space<vmem>>, vector<2x25xf32>
    tpu.vector_store %arg21[%c0_213, %c300], %162 {strides = array<i32>} : memref<2x400xf32, #tpu.memory_space<vmem>>, vector<2x25xf32>,
    %c26_214 = arith.constant 26 : index
    %c0_215 = arith.constant 0 : index
    %164 = vector.load %arg20[%c26_214, %c0_215] : memref<32x25xf32, #tpu.memory_space<vmem>>, vector<2x25xf32>
    %c0_216 = arith.constant 0 : index
    %c325 = arith.constant 325 : index
    %165 = vector.load %arg21[%c0_216, %c325] : memref<2x400xf32, #tpu.memory_space<vmem>>, vector<2x25xf32>
    tpu.vector_store %arg21[%c0_216, %c325], %164 {strides = array<i32>} : memref<2x400xf32, #tpu.memory_space<vmem>>, vector<2x25xf32>,
    %c28_217 = arith.constant 28 : index
    %c0_218 = arith.constant 0 : index
    %166 = vector.load %arg20[%c28_217, %c0_218] : memref<32x25xf32, #tpu.memory_space<vmem>>, vector<2x25xf32>
    %c0_219 = arith.constant 0 : index
    %c350 = arith.constant 350 : index
    %167 = vector.load %arg21[%c0_219, %c350] : memref<2x400xf32, #tpu.memory_space<vmem>>, vector<2x25xf32>
    tpu.vector_store %arg21[%c0_219, %c350], %166 {strides = array<i32>} : memref<2x400xf32, #tpu.memory_space<vmem>>, vector<2x25xf32>,
    %c30_220 = arith.constant 30 : index
    %c0_221 = arith.constant 0 : index
    %168 = vector.load %arg20[%c30_220, %c0_221] : memref<32x25xf32, #tpu.memory_space<vmem>>, vector<2x25xf32>
    %c0_222 = arith.constant 0 : index
    %c375 = arith.constant 375 : index
    %169 = vector.load %arg21[%c0_222, %c375] : memref<2x400xf32, #tpu.memory_space<vmem>>, vector<2x25xf32>
    tpu.vector_store %arg21[%c0_222, %c375], %168 {strides = array<i32>} : memref<2x400xf32, #tpu.memory_space<vmem>>, vector<2x25xf32>,
    %c0_223 = arith.constant 0 : index
    %c0_224 = arith.constant 0 : index
    %170 = vector.load %arg21[%c0_223, %c0_224] : memref<2x400xf32, #tpu.memory_space<vmem>>, vector<2x400xf32>
    %c0_225 = arith.constant 0 : index
    %c0_226 = arith.constant 0 : index
    %171 = vector.load %arg8[%c0_225, %c0_226] : memref<400x128xf32, #tpu.memory_space<vmem>>, vector<400x128xf32>
    %cst_227 = arith.constant dense<0.000000e+00> : vector<2x128xf32>
    %172 = tpu.matmul %170, %171, %cst_227 {dimension_numbers = #tpu.dot_dimension_numbers<[1], [0], [0], [1], [0, 0, 1, 1], [], []>} : vector<2x400xf32>, vector<400x128xf32>, vector<2x128xf32> -> vector<2x128xf32>
    %c0_228 = arith.constant 0 : index
    %c0_229 = arith.constant 0 : index
    %173 = vector.load %arg9[%c0_228, %c0_229] : memref<1x128xf32, #tpu.memory_space<vmem>>, vector<1x128xf32>
    %174 = vector.broadcast %173 : vector<1x128xf32> to vector<2x128xf32>
    %175 = arith.addf %172, %174 : vector<2x128xf32>
    %c0_230 = arith.constant 0 : index
    %c0_231 = arith.constant 0 : index
    %176 = vector.load %arg10[%c0_230, %c0_231] : memref<128x128xf32, #tpu.memory_space<vmem>>, vector<128x128xf32>
    %cst_232 = arith.constant dense<0.000000e+00> : vector<2x128xf32>
    %177 = tpu.matmul %175, %176, %cst_232 {dimension_numbers = #tpu.dot_dimension_numbers<[1], [0], [0], [1], [0, 0, 1, 1], [], []>} : vector<2x128xf32>, vector<128x128xf32>, vector<2x128xf32> -> vector<2x128xf32>
    %c0_233 = arith.constant 0 : index
    %c0_234 = arith.constant 0 : index
    %178 = vector.load %arg11[%c0_233, %c0_234] : memref<1x128xf32, #tpu.memory_space<vmem>>, vector<1x128xf32>
    %179 = vector.broadcast %178 : vector<1x128xf32> to vector<2x128xf32>
    %180 = arith.addf %177, %179 : vector<2x128xf32>
    %c0_235 = arith.constant 0 : index
    %c0_236 = arith.constant 0 : index
    %181 = vector.load %arg12[%c0_235, %c0_236] : memref<128x128xf32, #tpu.memory_space<vmem>>, vector<128x128xf32>
    %cst_237 = arith.constant dense<0.000000e+00> : vector<2x128xf32>
    %182 = tpu.matmul %180, %181, %cst_237 {dimension_numbers = #tpu.dot_dimension_numbers<[1], [0], [0], [1], [0, 0, 1, 1], [], []>} : vector<2x128xf32>, vector<128x128xf32>, vector<2x128xf32> -> vector<2x128xf32>
    %c0_238 = arith.constant 0 : index
    %c0_239 = arith.constant 0 : index
    %183 = vector.load %arg13[%c0_238, %c0_239] : memref<1x128xf32, #tpu.memory_space<vmem>>, vector<1x128xf32>
    %184 = vector.broadcast %183 : vector<1x128xf32> to vector<2x128xf32>
    %185 = arith.addf %182, %184 : vector<2x128xf32>
    %186 = vector.extract_strided_slice %185 {offsets = [0, 0], sizes = [2, 10], strides = [1, 1]} : vector<2x128xf32> to vector<2x10xf32>
    %c0_240 = arith.constant 0 : index
    %c0_241 = arith.constant 0 : index
    %187 = vector.load %arg14[%c0_240, %c0_241] : memref<2x10xf32, #tpu.memory_space<vmem>>, vector<2x10xf32>
    tpu.vector_store %arg14[%c0_240, %c0_241], %186 {strides = array<i32>} : memref<2x10xf32, #tpu.memory_space<vmem>>, vector<2x10xf32>,
    return
  }
  func.func @transform_0(%arg0: i32) -> (i32, i32) {
    %c0_i32 = arith.constant 0 : i32
    %c0_i32_0 = arith.constant 0 : i32
    return %arg0, %c0_i32 : i32, i32
  }
  func.func @transform_1(%arg0: i32) -> (i32, i32) {
    %c0_i32 = arith.constant 0 : i32
    %c0_i32_0 = arith.constant 0 : i32
    %c0_i32_1 = arith.constant 0 : i32
    return %c0_i32, %c0_i32_0 : i32, i32
  }
  func.func @transform_2(%arg0: i32) -> (i32, i32) {
    %c0_i32 = arith.constant 0 : i32
    %c0_i32_0 = arith.constant 0 : i32
    %c0_i32_1 = arith.constant 0 : i32
    return %c0_i32, %c0_i32_0 : i32, i32
  }
  func.func @transform_3(%arg0: i32) -> (i32, i32) {
    %c0_i32 = arith.constant 0 : i32
    %c0_i32_0 = arith.constant 0 : i32
    %c0_i32_1 = arith.constant 0 : i32
    return %c0_i32, %c0_i32_0 : i32, i32
  }
  func.func @transform_4(%arg0: i32) -> (i32, i32) {
    %c0_i32 = arith.constant 0 : i32
    %c0_i32_0 = arith.constant 0 : i32
    %c0_i32_1 = arith.constant 0 : i32
    return %c0_i32, %c0_i32_0 : i32, i32
  }
  func.func @transform_5(%arg0: i32) -> (i32, i32) {
    %c0_i32 = arith.constant 0 : i32
    %c0_i32_0 = arith.constant 0 : i32
    %c0_i32_1 = arith.constant 0 : i32
    return %c0_i32, %c0_i32_0 : i32, i32
  }
  func.func @transform_6(%arg0: i32) -> (i32, i32) {
    %c0_i32 = arith.constant 0 : i32
    %c0_i32_0 = arith.constant 0 : i32
    %c0_i32_1 = arith.constant 0 : i32
    return %c0_i32, %c0_i32_0 : i32, i32
  }
  func.func @transform_7(%arg0: i32) -> (i32, i32) {
    %c0_i32 = arith.constant 0 : i32
    %c0_i32_0 = arith.constant 0 : i32
    %c0_i32_1 = arith.constant 0 : i32
    return %c0_i32, %c0_i32_0 : i32, i32
  }
  func.func @transform_8(%arg0: i32) -> (i32, i32) {
    %c0_i32 = arith.constant 0 : i32
    %c0_i32_0 = arith.constant 0 : i32
    %c0_i32_1 = arith.constant 0 : i32
    return %c0_i32, %c0_i32_0 : i32, i32
  }
  func.func @transform_9(%arg0: i32) -> (i32, i32) {
    %c0_i32 = arith.constant 0 : i32
    %c0_i32_0 = arith.constant 0 : i32
    %c0_i32_1 = arith.constant 0 : i32
    return %c0_i32, %c0_i32_0 : i32, i32
  }
  func.func @transform_10(%arg0: i32) -> (i32, i32) {
    %c0_i32 = arith.constant 0 : i32
    %c0_i32_0 = arith.constant 0 : i32
    %c0_i32_1 = arith.constant 0 : i32
    return %c0_i32, %c0_i32_0 : i32, i32
  }
  func.func @transform_11(%arg0: i32) -> (i32, i32) {
    %c0_i32 = arith.constant 0 : i32
    %c0_i32_0 = arith.constant 0 : i32
    %c0_i32_1 = arith.constant 0 : i32
    return %c0_i32, %c0_i32_0 : i32, i32
  }
  func.func @transform_12(%arg0: i32) -> (i32, i32) {
    %c0_i32 = arith.constant 0 : i32
    %c0_i32_0 = arith.constant 0 : i32
    %c0_i32_1 = arith.constant 0 : i32
    return %c0_i32, %c0_i32_0 : i32, i32
  }
  func.func @transform_13(%arg0: i32) -> (i32, i32) {
    %c0_i32 = arith.constant 0 : i32
    %c0_i32_0 = arith.constant 0 : i32
    return %arg0, %c0_i32 : i32, i32
  }
}

</mosaic_0001>

<bundles_post_ra>
// kernel: tile.8
= control target key start
LH: loop header
LB: loop body
LE: loop exit
PB: predicated region body
PF: predicated region fallthrough
CT: control target
= control target key end

     0   :  { %s22_s0 = inlined_call_operand.vmem [shape: f32[6], index: 0, kind: input, shape index: {}]   ;;  %s23_s1 = inlined_call_operand.vmem [shape: f32[2,6], index: 1, kind: output, shape index: {}]  }
   0x1   :  { %v4_v0 = vld [vmem:[%s22_s0] ss:$0 sm:$0xff] }
   0x2   :  { %5 = vst [vmem:[%s23_s1] sm:$0x3] %v4_v0 }

// kernel: tile.0
= control target key start
LH: loop header
LB: loop body
LE: loop exit
PB: predicated region body
PF: predicated region fallthrough
CT: control target
= control target key end

     0   :  { %s50_s8 = smov 125   ;;  %vm7_vm0 = vcmask 7168   ;;  %s51_s11 = smov 126   ;;  %s91_s0 = inlined_call_operand.vmem [shape: f32[2,6], index: 0, kind: input, shape index: {}]   ;;  %s92_s1 = inlined_call_operand.vmem [shape: f32[12,1], index: 1, kind: output, shape index: {}]  }
   0x1   :  { %v4_v0 = vld [vmem:[%s91_s0] sm:$0x3]  ;;  %s49_s0 = smov 127   ;;  %s52_s12 = smov 124  }
   0x2   :  { %5 = vst [vmem:[#allocation0] sm:$0x3] %v4_v0  ;;  %s53_s13 = smov 123  }
   0x9   :  { %v9_v1 = vld [vmem:[#allocation0] sm:$0x3]  }
   0xa   :  { %v21_v2 = vld [vmem:[#allocation0] sm:$0x3]   ;;  %10 = vrot.lane.b32.xlu0 %v9_v1, %s49_s0 }
   0xb   :  { %22 = vrot.lane.b32.xlu1 %v21_v2, %s50_s8  ;;  %v6_v3 = vld [vmem:[#allocation0] sm:$0x3]  }
   0xc   :  { %v15_v4 = vld [vmem:[#allocation0] sm:$0x3]   ;;  %8 = vst.msk [vmem:[%s92_s1] ss:$6 sm:$0x3] %vm7_vm0, %v6_v3  }
   0xd   :  { %v27_v5 = vld [vmem:[#allocation0] sm:$0x3]  }
   0xe   :  { %16 = vrot.lane.b32.xlu0 %v15_v4, %s51_s11  ;;  %v33_v6 = vld [vmem:[#allocation0] sm:$0x3]  }
   0xf   :  { %28 = vrot.lane.b32.xlu1 %v27_v5, %s52_s12 }
  0x12   :  { %34 = vrot.lane.b32.xlu0 %v33_v6, %s53_s13 }
  0x7c   :  { %v11_v7 = vpop.permute.xlu0 %10  }
  0x7d   :  { %v23_v8 = vpop.permute.xlu1 %22   ;;  %39 = vst.msk [vmem:[%s92_s1 + $0x1] ss:$6 sm:$0x3] %vm7_vm0, %v11_v7  }
  0x7e   :  { %41 = vst.msk [vmem:[%s92_s1 + $0x3] ss:$6 sm:$0x3] %vm7_vm0, %v23_v8  }
  0x80   :  { %v17_v9 = vpop.permute.xlu0 %16  }
  0x81   :  { %v29_v10 = vpop.permute.xlu1 %28   ;;  %40 = vst.msk [vmem:[%s92_s1 + $0x2] ss:$6 sm:$0x3] %vm7_vm0, %v17_v9  }
  0x82   :  { %42 = vst.msk [vmem:[%s92_s1 + $0x4] ss:$6 sm:$0x3] %vm7_vm0, %v29_v10  }
  0x84   :  { %v35_v11 = vpop.permute.xlu0 %34  }
  0x85   :  { %43 = vst.msk [vmem:[%s92_s1 + $0x5] ss:$6 sm:$0x3] %vm7_vm0, %v35_v11  }

// kernel: net_forward.1
= control target key start
LH: loop header
LB: loop body
LE: loop exit
PB: predicated region body
PF: predicated region fallthrough
CT: control target
= control target key end

     0   :  { %v53_v0 = vlaneseq  ;;  %v6303_v3 = vmov 1983009808   ;;  %s6304_s29 = smov 126   ;;  %s6305_s30 = smov 127   ;;  %s9333_s0 = inlined_call_operand.vmem [shape: f32[2,1280], index: 0, kind: input, shape index: {}]   ;;  %s9334_s1 = inlined_call_operand.vmem [shape: f32[12,50], index: 1, kind: input, shape index: {}]   ;;  %s9335_s2 = inlined_call_operand.vmem [shape: f32[12,1], index: 2, kind: input, shape index: {}]   ;;  %s9336_s3 = inlined_call_operand.vmem [shape: f32[32,300], index: 3, kind: input, shape index: {}]   ;;  %s9337_s4 = inlined_call_operand.vmem [shape: f32[32,1], index: 4, kind: input, shape index: {}]   ;;  %s9338_s5 = inlined_call_operand.vmem [shape: f32[896,256], index: 5, kind: input, shape index: {}]   ;;  %s9339_s6 = inlined_call_operand.vmem [shape: f32[128,25], index: 6, kind: input, shape index: {}]   ;;  %s9340_s7 = inlined_call_operand.vmem [shape: f32[400,128], index: 7, kind: input, shape index: {}]   ;;  %s9341_s8 = inlined_call_operand.vmem [shape: f32[1,128], index: 8, kind: input, shape index: {}]   ;;  %s9342_s9 = inlined_call_operand.vmem [shape: f32[128,128], index: 9, kind: input, shape index: {}]   ;;  %s9343_s10 = inlined_call_operand.vmem [shape: f32[1,128], index: 10, kind: input, shape index: {}]   ;;  %s9344_s11 = inlined_call_operand.vmem [shape: f32[128,128], index: 11, kind: input, shape index: {}]   ;;  %s9345_s12 = inlined_call_operand.vmem [shape: f32[1,128], index: 12, kind: input, shape index: {}]   ;;  %s9346_s13 = inlined_call_operand.hbm [shape: f32[2,10], index: 13, kind: output, shape index: {}]  }
   0x1   :  { %v190_v1 = vld [vmem:[%s9333_s0] sm:$0xff]  ;;  %v51_v4 = vunpack.c.l.s4 %v6303_v3 }
   0x2   :  { %v6433_v2 = vld [vmem:[%s9333_s0 + $0x2] sm:$0xff]  ;;  %v196_v5 = vcombine.high %v190_v1, %v190_v1  ;;  %5317 = vst.sshfl [vmem:[#allocation2] sm:$0x3 pattern:$0x76325410] %v190_v1  ;;  %v54_v6 = vshrl.u32 %v53_v0, 7  ;;  %v105_v9 = vcombine.low %v190_v1, %v190_v1 }
   0x3   :  { %5330 = vst.sshfl [vmem:[#allocation2 + $0x140] sm:$0x3 pattern:$0x76325410] %v6433_v2  ;;  %v52_v7 = vunpack.c.0.s8 %v51_v4 }
   0x4   :  { %5318 = vst.sshfl [vmem:[#allocation2 + $0x10] sm:$0x3 pattern:$0x76325410] %v196_v5 }
   0x5   :  { %v6436_v8 = vsub.s32 %v52_v7, %v54_v6 }
   0x7   :  { %v6439_v10 = vrot.slane %v190_v1, %v6436_v8  ;;  %v6442_v11 = vrot.slane %v196_v5, %v6436_v8  ;;  %v6449_v12 = vrot.slane %v105_v9, %v6436_v8 }
   0x9   :  { %240 = vrot.lane.b32.xlu1 %v6439_v10, %s6304_s29  ;;  %151 = vrot.lane.b32.xlu0 %v6439_v10, %s6305_s30  ;;  %v6453_v13 = vcombine.low %v6442_v11, %v6442_v11 }
   0xa   :  { %18 = vsyncpa [#allocation10], 0  ;;  %v6457_v14 = vcombine.low %v6439_v10, %v6439_v10  ;;  %s6306_s14 = smov 125   ;;  %v120_v15 = vcombine.high %v6449_v12, %v6449_v12  ;;  %v6467_v16 = vcombine.high %v6439_v10, %v6439_v10  ;;  %s9382_s15 = smov 124   ;;  %v6494_v17 = vcombine.low %v6449_v12, %v6449_v12  ;;  %v6616_v32 = vld [vmem:[%s9333_s0 + $0x8] sm:$0xff] }
   0xb   :  { %s9373_s16 = smov 96   ;;  %s9371_s17 = smov 95   ;;  %v1889_v18 = vcombine.low %v6433_v2, %v6433_v2  ;;  %v6570_v21 = vcombine.high %v6433_v2, %v6433_v2  ;;  %v6574_v22 = vrot.slane %v6433_v2, %v6436_v8  ;;  %vm256_vm0 = vcmask 1031168  }
   0xc   :  { %92 = vst [vmem:[#allocation2 + $0x8] sm:$0x3] %v6467_v16  ;;  %s9368_s18 = smov 94   ;;  %s9366_s19 = smov 93   ;;  %vm348_vm1 = vcmask 1022976   ;;  %vm165_vm2 = vcmask 1039360   ;;  %v122_v38 = vcombine.low %v6616_v32, %v6616_v32  ;;  %v6636_v42 = vcombine.high %v6442_v11, %v6442_v11 }
   0xd   :  { %242 = vrot.lane.b32.xlu1 %v6453_v13, %s6304_s29  ;;  %332 = vrot.lane.b32.xlu0 %v6449_v12, %s6306_s14  ;;  %s9361_s20 = smov 92   ;;  %s9359_s21 = smov 64   ;;  %v1896_v19 = vrot.slane %v1889_v18, %v6436_v8  ;;  %v6578_v23 = vcombine.high %v6574_v22, %v6574_v22  ;;  %v6585_v24 = vrot.slane %v6570_v21, %v6436_v8  ;;  %vm438_vm3 = vcmask 1014784  }
   0xe   :  { %s9357_s22 = smov 63   ;;  %s9355_s23 = smov 62   ;;  %v2085_v26 = vcombine.low %v6574_v22, %v6574_v22  ;;  %vm9385_vm4 = vcmask 785408   ;;  %v6641_v43 = vrot.slane %v122_v38, %v6436_v8  ;;  %v6645_v44 = vrot.slane %v6616_v32, %v6436_v8  ;;  %94 = vst [vmem:[#allocation2 + $0x18] sm:$0x3] %v6636_v42 }
   0xf   :  { %s9349_s24 = smov 61   ;;  %s9347_s25 = smov 60   ;;  %v1904_v20 = vcombine.high %v1896_v19, %v1896_v19  ;;  %1876 = vst [vmem:[#allocation2 + $0x148] sm:$0x3] %v6578_v23  ;;  %v1995_v25 = vcombine.low %v6585_v24, %v6585_v24  ;;  %v2084_v37 = vcombine.low %v1896_v19, %v1896_v19  ;;  %vm620_vm5 = vcmask 777216  }
  0x10   :  { %s9353_s26 = smov 32   ;;  %s9351_s27 = smov 31   ;;  %v6658_v48 = vcombine.low %v6645_v44, %v6645_v44  ;;  %vm9370_vm6 = vcmask 769024   ;;  %v6670_v52 = vcombine.low %v6641_v43, %v6641_v43  ;;  %vm9375_vm7 = vcmask 760832  }
  0x11   :  { %334 = vrot.lane.b32.xlu1 %v6457_v14, %s6306_s14  ;;  %149 = vrot.lane.b32.xlu0 %v120_v15, %s6305_s30  ;;  %s6320_s28 = smov 30   ;;  %vm893_vm8 = vcmask 752640   ;;  %vm9376_vm9 = vcmask 523264   ;;  %vm1076_vm10 = vcmask 515072   ;;  %vm9377_vm11 = vcmask 506880  }
  0x12   :  { %vm9365_vm12 = vcmask 498688   ;;  %vm9364_vm13 = vcmask 490496   ;;  %vm9363_vm14 = vcmask 261120   ;;  %vm1530_vm15 = vcmask 252928  }
  0x13   :  { %5331 = vst.sshfl [vmem:[#allocation2 + $0x150] sm:$0x3 pattern:$0x76325410] %v6570_v21 }
  0x15   :  { %424 = vrot.lane.b32.xlu1 %v6442_v11, %s9382_s15  ;;  %422 = vrot.lane.b32.xlu0 %v6467_v16, %s9382_s15 }
  0x19   :  { %515 = vrot.lane.b32.xlu1 %v6439_v10, %s9373_s16  ;;  %513 = vrot.lane.b32.xlu0 %v120_v15, %s9373_s16 }
  0x1d   :  { %606 = vrot.lane.b32.xlu1 %v6453_v13, %s9371_s17  ;;  %604 = vrot.lane.b32.xlu0 %v6439_v10, %s9371_s17 }
  0x21   :  { %698 = vrot.lane.b32.xlu1 %v6457_v14, %s9368_s18  ;;  %696 = vrot.lane.b32.xlu0 %v6449_v12, %s9368_s18 }
  0x25   :  { %238 = vrot.lane.b32.xlu1 %v6457_v14, %s6304_s29  ;;  %147 = vrot.lane.b32.xlu0 %v6449_v12, %s6305_s30 }
  0x29   :  { %420 = vrot.lane.b32.xlu1 %v6439_v10, %s9382_s15  ;;  %330 = vrot.lane.b32.xlu0 %v6494_v17, %s6306_s14 }
  0x2d   :  { %602 = vrot.lane.b32.xlu1 %v6457_v14, %s9371_s17  ;;  %511 = vrot.lane.b32.xlu0 %v6449_v12, %s9373_s16 }
  0x31   :  { %786 = vrot.lane.b32.xlu1 %v6467_v16, %s9366_s19  ;;  %694 = vrot.lane.b32.xlu0 %v6494_v17, %s9368_s18 }
  0x35   :  { %877 = vrot.lane.b32.xlu1 %v120_v15, %s9361_s20  ;;  %788 = vrot.lane.b32.xlu0 %v6442_v11, %s9366_s19 }
  0x39   :  { %968 = vrot.lane.b32.xlu1 %v6439_v10, %s9359_s21  ;;  %879 = vrot.lane.b32.xlu0 %v6439_v10, %s9361_s20 }
  0x3d   :  { %1060 = vrot.lane.b32.xlu1 %v6449_v12, %s9357_s22  ;;  %970 = vrot.lane.b32.xlu0 %v6453_v13, %s9359_s21 }
  0x41   :  { %1150 = vrot.lane.b32.xlu1 %v6467_v16, %s9355_s23  ;;  %1062 = vrot.lane.b32.xlu0 %v6457_v14, %s9357_s22 }
  0x45   :  { %1241 = vrot.lane.b32.xlu1 %v120_v15, %s9349_s24  ;;  %1152 = vrot.lane.b32.xlu0 %v6442_v11, %s9355_s23 }
  0x49   :  { %1332 = vrot.lane.b32.xlu1 %v6439_v10, %s9347_s25  ;;  %1243 = vrot.lane.b32.xlu0 %v6439_v10, %s9349_s24 }
  0x4d   :  { %1424 = vrot.lane.b32.xlu1 %v6449_v12, %s9353_s26  ;;  %1334 = vrot.lane.b32.xlu0 %v6453_v13, %s9347_s25 }
  0x51   :  { %784 = vrot.lane.b32.xlu1 %v6439_v10, %s9366_s19  ;;  %1426 = vrot.lane.b32.xlu0 %v6457_v14, %s9353_s26 }
  0x55   :  { %966 = vrot.lane.b32.xlu1 %v6457_v14, %s9359_s21  ;;  %875 = vrot.lane.b32.xlu0 %v6449_v12, %s9361_s20 }
  0x59   :  { %1148 = vrot.lane.b32.xlu1 %v6439_v10, %s9355_s23  ;;  %1058 = vrot.lane.b32.xlu0 %v6494_v17, %s9357_s22 }
  0x5d   :  { %1330 = vrot.lane.b32.xlu1 %v6457_v14, %s9347_s25  ;;  %1239 = vrot.lane.b32.xlu0 %v6449_v12, %s9349_s24  ;;  %s9380_s25 = smov 29   ;;  %s9378_s24 = smov 28  }
  0x61   :  { %1514 = vrot.lane.b32.xlu1 %v6467_v16, %s9351_s27  ;;  %1422 = vrot.lane.b32.xlu0 %v6494_v17, %s9353_s26  ;;  %s9393_s26 = smov 61  }
  0x65   :  { %1605 = vrot.lane.b32.xlu1 %v120_v15, %s6320_s28  ;;  %1516 = vrot.lane.b32.xlu0 %v6442_v11, %s9351_s27 }
  0x69   :  { %1696 = vrot.lane.b32.xlu1 %v6439_v10, %s9380_s25  ;;  %1607 = vrot.lane.b32.xlu0 %v6439_v10, %s6320_s28 }
  0x6d   :  { %1788 = vrot.lane.b32.xlu1 %v6449_v12, %s9378_s24  ;;  %1698 = vrot.lane.b32.xlu0 %v6453_v13, %s9380_s25 }
  0x71   :  { %1933 = vrot.lane.b32.xlu1 %v1904_v20, %s6305_s30  ;;  %1790 = vrot.lane.b32.xlu0 %v6457_v14, %s9378_s24 }
  0x75   :  { %2023 = vrot.lane.b32.xlu1 %v6574_v22, %s6304_s29  ;;  %1935 = vrot.lane.b32.xlu0 %v6574_v22, %s6305_s30 }
  0x79   :  { %2114 = vrot.lane.b32.xlu1 %v1896_v19, %s6306_s14  ;;  %2025 = vrot.lane.b32.xlu0 %v1995_v25, %s6304_s29 }
  0x7b   :  { %v241_v27 = vpop.permute.xlu1 %240  ;;  %v6598_v28 = vpop.permute.xlu0 %151 }
  0x7d   :  { %1512 = vrot.lane.b32.xlu1 %v6439_v10, %s9351_s27  ;;  %2116 = vrot.lane.b32.xlu0 %v2085_v26, %s6306_s14  ;;  %s9394_s27 = smov 60  }
  0x7f   :  { %v6603_v29 = vpop.permute.xlu1 %242  ;;  %v6605_v30 = vpop.permute.xlu0 %332 }
  0x80   :  { %v258_v31 = vsel %vm256_vm0, %v241_v27, %v6603_v29 }
  0x81   :  { %274 = vst [vmem:[#allocation2 + $0x8] sm:$0x30] %v258_v31  ;;  %1694 = vrot.lane.b32.xlu1 %v6457_v14, %s9380_s25  ;;  %1603 = vrot.lane.b32.xlu0 %v6449_v12, %s6320_s28 }
  0x83   :  { %v6618_v33 = vpop.permute.xlu1 %334  ;;  %v150_v34 = vpop.permute.xlu0 %149 }
  0x84   :  { %v350_v35 = vsel %vm348_vm1, %v6605_v30, %v6618_v33  ;;  %v167_v36 = vsel %vm165_vm2, %v150_v34, %v6598_v28 }
  0x85   :  { %366 = vst [vmem:[#allocation2 + $0x8] sm:$0xc0] %v350_v35  ;;  %183 = vst [vmem:[#allocation2 + $0x8] sm:$0xc] %v167_v36  ;;  %1931 = vrot.lane.b32.xlu1 %v1896_v19, %s6305_s30  ;;  %1786 = vrot.lane.b32.xlu0 %v6494_v17, %s9378_s24  ;;  %v6323_v19 = vmov 0.0  }
  0x86   :  { %2409 = vmatprep.mubr.f32.mxu0 %v6323_v19  ;;  %2640 = vmatprep.mubr.f32.mxu1 %v6323_v19 }
  0x87   :  { %v6630_v39 = vpop.permute.xlu1 %424  ;;  %v423_v40 = vpop.permute.xlu0 %422 }
  0x88   :  { %v440_v41 = vsel %vm438_vm3, %v423_v40, %v6630_v39 }
  0x89   :  { %456 = vst [vmem:[#allocation2 + $0x48] sm:$0x3] %v440_v41  ;;  %2112 = vrot.lane.b32.xlu1 %v2084_v37, %s6306_s14  ;;  %2021 = vrot.lane.b32.xlu0 %v2085_v26, %s6304_s29 }
  0x8b   :  { %v6648_v45 = vpop.permute.xlu1 %515  ;;  %v514_v46 = vpop.permute.xlu0 %513 }
  0x8c   :  { %v531_v47 = vsel %vm9385_vm4, %v514_v46, %v6648_v45  ;;  %v2246_v0 = vld [vmem:[#allocation2 + $0x8] sm:$0xff] }
  0x8d   :  { %547 = vst [vmem:[#allocation2 + $0x48] sm:$0xc] %v531_v47  ;;  %155 = vrot.lane.b32.xlu1 %v6641_v43, %s6305_s30  ;;  %153 = vrot.lane.b32.xlu0 %v6467_v16, %s6305_s30 }
  0x8f   :  { %v6660_v49 = vpop.permute.xlu1 %606  ;;  %v605_v50 = vpop.permute.xlu0 %604 }
  0x90   :  { %v622_v51 = vsel %vm620_vm5, %v605_v50, %v6660_v49 }
  0x91   :  { %638 = vst [vmem:[#allocation2 + $0x48] sm:$0x30] %v622_v51  ;;  %246 = vrot.lane.b32.xlu1 %v6658_v48, %s6304_s29  ;;  %244 = vrot.lane.b32.xlu0 %v6442_v11, %s6304_s29 }
  0x93   :  { %v6672_v53 = vpop.permute.xlu1 %698  ;;  %v697_v54 = vpop.permute.xlu0 %696 }
  0x94   :  { %v714_v55 = vsel %vm9370_vm6, %v697_v54, %v6672_v53 }
  0x95   :  { %730 = vst [vmem:[#allocation2 + $0x48] sm:$0xc0] %v714_v55  ;;  %338 = vrot.lane.b32.xlu1 %v6670_v52, %s6306_s14  ;;  %336 = vrot.lane.b32.xlu0 %v6439_v10, %s6306_s14 }
  0x97   :  { %v239_v56 = vpop.permute.xlu1 %238  ;;  %v148_v57 = vpop.permute.xlu0 %147 }
  0x98   :  { %v257_v58 = vsel %vm256_vm0, %v239_v56, %v241_v27  ;;  %v166_v59 = vsel %vm165_vm2, %v148_v57, %v150_v34 }
  0x99   :  { %273 = vst [vmem:[#allocation2] sm:$0x30] %v257_v58  ;;  %182 = vst [vmem:[#allocation2] sm:$0xc] %v166_v59  ;;  %428 = vrot.lane.b32.xlu1 %v6645_v44, %s9382_s15  ;;  %426 = vrot.lane.b32.xlu0 %v6636_v42, %s9382_s15 }
  0x9b   :  { %v421_v60 = vpop.permute.xlu1 %420  ;;  %v331_v61 = vpop.permute.xlu0 %330 }
  0x9c   :  { %v439_v62 = vsel %vm438_vm3, %v421_v60, %v423_v40  ;;  %v349_v63 = vsel %vm348_vm1, %v331_v61, %v6605_v30  ;;  %v2254_v1 = vld [vmem:[#allocation2 + $0x48] sm:$0xff] }
  0x9d   :  { %455 = vst [vmem:[#allocation2 + $0x40] sm:$0x3] %v439_v62  ;;  %365 = vst [vmem:[#allocation2] sm:$0xc0] %v349_v63  ;;  %519 = vrot.lane.b32.xlu1 %v6641_v43, %s9373_s16  ;;  %517 = vrot.lane.b32.xlu0 %v6467_v16, %s9373_s16  ;;  %v5574_v2 = vpack.c.bf16 %v2254_v1, %v2246_v0 }
  0x9f   :  { %v603_v3 = vpop.permute.xlu1 %602  ;;  %v512_v4 = vpop.permute.xlu0 %511  ;;  %5575 = vmatprep.subr.bf16.mxu0 %v5574_v2 }
  0xa0   :  { %v621_v5 = vsel %vm620_vm5, %v603_v3, %v605_v50  ;;  %v530_v6 = vsel %vm9385_vm4, %v512_v4, %v514_v46 }
  0xa1   :  { %637 = vst [vmem:[#allocation2 + $0x40] sm:$0x30] %v621_v5  ;;  %546 = vst [vmem:[#allocation2 + $0x40] sm:$0xc] %v530_v6  ;;  %610 = vrot.lane.b32.xlu1 %v6658_v48, %s9371_s17  ;;  %608 = vrot.lane.b32.xlu0 %v6442_v11, %s9371_s17 }
  0xa3   :  { %v6699_v7 = vpop.permute.xlu1 %786  ;;  %v695_v9 = vpop.permute.xlu0 %694 }
  0xa4   :  { %v713_v12 = vsel %vm9370_vm6, %v695_v9, %v697_v54  ;;  %v2245_v25 = vld [vmem:[#allocation2] sm:$0xff] }
  0xa5   :  { %729 = vst [vmem:[#allocation2 + $0x40] sm:$0xc0] %v713_v12  ;;  %702 = vrot.lane.b32.xlu1 %v6670_v52, %s9368_s18  ;;  %700 = vrot.lane.b32.xlu0 %v6439_v10, %s9368_s18 }
  0xa7   :  { %v6706_v13 = vpop.permute.xlu1 %877  ;;  %v6708_v14 = vpop.permute.xlu0 %788 }
  0xa8   :  { %v804_v15 = vsel %vm9375_vm7, %v6699_v7, %v6708_v14 }
  0xa9   :  { %820 = vst [vmem:[#allocation2 + $0x88] sm:$0x3] %v804_v15  ;;  %2205 = vrot.lane.b32.xlu1 %v6585_v24, %s9382_s15  ;;  %2203 = vrot.lane.b32.xlu0 %v6578_v23, %s9382_s15 }
  0xab   :  { %v969_v17 = vpop.permute.xlu1 %968  ;;  %v6717_v18 = vpop.permute.xlu0 %879 }
  0xac   :  { %v895_v20 = vsel %vm893_vm8, %v6706_v13, %v6717_v18  ;;  %v2253_v26 = vld [vmem:[#allocation2 + $0x40] sm:$0xff] }
  0xad   :  { %911 = vst [vmem:[#allocation2 + $0x88] sm:$0xc] %v895_v20  ;;  %790 = vrot.lane.b32.xlu1 %v6636_v42, %s9366_s19  ;;  %2201 = vrot.lane.b32.xlu0 %v6574_v22, %s9382_s15  ;;  %v5576_v27 = vpack.c.bf16 %v2253_v26, %v2245_v25 }
  0xaf   :  { %v1061_v30 = vpop.permute.xlu1 %1060  ;;  %v6728_v31 = vpop.permute.xlu0 %970  ;;  %5577 = vmatpush1.bf16.msra.mxu0 %v5576_v27 }
  0xb0   :  { %v986_v34 = vsel %vm9376_vm9, %v969_v17, %v6728_v31 }
  0xb1   :  { %1002 = vst [vmem:[#allocation2 + $0x88] sm:$0x30] %v986_v34  ;;  %881 = vrot.lane.b32.xlu1 %v6467_v16, %s9361_s20  ;;  %792 = vrot.lane.b32.xlu0 %v6645_v44, %s9366_s19 }
  0xb3   :  { %v1151_v35 = vpop.permute.xlu1 %1150  ;;  %v6736_v36 = vpop.permute.xlu0 %1062 }
  0xb4   :  { %v1078_v37 = vsel %vm1076_vm10, %v1061_v30, %v6736_v36 }
  0xb5   :  { %1094 = vst [vmem:[#allocation2 + $0x88] sm:$0xc0] %v1078_v37  ;;  %972 = vrot.lane.b32.xlu1 %v6442_v11, %s9359_s21  ;;  %883 = vrot.lane.b32.xlu0 %v6641_v43, %s9361_s20  ;;  %s9397_s20 = smov 92  }
  0xb7   :  { %v1242_v38 = vpop.permute.xlu1 %1241  ;;  %v6744_v40 = vpop.permute.xlu0 %1152 }
  0xb8   :  { %v1168_v41 = vsel %vm9377_vm11, %v1151_v35, %v6744_v40 }
  0xb9   :  { %1184 = vst [vmem:[#allocation2 + $0xc8] sm:$0x3] %v1168_v41  ;;  %1064 = vrot.lane.b32.xlu1 %v6439_v10, %s9357_s22  ;;  %974 = vrot.lane.b32.xlu0 %v6658_v48, %s9359_s21  ;;  %s9398_s21 = smov 64  }
  0xbb   :  { %v1333_v46 = vpop.permute.xlu1 %1332  ;;  %v6752_v47 = vpop.permute.xlu0 %1243 }
  0xbc   :  { %v1259_v50 = vsel %vm9365_vm12, %v1242_v38, %v6752_v47  ;;  %v2262_v4 = vld [vmem:[#allocation2 + $0x88] sm:$0xff] }
  0xbd   :  { %1275 = vst [vmem:[#allocation2 + $0xc8] sm:$0xc] %v1259_v50  ;;  %1154 = vrot.lane.b32.xlu1 %v6636_v42, %s9355_s23  ;;  %1066 = vrot.lane.b32.xlu0 %v6670_v52, %s9357_s22  ;;  %s9396_s22 = smov 31  }
  0xbf   :  { %v1425_v51 = vpop.permute.xlu1 %1424  ;;  %v6760_v54 = vpop.permute.xlu0 %1334 }
  0xc0   :  { %v1350_v55 = vsel %vm9364_vm13, %v1333_v46, %v6760_v54 }
  0xc1   :  { %1366 = vst [vmem:[#allocation2 + $0xc8] sm:$0x30] %v1350_v55  ;;  %1245 = vrot.lane.b32.xlu1 %v6467_v16, %s9393_s26  ;;  %1156 = vrot.lane.b32.xlu0 %v6645_v44, %s9355_s23  ;;  %s9395_s23 = smov 32  }
  0xc3   :  { %v785_v56 = vpop.permute.xlu1 %784  ;;  %v6768_v57 = vpop.permute.xlu0 %1426 }
  0xc4   :  { %v803_v58 = vsel %vm9375_vm7, %v785_v56, %v6699_v7  ;;  %v1442_v59 = vsel %vm9363_vm14, %v1425_v51, %v6768_v57 }
  0xc5   :  { %819 = vst [vmem:[#allocation2 + $0x80] sm:$0x3] %v803_v58  ;;  %1458 = vst [vmem:[#allocation2 + $0xc8] sm:$0xc0] %v1442_v59  ;;  %1336 = vrot.lane.b32.xlu1 %v6442_v11, %s9394_s27  ;;  %1247 = vrot.lane.b32.xlu0 %v6641_v43, %s9393_s26 }
  0xc7   :  { %v967_v60 = vpop.permute.xlu1 %966  ;;  %v876_v61 = vpop.permute.xlu0 %875 }
  0xc8   :  { %v985_v62 = vsel %vm9376_vm9, %v967_v60, %v969_v17  ;;  %v894_v63 = vsel %vm893_vm8, %v876_v61, %v6706_v13  ;;  %v6869_v61 = vcombine.high %v6641_v43, %v6641_v43 }
  0xc9   :  { %1001 = vst [vmem:[#allocation2 + $0x80] sm:$0x30] %v985_v62  ;;  %910 = vst [vmem:[#allocation2 + $0x80] sm:$0xc] %v894_v63  ;;  %1428 = vrot.lane.b32.xlu1 %v6439_v10, %s9395_s23  ;;  %1338 = vrot.lane.b32.xlu0 %v6658_v48, %s9394_s27  ;;  %v213_v62 = vcombine.high %v6616_v32, %v6616_v32 }
  0xcb   :  { %v1149_v0 = vpop.permute.xlu1 %1148  ;;  %v1059_v1 = vpop.permute.xlu0 %1058  ;;  %v6890_v32 = vrot.slane %v213_v62, %v6436_v8 }
  0xcc   :  { %v1167_v2 = vsel %vm9377_vm11, %v1149_v0, %v1151_v35  ;;  %v1077_v3 = vsel %vm1076_vm10, %v1059_v1, %v1061_v30  ;;  %v2270_v5 = vld [vmem:[#allocation2 + $0xc8] sm:$0xff] }
  0xcd   :  { %1183 = vst [vmem:[#allocation2 + $0xc0] sm:$0x3] %v1167_v2  ;;  %1093 = vst [vmem:[#allocation2 + $0x80] sm:$0xc0] %v1077_v3  ;;  %1518 = vrot.lane.b32.xlu1 %v6636_v42, %s9396_s22  ;;  %1430 = vrot.lane.b32.xlu0 %v6670_v52, %s9395_s23  ;;  %v5578_v6 = vpack.c.bf16 %v2270_v5, %v2262_v4 }
  0xcf   :  { %v1331_v7 = vpop.permute.xlu1 %1330  ;;  %v1240_v9 = vpop.permute.xlu0 %1239  ;;  %5579 = vmatprep.subr.bf16.mxu0 %v5578_v6  ;;  %v6904_v6 = vcombine.low %v6890_v32, %v6890_v32 }
  0xd0   :  { %v1349_v12 = vsel %vm9364_vm13, %v1331_v7, %v1333_v46  ;;  %v1258_v13 = vsel %vm9365_vm12, %v1240_v9, %v1242_v38  ;;  %vm1712_vm13 = vcmask 236544   ;;  %vm1804_vm12 = vcmask 228352  }
  0xd1   :  { %1365 = vst [vmem:[#allocation2 + $0xc0] sm:$0x30] %v1349_v12  ;;  %1274 = vst [vmem:[#allocation2 + $0xc0] sm:$0xc] %v1258_v13  ;;  %1609 = vrot.lane.b32.xlu1 %v6467_v16, %s6320_s28  ;;  %1520 = vrot.lane.b32.xlu0 %v6645_v44, %s9396_s22  ;;  %v6807_v16 = vld [vmem:[%s9333_s0 + $0xa] sm:$0xff] }
  0xd2   :  { %v6839_v41 = vrot.slane %v6807_v16, %v6436_v8 }
  0xd3   :  { %v6797_v42 = vpop.permute.xlu1 %1514  ;;  %v1423_v15 = vpop.permute.xlu0 %1422 }
  0xd4   :  { %v1441_v17 = vsel %vm9363_vm14, %v1423_v15, %v1425_v51  ;;  %vm1621_vm14 = vcmask 244736   ;;  %v2261_v35 = vld [vmem:[#allocation2 + $0x80] sm:$0xff] }
  0xd5   :  { %1457 = vst [vmem:[#allocation2 + $0xc0] sm:$0xc0] %v1441_v17  ;;  %1700 = vrot.lane.b32.xlu1 %v6442_v11, %s9380_s25  ;;  %1611 = vrot.lane.b32.xlu0 %v6641_v43, %s6320_s28  ;;  %v1906_v11 = vcombine.low %v6807_v16, %v6807_v16 }
  0xd7   :  { %v6809_v20 = vpop.permute.xlu1 %1605  ;;  %v6811_v25 = vpop.permute.xlu0 %1516  ;;  %v6835_v38 = vrot.slane %v1906_v11, %v6436_v8 }
  0xd8   :  { %v1532_v26 = vsel %vm1530_vm15, %v6797_v42, %v6811_v25 }
  0xd9   :  { %1548 = vst [vmem:[#allocation2 + $0x108] sm:$0x3] %v1532_v26  ;;  %1792 = vrot.lane.b32.xlu1 %v6439_v10, %s9378_s24  ;;  %1702 = vrot.lane.b32.xlu0 %v6658_v48, %s9380_s25  ;;  %v1849_v10 = vcombine.high %v6585_v24, %v6585_v24 }
  0xdb   :  { %v1697_v27 = vpop.permute.xlu1 %1696  ;;  %v6823_v30 = vpop.permute.xlu0 %1607  ;;  %1878 = vst [vmem:[#allocation2 + $0x158] sm:$0x3] %v1849_v10 }
  0xdc   :  { %v1623_v34 = vsel %vm1621_vm14, %v6809_v20, %v6823_v30  ;;  %v2269_v37 = vld [vmem:[#allocation2 + $0xc0] sm:$0xff] }
  0xdd   :  { %1639 = vst [vmem:[#allocation2 + $0x108] sm:$0xc] %v1623_v34  ;;  %1937 = vrot.lane.b32.xlu1 %v6578_v23, %s6305_s30  ;;  %1794 = vrot.lane.b32.xlu0 %v6670_v52, %s9378_s24  ;;  %v5580_v21 = vpack.c.bf16 %v2269_v37, %v2261_v35  ;;  %v6851_v52 = vcombine.low %v6839_v41, %v6839_v41 }
  0xdf   :  { %v1789_v46 = vpop.permute.xlu1 %1788  ;;  %v6841_v50 = vpop.permute.xlu0 %1698  ;;  %5581 = vmatpush1.bf16.msra.mxu0 %v5580_v21 }
  0xe0   :  { %v1714_v23 = vsel %vm1712_vm13, %v1697_v27, %v6841_v50 }
  0xe1   :  { %1730 = vst [vmem:[#allocation2 + $0x108] sm:$0x30] %v1714_v23  ;;  %2027 = vrot.lane.b32.xlu1 %v6585_v24, %s6304_s29  ;;  %1939 = vrot.lane.b32.xlu0 %v6835_v38, %s6305_s30  ;;  %v2101_v24 = vcombine.low %v6835_v38, %v6835_v38 }
  0xe3   :  { %v1934_v51 = vpop.permute.xlu1 %1933  ;;  %v6853_v55 = vpop.permute.xlu0 %1790 }
  0xe4   :  { %v1806_v56 = vsel %vm1804_vm12, %v1789_v46, %v6853_v55 }
  0xe5   :  { %1822 = vst [vmem:[#allocation2 + $0x108] sm:$0xc0] %v1806_v56  ;;  %2118 = vrot.lane.b32.xlu1 %v6574_v22, %s6306_s14  ;;  %2029 = vrot.lane.b32.xlu0 %v6851_v52, %s6304_s29  ;;  %v6878_v22 = vld [vmem:[%s9333_s0 + $0x8] sm:$0xff] }
  0xe6   :  { %5319 = vst.sshfl [vmem:[#allocation2 + $0x20] sm:$0x3 pattern:$0x76325410] %v6878_v22  ;;  %v73_v35 = vrot.slane %v6878_v22, %v6436_v8 }
  0xe7   :  { %v2024_v58 = vpop.permute.xlu1 %2023  ;;  %v6863_v59 = vpop.permute.xlu0 %1935 }
  0xe8   :  { %v1950_v60 = vsel %vm165_vm2, %v1934_v51, %v6863_v59  ;;  %v81_v23 = vcombine.high %v73_v35, %v73_v35 }
  0xe9   :  { %1966 = vst [vmem:[#allocation2 + $0x148] sm:$0xc] %v1950_v60  ;;  %2207 = vrot.lane.b32.xlu1 %v1849_v10, %s9382_s15  ;;  %2120 = vrot.lane.b32.xlu0 %v2101_v24, %s6306_s14 }
  0xea   :  { %96 = vst [vmem:[#allocation2 + $0x28] sm:$0x3] %v81_v23 }
  0xeb   :  { %v2115_v63 = vpop.permute.xlu1 %2114  ;;  %v6881_v0 = vpop.permute.xlu0 %2025 }
  0xec   :  { %v2040_v1 = vsel %vm256_vm0, %v2024_v58, %v6881_v0 }
  0xed   :  { %2056 = vst [vmem:[#allocation2 + $0x148] sm:$0x30] %v2040_v1  ;;  %157 = vrot.lane.b32.xlu1 %v6869_v61, %s6305_s30  ;;  %2209 = vrot.lane.b32.xlu0 %v6839_v41, %s9382_s15 }
  0xef   :  { %v1513_v2 = vpop.permute.xlu1 %1512  ;;  %v6892_v3 = vpop.permute.xlu0 %2116 }
  0xf0   :  { %v1531_v4 = vsel %vm1530_vm15, %v1513_v2, %v6797_v42  ;;  %v2131_v5 = vsel %vm348_vm1, %v2115_v63, %v6892_v3  ;;  %v6911_v42 = vcombine.high %v6645_v44, %v6645_v44 }
  0xf1   :  { %1547 = vst [vmem:[#allocation2 + $0x100] sm:$0x3] %v1531_v4  ;;  %2147 = vst [vmem:[#allocation2 + $0x148] sm:$0xc0] %v2131_v5  ;;  %248 = vrot.lane.b32.xlu1 %v6645_v44, %s6304_s29  ;;  %159 = vrot.lane.b32.xlu0 %v6645_v44, %s6305_s30 }
  0xf3   :  { %v1695_v7 = vpop.permute.xlu1 %1694  ;;  %v1604_v9 = vpop.permute.xlu0 %1603 }
  0xf4   :  { %v1713_v12 = vsel %vm1712_vm13, %v1695_v7, %v1697_v27  ;;  %v1622_v13 = vsel %vm1621_vm14, %v1604_v9, %v6809_v20  ;;  %v2278_v27 = vld [vmem:[#allocation2 + $0x108] sm:$0xff] }
  0xf5   :  { %1729 = vst [vmem:[#allocation2 + $0x100] sm:$0x30] %v1713_v12  ;;  %1638 = vst [vmem:[#allocation2 + $0x100] sm:$0xc] %v1622_v13  ;;  %340 = vrot.lane.b32.xlu1 %v6641_v43, %s6306_s14  ;;  %250 = vrot.lane.b32.xlu0 %v6904_v6, %s6304_s29 }
  0xf7   :  { %v1932_v15 = vpop.permute.xlu1 %1931  ;;  %v1787_v17 = vpop.permute.xlu0 %1786 }
  0xf8   :  { %v1949_v26 = vsel %vm165_vm2, %v1932_v15, %v1934_v51  ;;  %v1805_v11 = vsel %vm1804_vm12, %v1787_v17, %v1789_v46  ;;  %v2286_v20 = vld [vmem:[#allocation2 + $0x148] sm:$0xff] }
  0xf9   :  { %1965 = vst [vmem:[#allocation2 + $0x140] sm:$0xc] %v1949_v26  ;;  %1821 = vst [vmem:[#allocation2 + $0x100] sm:$0xc0] %v1805_v11  ;;  %430 = vrot.lane.b32.xlu1 %v6911_v42, %s9382_s15  ;;  %342 = vrot.lane.b32.xlu0 %v6658_v48, %s6306_s14  ;;  %v5582_v34 = vpack.c.bf16 %v2286_v20, %v2278_v27 }
  0xfb   :  { %v2113_v37 = vpop.permute.xlu1 %2112  ;;  %v2022_v10 = vpop.permute.xlu0 %2021  ;;  %5583 = vmatprep.subr.bf16.mxu0 %v5582_v34 }
  0xfc   :  { %v2130_v21 = vsel %vm348_vm1, %v2113_v37, %v2115_v63  ;;  %v2039_v46 = vsel %vm256_vm0, %v2022_v10, %v2024_v58 }
  0xfd   :  { %2146 = vst [vmem:[#allocation2 + $0x140] sm:$0xc0] %v2130_v21  ;;  %2055 = vst [vmem:[#allocation2 + $0x140] sm:$0x30] %v2039_v46  ;;  %521 = vrot.lane.b32.xlu1 %v6869_v61, %s9373_s16  ;;  %432 = vrot.lane.b32.xlu0 %v6890_v32, %s9382_s15 }
  0xff   :  { %v6931_v51 = vpop.permute.xlu1 %155  ;;  %v154_v56 = vpop.permute.xlu0 %153 }
 0x100   :  { %v168_v24 = vsel %vm165_vm2, %v6598_v28, %v154_v56  ;;  %v169_v60 = vsel %vm165_vm2, %v154_v56, %v6931_v51  ;;  %v2277_v1 = vld [vmem:[#allocation2 + $0x100] sm:$0xff] }
 0x101   :  { %184 = vst [vmem:[#allocation2 + $0x10] sm:$0xc] %v168_v24  ;;  %185 = vst [vmem:[#allocation2 + $0x18] sm:$0xc] %v169_v60  ;;  %612 = vrot.lane.b32.xlu1 %v6645_v44, %s9371_s17  ;;  %523 = vrot.lane.b32.xlu0 %v6645_v44, %s9373_s16  ;;  %s9406_s16 = smov 96  }
 0x103   :  { %v6941_v58 = vpop.permute.xlu1 %246  ;;  %v245_v62 = vpop.permute.xlu0 %244 }
 0x104   :  { %v259_v63 = vsel %vm256_vm0, %v6603_v29, %v245_v62  ;;  %v260_v28 = vsel %vm256_vm0, %v245_v62, %v6941_v58  ;;  %v2285_v2 = vld [vmem:[#allocation2 + $0x140] sm:$0xff] }
 0x105   :  { %275 = vst [vmem:[#allocation2 + $0x10] sm:$0x30] %v259_v63  ;;  %276 = vst [vmem:[#allocation2 + $0x18] sm:$0x30] %v260_v28  ;;  %704 = vrot.lane.b32.xlu1 %v6641_v43, %s9368_s18  ;;  %614 = vrot.lane.b32.xlu0 %v6904_v6, %s9371_s17  ;;  %v5584_v4 = vpack.c.bf16 %v2285_v2, %v2277_v1  ;;  %s9408_s17 = smov 94  }
 0x107   :  { %v6951_v5 = vpop.permute.xlu1 %338  ;;  %v337_v7 = vpop.permute.xlu0 %336  ;;  %5585 = vmatpush1.bf16.msra.mxu0 %v5584_v4 }
 0x108   :  { %v351_v29 = vsel %vm348_vm1, %v6618_v33, %v337_v7  ;;  %v352_v9 = vsel %vm348_vm1, %v337_v7, %v6951_v5 }
 0x109   :  { %367 = vst [vmem:[#allocation2 + $0x10] sm:$0xc0] %v351_v29  ;;  %368 = vst [vmem:[#allocation2 + $0x18] sm:$0xc0] %v352_v9  ;;  %794 = vrot.lane.b32.xlu1 %v6911_v42, %s9366_s19  ;;  %706 = vrot.lane.b32.xlu0 %v6658_v48, %s9368_s18  ;;  %s9400_s18 = smov 62  }
 0x10b   :  { %v6961_v12 = vpop.permute.xlu1 %428  ;;  %v427_v13 = vpop.permute.xlu0 %426 }
 0x10c   :  { %v441_v15 = vsel %vm438_vm3, %v6630_v39, %v427_v13  ;;  %v442_v33 = vsel %vm438_vm3, %v427_v13, %v6961_v12 }
 0x10d   :  { %457 = vst [vmem:[#allocation2 + $0x50] sm:$0x3] %v441_v15  ;;  %458 = vst [vmem:[#allocation2 + $0x58] sm:$0x3] %v442_v33  ;;  %885 = vrot.lane.b32.xlu1 %v6869_v61, %s9397_s20  ;;  %796 = vrot.lane.b32.xlu0 %v6890_v32, %s9366_s19  ;;  %s9399_s19 = smov 63   ;;  %v7036_v33 = vld [vmem:[%s9334_s1] sm:$0xff] }
 0x10f   :  { %v6971_v17 = vpop.permute.xlu1 %519  ;;  %v518_v26 = vpop.permute.xlu0 %517 }
 0x110   :  { %v532_v11 = vsel %vm9385_vm4, %v6648_v45, %v518_v26  ;;  %v533_v39 = vsel %vm9385_vm4, %v518_v26, %v6971_v17  ;;  %v2248_v15 = vld [vmem:[#allocation2 + $0x18] sm:$0xff]  ;;  %v2247_v26 = vld [vmem:[#allocation2 + $0x10] sm:$0xff] }
 0x111   :  { %548 = vst [vmem:[#allocation2 + $0x50] sm:$0xc] %v532_v11  ;;  %549 = vst [vmem:[#allocation2 + $0x58] sm:$0xc] %v533_v39  ;;  %976 = vrot.lane.b32.xlu1 %v6645_v44, %s9398_s21  ;;  %887 = vrot.lane.b32.xlu0 %v6645_v44, %s9397_s20 }
 0x113   :  { %v6981_v27 = vpop.permute.xlu1 %610  ;;  %v609_v20 = vpop.permute.xlu0 %608 }
 0x114   :  { %v623_v34 = vsel %vm620_vm5, %v6660_v49, %v609_v20  ;;  %v624_v45 = vsel %vm620_vm5, %v609_v20, %v6981_v27 }
 0x115   :  { %639 = vst [vmem:[#allocation2 + $0x50] sm:$0x30] %v623_v34  ;;  %640 = vst [vmem:[#allocation2 + $0x58] sm:$0x30] %v624_v45  ;;  %1068 = vrot.lane.b32.xlu1 %v6641_v43, %s9399_s19  ;;  %978 = vrot.lane.b32.xlu0 %v6904_v6, %s9398_s21 }
 0x117   :  { %v6991_v35 = vpop.permute.xlu1 %702  ;;  %v701_v37 = vpop.permute.xlu0 %700 }
 0x118   :  { %v715_v10 = vsel %vm9370_vm6, %v6672_v53, %v701_v37  ;;  %v716_v49 = vsel %vm9370_vm6, %v701_v37, %v6991_v35  ;;  %vm2320_vm6 = vcmask 1041408   ;;  %v7055_v37 = vld [vmem:[%s9334_s1 + $0x8] sm:$0xf] }
 0x119   :  { %731 = vst [vmem:[#allocation2 + $0x50] sm:$0xc0] %v715_v10  ;;  %732 = vst [vmem:[#allocation2 + $0x58] sm:$0xc0] %v716_v49  ;;  %1158 = vrot.lane.b32.xlu1 %v6911_v42, %s9400_s18  ;;  %1070 = vrot.lane.b32.xlu0 %v6658_v48, %s9399_s19 }
 0x11b   :  { %v7001_v21 = vpop.permute.xlu1 %2205  ;;  %v2204_v46 = vpop.permute.xlu0 %2203 }
 0x11c   :  { %v2220_v23 = vsel %vm438_vm3, %v2204_v46, %v7001_v21 }
 0x11d   :  { %2236 = vst [vmem:[#allocation2 + $0x188] sm:$0x3] %v2220_v23  ;;  %1249 = vrot.lane.b32.xlu1 %v6869_v61, %s9393_s26  ;;  %1160 = vrot.lane.b32.xlu0 %v6890_v32, %s9400_s18 }
 0x11f   :  { %v791_v53 = vpop.permute.xlu1 %790  ;;  %v2202_v56 = vpop.permute.xlu0 %2201 }
 0x120   :  { %v805_v24 = vsel %vm9375_vm7, %v6708_v14, %v791_v53  ;;  %v2219_v60 = vsel %vm438_vm3, %v2202_v56, %v2204_v46  ;;  %v2256_v2 = vld [vmem:[#allocation2 + $0x58] sm:$0xff]  ;;  %v2255_v29 = vld [vmem:[#allocation2 + $0x50] sm:$0xff] }
 0x121   :  { %821 = vst [vmem:[#allocation2 + $0x90] sm:$0x3] %v805_v24  ;;  %2235 = vst [vmem:[#allocation2 + $0x180] sm:$0x3] %v2219_v60  ;;  %1340 = vrot.lane.b32.xlu1 %v6645_v44, %s9394_s27  ;;  %1251 = vrot.lane.b32.xlu0 %v6645_v44, %s9393_s26  ;;  %v5588_v11 = vpack.c.bf16 %v2255_v29, %v2247_v26  ;;  %v1921_v24 = vcombine.high %v6835_v38, %v6835_v38 }
 0x122   :  { %v1996_v60 = vcombine.high %v6807_v16, %v6807_v16 }
 0x123   :  { %v882_v62 = vpop.permute.xlu1 %881  ;;  %v7016_v63 = vpop.permute.xlu0 %792 }
 0x124   :  { %v896_v28 = vsel %vm893_vm8, %v6717_v18, %v882_v62  ;;  %v806_v14 = vsel %vm9375_vm7, %v791_v53, %v7016_v63  ;;  %v2294_v1 = vld [vmem:[#allocation2 + $0x188] sm:$0x3]  ;;  %vm9384_vm7 = vcmask 408576  }
 0x125   :  { %912 = vst [vmem:[#allocation2 + $0x90] sm:$0xc] %v896_v28  ;;  %822 = vst [vmem:[#allocation2 + $0x98] sm:$0x3] %v806_v14  ;;  %1432 = vrot.lane.b32.xlu1 %v6641_v43, %s9395_s23  ;;  %1342 = vrot.lane.b32.xlu0 %v6904_v6, %s9394_s27 }
 0x126   :  { %5336 = vmatprep.subr.msk.mxu0 %vm2320_vm6, %v2294_v1  ;;  %v7106_v1 = vrot.slane %v1996_v60, %v6436_v8 }
 0x127   :  { %v973_v4 = vpop.permute.xlu1 %972  ;;  %v7027_v7 = vpop.permute.xlu0 %883 }
 0x128   :  { %v987_v18 = vsel %vm9376_vm9, %v6728_v31, %v973_v4  ;;  %v897_v9 = vsel %vm893_vm8, %v882_v62, %v7027_v7  ;;  %v2293_v13 = vld [vmem:[#allocation2 + $0x180] sm:$0x3]  ;;  %v5586_v31 = vpack.c.bf16 %v2256_v2, %v2248_v15  ;;  %v7131_v15 = vcombine.high %v6839_v41, %v6839_v41 }
 0x129   :  { %1003 = vst [vmem:[#allocation2 + $0x90] sm:$0x30] %v987_v18  ;;  %913 = vst [vmem:[#allocation2 + $0x98] sm:$0xc] %v897_v9  ;;  %1522 = vrot.lane.b32.xlu1 %v6911_v42, %s9396_s22  ;;  %1434 = vrot.lane.b32.xlu0 %v6658_v48, %s9395_s23 }
 0x12a   :  { %5337 = vmatpush1.msk.msra.mxu0 %vm2320_vm6, %v2293_v13 }
 0x12b   :  { %5587 = vmatprep.subr.bf16.mxu0 %v5586_v31  ;;  %v1065_v39 = vpop.permute.xlu1 %1064  ;;  %v7043_v20 = vpop.permute.xlu0 %974  ;;  %5338 = vmatmul.mubr.msk.f32.vlgmr.msra.gmra.mrb[0].mxu0 %vm9384_vm7, %v7036_v33 }
 0x12c   :  { %v1079_v34 = vsel %vm1076_vm10, %v6736_v36, %v1065_v39  ;;  %v988_v45 = vsel %vm9376_vm9, %v973_v4, %v7043_v20  ;;  %5589 = vmatpush1.bf16.msra.mxu0 %v5588_v11  ;;  %2415 = vmatprep.mubr.f32.mxu0 %v6323_v19  ;;  %vm9401_vm9 = vcmask 498688  }
 0x12d   :  { %1095 = vst [vmem:[#allocation2 + $0x90] sm:$0xc0] %v1079_v34  ;;  %1004 = vst [vmem:[#allocation2 + $0x98] sm:$0x30] %v988_v45  ;;  %1613 = vrot.lane.b32.xlu1 %v6869_v61, %s6320_s28  ;;  %1524 = vrot.lane.b32.xlu0 %v6890_v32, %s9396_s22  ;;  %v6324_v61 = vmov 0  }
 0x12e   :  { %6145 = vset.pattern.permute.xlu1 %v6324_v61  ;;  %6146 = vset.pattern.permute.xlu0 %v6324_v61 }
 0x12f   :  { %v1155_v36 = vpop.permute.xlu1 %1154  ;;  %v7061_v10 = vpop.permute.xlu0 %1066  ;;  %5339 = vmatmul.mubr.msk.f32.gmra.mrb[2].mxu0 %vm9384_vm7, %v7055_v37 }
 0x130   :  { %v1169_v49 = vsel %vm9377_vm11, %v6744_v40, %v1155_v36  ;;  %v1080_v46 = vsel %vm1076_vm10, %v1065_v39, %v7061_v10  ;;  %2486 = vmatprep.mubr.f32.mxu0 %v6323_v19  ;;  %v66_v39 = vcombine.high %v6878_v22, %v6878_v22 }
 0x131   :  { %1185 = vst [vmem:[#allocation2 + $0xd0] sm:$0x3] %v1169_v49  ;;  %1096 = vst [vmem:[#allocation2 + $0x98] sm:$0xc0] %v1080_v46  ;;  %1704 = vrot.lane.b32.xlu1 %v6645_v44, %s9380_s25  ;;  %1615 = vrot.lane.b32.xlu0 %v6645_v44, %s6320_s28 }
 0x132   :  { %5320 = vst.sshfl [vmem:[#allocation2 + $0x30] sm:$0x3 pattern:$0x76325410] %v66_v39 }
 0x133   :  { %v1246_v23 = vpop.permute.xlu1 %1245  ;;  %v7074_v53 = vpop.permute.xlu0 %1156 }
 0x134   :  { %v1260_v40 = vsel %vm9401_vm9, %v6752_v47, %v1246_v23  ;;  %v1170_v56 = vsel %vm9377_vm11, %v1155_v36, %v7074_v53  ;;  %v7091_v47 = vld [vmem:[%s9333_s0 + $0xa] sm:$0xff]  ;;  %vm9402_vm9 = vcmask 490496   ;;  %vm9403_vm11 = vcmask 498688  }
 0x135   :  { %1276 = vst [vmem:[#allocation2 + $0xd0] sm:$0xc] %v1260_v40  ;;  %1186 = vst [vmem:[#allocation2 + $0xd8] sm:$0x3] %v1170_v56  ;;  %1796 = vrot.lane.b32.xlu1 %v6641_v43, %s9378_s24  ;;  %1706 = vrot.lane.b32.xlu0 %v6904_v6, %s9380_s25  ;;  %v1857_v62 = vrot.slane %v7091_v47, %v6436_v8  ;;  %v2263_v61 = vld [vmem:[#allocation2 + $0x90] sm:$0xff]  ;;  %s9407_s25 = smov 95  }
 0x136   :  { %5332 = vst.sshfl [vmem:[#allocation2 + $0x160] sm:$0x3 pattern:$0x76325410] %v7091_v47 }
 0x137   :  { %v1337_v43 = vpop.permute.xlu1 %1336  ;;  %v7096_v28 = vpop.permute.xlu0 %1247  ;;  %v1865_v16 = vcombine.high %v1857_v62, %v1857_v62  ;;  %v7165_v56 = vld.sshfl [vmem:[%s9333_s0 + $0x10] sm:$0x3 pattern:$0x76325410] }
 0x138   :  { %v1351_v6 = vsel %vm9402_vm9, %v6760_v54, %v1337_v43  ;;  %v1261_v14 = vsel %vm9403_vm11, %v1246_v23, %v7096_v28  ;;  %vm9404_vm9 = vcmask 261120   ;;  %vm9405_vm11 = vcmask 490496   ;;  %v2264_v49 = vld [vmem:[#allocation2 + $0x98] sm:$0xff] }
 0x139   :  { %1367 = vst [vmem:[#allocation2 + $0xd0] sm:$0x30] %v1351_v6  ;;  %1277 = vst [vmem:[#allocation2 + $0xd8] sm:$0xc] %v1261_v14  ;;  %1941 = vrot.lane.b32.xlu1 %v1921_v24, %s6305_s30  ;;  %1798 = vrot.lane.b32.xlu0 %v6658_v48, %s9378_s24  ;;  %v2012_v48 = vcombine.low %v7106_v1, %v7106_v1  ;;  %v7178_v6 = vcombine.low %v7165_v56, %v7165_v56  ;;  %s9409_s24 = smov 93  }
 0x13a   :  { %1880 = vst [vmem:[#allocation2 + $0x168] sm:$0x3] %v1865_v16 }
 0x13b   :  { %v1429_v2 = vpop.permute.xlu1 %1428  ;;  %v7108_v4 = vpop.permute.xlu0 %1338 }
 0x13c   :  { %v1443_v54 = vsel %vm9404_vm9, %v6768_v57, %v1429_v2  ;;  %v1352_v29 = vsel %vm9405_vm11, %v1337_v43, %v7108_v4  ;;  %vm9410_vm11 = vcmask 769024  }
 0x13d   :  { %1459 = vst [vmem:[#allocation2 + $0xd0] sm:$0xc0] %v1443_v54  ;;  %1368 = vst [vmem:[#allocation2 + $0xd8] sm:$0x30] %v1352_v29  ;;  %2031 = vrot.lane.b32.xlu1 %v6839_v41, %s6304_s29  ;;  %1943 = vrot.lane.b32.xlu0 %v6839_v41, %s6305_s30  ;;  %v7193_v29 = vcombine.high %v6890_v32, %v6890_v32 }
 0x13f   :  { %v1519_v18 = vpop.permute.xlu1 %1518  ;;  %v7120_v9 = vpop.permute.xlu0 %1430 }
 0x140   :  { %v1533_v57 = vsel %vm1530_vm15, %v6811_v25, %v1519_v18  ;;  %v1444_v13 = vsel %vm9404_vm9, %v1429_v2, %v7120_v9  ;;  %vm9411_vm9 = vcmask 760832  }
 0x141   :  { %1549 = vst [vmem:[#allocation2 + $0x110] sm:$0x3] %v1533_v57  ;;  %1460 = vst [vmem:[#allocation2 + $0xd8] sm:$0xc0] %v1444_v13  ;;  %2122 = vrot.lane.b32.xlu1 %v6835_v38, %s6306_s14  ;;  %2033 = vrot.lane.b32.xlu0 %v2012_v48, %s6304_s29 }
 0x142   :  { %v6264_v38 = vld [vmem:[%s9333_s0 + $0x10] ss:$0 sps:$4 sm:$0x33]  }
 0x143   :  { %v1610_v31 = vpop.permute.xlu1 %1609  ;;  %v7133_v26 = vpop.permute.xlu0 %1520  ;;  %v146_v23 = vrot.slane %v6264_v38, %v6436_v8 }
 0x144   :  { %v1624_v25 = vsel %vm1621_vm14, %v6823_v30, %v1610_v31  ;;  %v1534_v11 = vsel %vm1530_vm15, %v1519_v18, %v7133_v26  ;;  %v2271_v45 = vld [vmem:[#allocation2 + $0xd0] sm:$0xff] }
 0x145   :  { %1640 = vst [vmem:[#allocation2 + $0x110] sm:$0xc] %v1624_v25  ;;  %1550 = vst [vmem:[#allocation2 + $0x118] sm:$0x3] %v1534_v11  ;;  %2211 = vrot.lane.b32.xlu1 %v7131_v15, %s9382_s15  ;;  %2124 = vrot.lane.b32.xlu0 %v6851_v52, %s6306_s14  ;;  %v5592_v40 = vpack.c.bf16 %v2271_v45, %v2263_v61  ;;  %v80_v25 = vrot.slane %v66_v39, %v6436_v8 }
 0x147   :  { %v1701_v30 = vpop.permute.xlu1 %1700  ;;  %v7148_v34 = vpop.permute.xlu0 %1611  ;;  %v82_v45 = vcombine.high %v80_v25, %v80_v25 }
 0x148   :  { %v1715_v22 = vsel %vm1712_vm13, %v6841_v50, %v1701_v30  ;;  %v1625_v36 = vsel %vm1621_vm14, %v1610_v31, %v7148_v34  ;;  %v2272_v46 = vld [vmem:[#allocation2 + $0xd8] sm:$0xff]  ;;  %v6265_v50 = vld [vmem:[%s9333_s0 + $0x10] ss:$0 sps:$4 sm:$0x33]  }
 0x149   :  { %1731 = vst [vmem:[#allocation2 + $0x110] sm:$0x30] %v1715_v22  ;;  %1641 = vst [vmem:[#allocation2 + $0x118] sm:$0xc] %v1625_v36  ;;  %161 = vrot.lane.b32.xlu1 %v6911_v42, %s6305_s30  ;;  %2213 = vrot.lane.b32.xlu0 %v7106_v1, %s9382_s15  ;;  %v5590_v52 = vpack.c.bf16 %v2272_v46, %v2264_v49  ;;  %v328_v14 = vrot.slane %v6265_v50, %v6436_v8 }
 0x14a   :  { %v6266_v31 = vld [vmem:[%s9333_s0 + $0x10] ss:$0 sps:$4 sm:$0x33]   ;;  %98 = vst [vmem:[#allocation2 + $0x38] sm:$0x3] %v82_v45 }
 0x14b   :  { %v1793_v24 = vpop.permute.xlu1 %1792  ;;  %v7167_v60 = vpop.permute.xlu0 %1702  ;;  %5591 = vmatprep.subr.bf16.mxu0 %v5590_v52  ;;  %v329_v48 = vcombine.low %v328_v14, %v328_v14  ;;  %v510_v39 = vrot.slane %v6266_v31, %v6436_v8  ;;  %v6267_v22 = vld [vmem:[%s9333_s0 + $0x10] ss:$0 sps:$4 sm:$0x33]  }
 0x14c   :  { %v1807_v62 = vsel %vm1804_vm12, %v6853_v55, %v1793_v24  ;;  %v1716_v43 = vsel %vm1712_vm13, %v1701_v30, %v7167_v60  ;;  %5593 = vmatpush1.bf16.msra.mxu0 %v5592_v40  ;;  %v692_v52 = vrot.slane %v6267_v22, %v6436_v8 }
 0x14d   :  { %1823 = vst [vmem:[#allocation2 + $0x110] sm:$0xc0] %v1807_v62  ;;  %1732 = vst [vmem:[#allocation2 + $0x118] sm:$0x30] %v1716_v43  ;;  %252 = vrot.lane.b32.xlu1 %v6890_v32, %s6304_s29  ;;  %163 = vrot.lane.b32.xlu0 %v146_v23, %s6305_s30 }
 0x14e   :  { %v693_v40 = vcombine.low %v692_v52, %v692_v52 }
 0x14f   :  { %v1938_v16 = vpop.permute.xlu1 %1937  ;;  %v7181_v2 = vpop.permute.xlu0 %1794 }
 0x150   :  { %v1951_v55 = vsel %vm165_vm2, %v6863_v59, %v1938_v16  ;;  %v1808_v54 = vsel %vm1804_vm12, %v1793_v24, %v7181_v2 }
 0x151   :  { %1967 = vst [vmem:[#allocation2 + $0x150] sm:$0xc] %v1951_v55  ;;  %1824 = vst [vmem:[#allocation2 + $0x118] sm:$0xc0] %v1808_v54  ;;  %344 = vrot.lane.b32.xlu1 %v6645_v44, %s6306_s14  ;;  %254 = vrot.lane.b32.xlu0 %v7178_v6, %s6304_s29 }
 0x153   :  { %v2028_v18 = vpop.permute.xlu1 %2027  ;;  %v7195_v57 = vpop.permute.xlu0 %1939 }
 0x154   :  { %v2041_v59 = vsel %vm256_vm0, %v6881_v0, %v2028_v18  ;;  %v1952_v13 = vsel %vm165_vm2, %v1938_v16, %v7195_v57 }
 0x155   :  { %2057 = vst [vmem:[#allocation2 + $0x150] sm:$0x30] %v2041_v59  ;;  %1968 = vst [vmem:[#allocation2 + $0x158] sm:$0xc] %v1952_v13  ;;  %434 = vrot.lane.b32.xlu1 %v7193_v29, %s9382_s15  ;;  %346 = vrot.lane.b32.xlu0 %v329_v48, %s6306_s14  ;;  %v2279_v48 = vld [vmem:[#allocation2 + $0x110] sm:$0xff] }
 0x157   :  { %v2119_v11 = vpop.permute.xlu1 %2118  ;;  %v7208_v38 = vpop.permute.xlu0 %2029 }
 0x158   :  { %v2132_v0 = vsel %vm348_vm1, %v6892_v3, %v2119_v11  ;;  %v2042_v30 = vsel %vm256_vm0, %v2028_v18, %v7208_v38  ;;  %v2280_v16 = vld [vmem:[#allocation2 + $0x118] sm:$0xff]  ;;  %v6268_v18 = vld [vmem:[%s9333_s0 + $0x10] ss:$0 sps:$4 sm:$0x33]  }
 0x159   :  { %2148 = vst [vmem:[#allocation2 + $0x150] sm:$0xc0] %v2132_v0  ;;  %2058 = vst [vmem:[#allocation2 + $0x158] sm:$0x30] %v2042_v30  ;;  %525 = vrot.lane.b32.xlu1 %v6911_v42, %s9406_s16  ;;  %436 = vrot.lane.b32.xlu0 %v7165_v56, %s9382_s15  ;;  %v874_v0 = vrot.slane %v6268_v18, %v6436_v8  ;;  %s9415_s15 = smov 29  }
 0x15a   :  { %v6269_v30 = vld [vmem:[%s9333_s0 + $0x10] ss:$0 sps:$4 sm:$0x33]  }
 0x15b   :  { %v2208_v3 = vpop.permute.xlu1 %2207  ;;  %v7222_v36 = vpop.permute.xlu0 %2120 }
 0x15c   :  { %v2221_v49 = vsel %vm438_vm3, %v7001_v21, %v2208_v3  ;;  %v2133_v46 = vsel %vm348_vm1, %v2119_v11, %v7222_v36 }
 0x15d   :  { %2237 = vst [vmem:[#allocation2 + $0x190] sm:$0x3] %v2221_v49  ;;  %2149 = vst [vmem:[#allocation2 + $0x158] sm:$0xc0] %v2133_v46  ;;  %616 = vrot.lane.b32.xlu1 %v6890_v32, %s9407_s25  ;;  %527 = vrot.lane.b32.xlu0 %v510_v39, %s9406_s16  ;;  %v1056_v49 = vrot.slane %v6269_v30, %v6436_v8 }
 0x15f   :  { %v158_v61 = vpop.permute.xlu1 %157  ;;  %v7232_v23 = vpop.permute.xlu0 %2209 }
 0x160   :  { %v170_v50 = vsel %vm165_vm2, %v6931_v51, %v158_v61  ;;  %v2222_v21 = vsel %vm438_vm3, %v2208_v3, %v7232_v23  ;;  %v2287_v43 = vld [vmem:[#allocation2 + $0x150] sm:$0xff] }
 0x161   :  { %186 = vst [vmem:[#allocation2 + $0x20] sm:$0xc] %v170_v50  ;;  %2238 = vst [vmem:[#allocation2 + $0x198] sm:$0x3] %v2222_v21  ;;  %708 = vrot.lane.b32.xlu1 %v6645_v44, %s9408_s17  ;;  %618 = vrot.lane.b32.xlu0 %v7178_v6, %s9407_s25  ;;  %v5596_v59 = vpack.c.bf16 %v2287_v43, %v2279_v48  ;;  %v1057_v50 = vcombine.low %v1056_v49, %v1056_v49  ;;  %s6327_s25 = smov 100  }
 0x162   :  { %v6270_v43 = vld [vmem:[%s9333_s0 + $0x10] ss:$0 sps:$4 sm:$0x33]  }
 0x163   :  { %v249_v24 = vpop.permute.xlu1 %248  ;;  %v7242_v62 = vpop.permute.xlu0 %159 }
 0x164   :  { %v261_v14 = vsel %vm256_vm0, %v6941_v58, %v249_v24  ;;  %v171_v51 = vsel %vm165_vm2, %v158_v61, %v7242_v62  ;;  %v2288_v55 = vld [vmem:[#allocation2 + $0x158] sm:$0xff]  ;;  %v2295_v39 = vld [vmem:[#allocation2 + $0x190] sm:$0x3] }
 0x165   :  { %277 = vst [vmem:[#allocation2 + $0x20] sm:$0x30] %v261_v14  ;;  %187 = vst [vmem:[#allocation2 + $0x28] sm:$0xc] %v171_v51  ;;  %798 = vrot.lane.b32.xlu1 %v7193_v29, %s9409_s24  ;;  %710 = vrot.lane.b32.xlu0 %v693_v40, %s9408_s17  ;;  %v5594_v54 = vpack.c.bf16 %v2288_v55, %v2280_v16  ;;  %v1238_v55 = vrot.slane %v6270_v43, %v6436_v8 }
 0x166   :  { %v6273_v43 = vld [vmem:[%s9333_s0 + $0x10] ss:$0 sps:$4 sm:$0x33]  }
 0x167   :  { %v341_v58 = vpop.permute.xlu1 %340  ;;  %v7254_v13 = vpop.permute.xlu0 %250  ;;  %5595 = vmatprep.subr.bf16.mxu0 %v5594_v54  ;;  %v6271_v54 = vld [vmem:[%s9333_s0 + $0x10] ss:$0 sps:$4 sm:$0x33]  }
 0x168   :  { %v353_v31 = vsel %vm348_vm1, %v6951_v5, %v341_v58  ;;  %v262_v25 = vsel %vm256_vm0, %v249_v24, %v7254_v13  ;;  %5597 = vmatpush1.bf16.msra.mxu0 %v5596_v59  ;;  %v2296_v11 = vld [vmem:[#allocation2 + $0x198] sm:$0x3] }
 0x169   :  { %369 = vst [vmem:[#allocation2 + $0x20] sm:$0xc0] %v353_v31  ;;  %278 = vst [vmem:[#allocation2 + $0x28] sm:$0x30] %v262_v25  ;;  %889 = vrot.lane.b32.xlu1 %v6911_v42, %s9397_s20  ;;  %800 = vrot.lane.b32.xlu0 %v7165_v56, %s9409_s24  ;;  %s6331_s24 = smov 72  }
 0x16a   :  { %5340 = vmatprep.subr.msk.mxu0 %vm2320_vm6, %v2296_v11 }
 0x16b   :  { %v431_v5 = vpop.permute.xlu1 %430  ;;  %v7269_v45 = vpop.permute.xlu0 %342 }
 0x16c   :  { %v443_v22 = vsel %vm438_vm3, %v6961_v12, %v431_v5  ;;  %v354_v3 = vsel %vm348_vm1, %v341_v58, %v7269_v45  ;;  %5341 = vmatpush1.msk.msra.mxu0 %vm2320_vm6, %v2295_v39  ;;  %v1420_v58 = vrot.slane %v6271_v54, %v6436_v8 }
 0x16d   :  { %459 = vst [vmem:[#allocation2 + $0x60] sm:$0x3] %v443_v22  ;;  %370 = vst [vmem:[#allocation2 + $0x28] sm:$0xc0] %v354_v3  ;;  %980 = vrot.lane.b32.xlu1 %v6890_v32, %s9398_s21  ;;  %891 = vrot.lane.b32.xlu0 %v874_v0, %s9397_s20  ;;  %s6328_s20 = smov 98  }
 0x16e   :  { %5342 = vmatmul.mubr.msk.f32.vlgmr.msra.gmra.mrb[4].mxu0 %vm9384_vm7, %v7036_v33  ;;  %v1421_v0 = vcombine.low %v1420_v58, %v1420_v58 }
 0x16f   :  { %v522_v46 = vpop.permute.xlu1 %521  ;;  %v7282_v52 = vpop.permute.xlu0 %432  ;;  %2492 = vmatprep.mubr.f32.mxu0 %v6323_v19 }
 0x170   :  { %v534_v12 = vsel %vm9385_vm4, %v6971_v17, %v522_v46  ;;  %v444_v61 = vsel %vm438_vm3, %v431_v5, %v7282_v52 }
 0x171   :  { %550 = vst [vmem:[#allocation2 + $0x60] sm:$0xc] %v534_v12  ;;  %460 = vst [vmem:[#allocation2 + $0x68] sm:$0x3] %v444_v61  ;;  %1072 = vrot.lane.b32.xlu1 %v6645_v44, %s9399_s19  ;;  %982 = vrot.lane.b32.xlu0 %v7178_v6, %s9398_s21  ;;  %v2249_v12 = vld [vmem:[#allocation2 + $0x20] sm:$0xff]  ;;  %s6329_s21 = smov 85  }
 0x172   :  { %5343 = vmatmul.mubr.msk.f32.gmra.mrb[6].mxu0 %vm9384_vm7, %v7055_v37  ;;  %v6272_v61 = vld [vmem:[%s9333_s0 + $0x10] ss:$0 sps:$4 sm:$0x33]  }
 0x173   :  { %v613_v21 = vpop.permute.xlu1 %612  ;;  %v7295_v40 = vpop.permute.xlu0 %523  ;;  %2563 = vmatprep.mubr.f32.mxu0 %v6323_v19 }
 0x174   :  { %v625_v17 = vsel %vm620_vm5, %v6981_v27, %v613_v21  ;;  %v535_v24 = vsel %vm9385_vm4, %v522_v46, %v7295_v40  ;;  %v2250_v30 = vld [vmem:[#allocation2 + $0x28] sm:$0xff] }
 0x175   :  { %641 = vst [vmem:[#allocation2 + $0x60] sm:$0x30] %v625_v17  ;;  %551 = vst [vmem:[#allocation2 + $0x68] sm:$0xc] %v535_v24  ;;  %1162 = vrot.lane.b32.xlu1 %v7193_v29, %s9400_s18  ;;  %1074 = vrot.lane.b32.xlu0 %v1057_v50, %s9399_s19  ;;  %s6330_s19 = smov 83  }
 0x177   :  { %v705_v14 = vpop.permute.xlu1 %704  ;;  %v7308_v51 = vpop.permute.xlu0 %614 }
 0x178   :  { %v717_v27 = vsel %vm9410_vm11, %v6991_v35, %v705_v14  ;;  %v626_v16 = vsel %vm620_vm5, %v613_v21, %v7308_v51 }
 0x179   :  { %733 = vst [vmem:[#allocation2 + $0x60] sm:$0xc0] %v717_v27  ;;  %642 = vst [vmem:[#allocation2 + $0x68] sm:$0x30] %v626_v16  ;;  %1253 = vrot.lane.b32.xlu1 %v6911_v42, %s9393_s26  ;;  %1164 = vrot.lane.b32.xlu0 %v7165_v56, %s9400_s18  ;;  %s6332_s18 = smov 114  }
 0x17b   :  { %v795_v48 = vpop.permute.xlu1 %794  ;;  %v7322_v18 = vpop.permute.xlu0 %706 }
 0x17c   :  { %v807_v35 = vsel %vm9411_vm9, %v7016_v63, %v795_v48  ;;  %v718_v59 = vsel %vm9410_vm11, %v705_v14, %v7322_v18  ;;  %vm9412_vm11 = vcmask 523264  }
 0x17d   :  { %823 = vst [vmem:[#allocation2 + $0xa0] sm:$0x3] %v807_v35  ;;  %734 = vst [vmem:[#allocation2 + $0x68] sm:$0xc0] %v718_v59  ;;  %1344 = vrot.lane.b32.xlu1 %v6890_v32, %s9394_s27  ;;  %1255 = vrot.lane.b32.xlu0 %v1238_v55, %s9393_s26  ;;  %s6333_s26 = smov 112  }
 0x17e   :  { %v6274_v35 = vld [vmem:[%s9333_s0 + $0x12] ss:$0 sps:$4 sm:$0x33]  }
 0x17f   :  { %v886_v31 = vpop.permute.xlu1 %885  ;;  %v7332_v25 = vpop.permute.xlu0 %796 }
 0x180   :  { %v898_v11 = vsel %vm893_vm8, %v7027_v7, %v886_v31  ;;  %v808_v63 = vsel %vm9411_vm9, %v795_v48, %v7332_v25  ;;  %v2257_v22 = vld [vmem:[#allocation2 + $0x60] sm:$0xff]  ;;  %vm9413_vm9 = vmmov %vm9412_vm11  ;;  %v1850_v48 = vcombine.high %v7091_v47, %v7091_v47 }
 0x181   :  { %914 = vst [vmem:[#allocation2 + $0xa0] sm:$0xc] %v898_v11  ;;  %824 = vst [vmem:[#allocation2 + $0xa8] sm:$0x3] %v808_v63  ;;  %1436 = vrot.lane.b32.xlu1 %v6645_v44, %s9395_s23  ;;  %1346 = vrot.lane.b32.xlu0 %v7178_v6, %s9394_s27  ;;  %v5600_v50 = vpack.c.bf16 %v2257_v22, %v2249_v12  ;;  %s6335_s27 = smov 99  }
 0x182   :  { %5333 = vst.sshfl [vmem:[#allocation2 + $0x170] sm:$0x3 pattern:$0x76325410] %v1850_v48 }
 0x183   :  { %v977_v5 = vpop.permute.xlu1 %976  ;;  %v7342_v39 = vpop.permute.xlu0 %887  ;;  %v6275_v11 = vld [vmem:[%s9333_s0 + $0x12] ss:$0 sps:$4 sm:$0x33]  }
 0x184   :  { %v989_v7 = vsel %vm9412_vm11, %v7043_v20, %v977_v5  ;;  %v899_v3 = vsel %vm893_vm8, %v886_v31, %v7342_v39  ;;  %v2258_v49 = vld [vmem:[#allocation2 + $0x68] sm:$0xff]  ;;  %vm9414_vm11 = vcmask 506880   ;;  %v2110_v22 = vrot.slane %v6275_v11, %v6436_v8 }
 0x185   :  { %1005 = vst [vmem:[#allocation2 + $0xa0] sm:$0x30] %v989_v7  ;;  %915 = vst [vmem:[#allocation2 + $0xa8] sm:$0xc] %v899_v3  ;;  %1526 = vrot.lane.b32.xlu1 %v7193_v29, %s9396_s22  ;;  %1438 = vrot.lane.b32.xlu0 %v1421_v0, %s9395_s23  ;;  %v5598_v46 = vpack.c.bf16 %v2258_v49, %v2250_v30  ;;  %v1602_v29 = vrot.slane %v6272_v61, %v6436_v8  ;;  %s6334_s23 = smov 110  }
 0x186   :  { %v2111_v12 = vcombine.low %v2110_v22, %v2110_v22 }
 0x187   :  { %v1069_v21 = vpop.permute.xlu1 %1068  ;;  %v7354_v20 = vpop.permute.xlu0 %978  ;;  %5599 = vmatprep.subr.bf16.mxu0 %v5598_v46  ;;  %v2193_v46 = vcombine.high %v7106_v1, %v7106_v1 }
 0x188   :  { %v1081_v17 = vsel %vm1076_vm10, %v7061_v10, %v1069_v21  ;;  %v990_v24 = vsel %vm9413_vm9, %v977_v5, %v7354_v20  ;;  %5601 = vmatpush1.bf16.msra.mxu0 %v5600_v50  ;;  %vm9416_vm9 = vcmask 498688  }
 0x189   :  { %1097 = vst [vmem:[#allocation2 + $0xa0] sm:$0xc0] %v1081_v17  ;;  %1006 = vst [vmem:[#allocation2 + $0xa8] sm:$0x30] %v990_v24  ;;  %1617 = vrot.lane.b32.xlu1 %v6911_v42, %s6320_s28  ;;  %1528 = vrot.lane.b32.xlu0 %v7165_v56, %s9396_s22  ;;  %v1784_v42 = vrot.slane %v6273_v43, %v6436_v8  ;;  %s9417_s22 = smov 28  }
 0x18b   :  { %v1159_v14 = vpop.permute.xlu1 %1158  ;;  %v7368_v10 = vpop.permute.xlu0 %1070 }
 0x18c   :  { %v1171_v27 = vsel %vm9414_vm11, %v7074_v53, %v1159_v14  ;;  %v1082_v16 = vsel %vm1076_vm10, %v1069_v21, %v7368_v10 }
 0x18d   :  { %1187 = vst [vmem:[#allocation2 + $0xe0] sm:$0x3] %v1171_v27  ;;  %1098 = vst [vmem:[#allocation2 + $0xa8] sm:$0xc0] %v1082_v16  ;;  %1708 = vrot.lane.b32.xlu1 %v6890_v32, %s9415_s15  ;;  %1619 = vrot.lane.b32.xlu0 %v1602_v29, %s6320_s28  ;;  %v1785_v32 = vcombine.low %v1784_v42, %v1784_v42  ;;  %s6339_s28 = smov 82  }
 0x18f   :  { %v1250_v56 = vpop.permute.xlu1 %1249  ;;  %v7378_v55 = vpop.permute.xlu0 %1160 }
 0x190   :  { %v1262_v54 = vsel %vm9416_vm9, %v7096_v28, %v1250_v56  ;;  %v1172_v53 = vsel %vm9414_vm11, %v1159_v14, %v7378_v55  ;;  %v1864_v28 = vrot.slane %v1850_v48, %v6436_v8  ;;  %vm9418_vm9 = vcmask 490496   ;;  %v2265_v16 = vld [vmem:[#allocation2 + $0xa0] sm:$0xff] }
 0x191   :  { %1278 = vst [vmem:[#allocation2 + $0xe0] sm:$0xc] %v1262_v54  ;;  %1188 = vst [vmem:[#allocation2 + $0xe8] sm:$0x3] %v1172_v53  ;;  %1800 = vrot.lane.b32.xlu1 %v6645_v44, %s9417_s22  ;;  %1710 = vrot.lane.b32.xlu0 %v7178_v6, %s9415_s15  ;;  %vm9419_vm11 = vcmask 498688   ;;  %v1930_v6 = vrot.slane %v6274_v35, %v6436_v8  ;;  %s6337_s15 = smov 86  }
 0x192   :  { %v1866_v31 = vcombine.high %v1864_v28, %v1864_v28 }
 0x193   :  { %v1341_v59 = vpop.permute.xlu1 %1340  ;;  %v7394_v58 = vpop.permute.xlu0 %1251 }
 0x194   :  { %v1353_v47 = vsel %vm9418_vm9, %v7108_v4, %v1341_v59  ;;  %v1263_v44 = vsel %vm9419_vm11, %v1250_v56, %v7394_v58  ;;  %v5334_v4 = vld.sshfl [vmem:[%s9333_s0 + $0x12] sm:$0x3 pattern:$0x76325410]  ;;  %1882 = vst [vmem:[#allocation2 + $0x178] sm:$0x3] %v1866_v31 }
 0x195   :  { %1369 = vst [vmem:[#allocation2 + $0xe0] sm:$0x30] %v1353_v47  ;;  %1279 = vst [vmem:[#allocation2 + $0xe8] sm:$0xc] %v1263_v44  ;;  %1945 = vrot.lane.b32.xlu1 %v7131_v15, %s6305_s30  ;;  %1802 = vrot.lane.b32.xlu0 %v1785_v32, %s9417_s22  ;;  %vm9420_vm9 = vcmask 261120   ;;  %vm9421_vm11 = vcmask 490496   ;;  %v2020_v5 = vcombine.low %v5334_v4, %v5334_v4 }
 0x196   :  { %s9422_s0 = smov 124   ;;  %v2266_v43 = vld [vmem:[#allocation2 + $0xa8] sm:$0xff]  ;;  %s6338_s22 = smov 84  }
 0x197   :  { %v1433_v63 = vpop.permute.xlu1 %1432  ;;  %v7410_v0 = vpop.permute.xlu0 %1342  ;;  %v2302_v56 = vld [vmem:[%s9335_s2 + $0x8] sm:$0xf] }
 0x198   :  { %v1445_v30 = vsel %vm9420_vm9, %v7120_v9, %v1433_v63  ;;  %v1354_v15 = vsel %vm9421_vm11, %v1341_v59, %v7410_v0  ;;  %vm9423_vm11 = vcmask 769024  }
 0x199   :  { %1461 = vst [vmem:[#allocation2 + $0xe0] sm:$0xc0] %v1445_v30  ;;  %1370 = vst [vmem:[#allocation2 + $0xe8] sm:$0x30] %v1354_v15  ;;  %2035 = vrot.lane.b32.xlu1 %v7106_v1, %s6304_s29  ;;  %1947 = vrot.lane.b32.xlu0 %v1930_v6, %s6305_s30 }
 0x19b   :  { %v1523_v7 = vpop.permute.xlu1 %1522  ;;  %v7420_v3 = vpop.permute.xlu0 %1434 }
 0x19c   :  { %v1535_v49 = vsel %vm1530_vm15, %v7133_v26, %v1523_v7  ;;  %v1446_v9 = vsel %vm9420_vm9, %v1433_v63, %v7420_v3  ;;  %vm9424_vm9 = vcmask 760832  }
 0x19d   :  { %1551 = vst [vmem:[#allocation2 + $0x120] sm:$0x3] %v1535_v49  ;;  %1462 = vst [vmem:[#allocation2 + $0xe8] sm:$0xc0] %v1446_v9  ;;  %2126 = vrot.lane.b32.xlu1 %v6839_v41, %s6306_s14  ;;  %2037 = vrot.lane.b32.xlu0 %v2020_v5, %s6304_s29  ;;  %v2301_v41 = vld [vmem:[%s9335_s2] sm:$0xff]  ;;  %s6336_s2 = smov 97  }
 0x19f   :  { %v1614_v61 = vpop.permute.xlu1 %1613  ;;  %v7431_v50 = vpop.permute.xlu0 %1524 }
 0x1a0   :  { %v1626_v26 = vsel %vm1621_vm14, %v7148_v34, %v1614_v61  ;;  %v1536_v21 = vsel %vm1530_vm15, %v1523_v7, %v7431_v50  ;;  %v2273_v24 = vld [vmem:[#allocation2 + $0xe0] sm:$0xff] }
 0x1a1   :  { %1642 = vst [vmem:[#allocation2 + $0x120] sm:$0xc] %v1626_v26  ;;  %1552 = vst [vmem:[#allocation2 + $0x128] sm:$0x3] %v1536_v21  ;;  %2215 = vrot.lane.b32.xlu1 %v2193_v46, %s9422_s0  ;;  %2128 = vrot.lane.b32.xlu0 %v2111_v12, %s6306_s14  ;;  %v5604_v42 = vpack.c.bf16 %v2273_v24, %v2265_v16 }
 0x1a3   :  { %v1705_v1 = vpop.permute.xlu1 %1704  ;;  %v7442_v17 = vpop.permute.xlu0 %1615 }
 0x1a4   :  { %v1717_v34 = vsel %vm1712_vm13, %v7167_v60, %v1705_v1  ;;  %v1627_v29 = vsel %vm1621_vm14, %v1614_v61, %v7442_v17  ;;  %v2274_v14 = vld [vmem:[#allocation2 + $0xe8] sm:$0xff] }
 0x1a5   :  { %1733 = vst [vmem:[#allocation2 + $0x120] sm:$0x30] %v1717_v34  ;;  %1643 = vst [vmem:[#allocation2 + $0x128] sm:$0xc] %v1627_v29  ;;  %2217 = vrot.lane.b32.xlu0 %v5334_v4, %s9422_s0  ;;  %v5602_v27 = vpack.c.bf16 %v2274_v14, %v2266_v43  ;;  %2305 = vperm.xlu1 %6145, %v2301_v41  }
 0x1a7   :  { %v1797_v54 = vpop.permute.xlu1 %1796  ;;  %v7452_v53 = vpop.permute.xlu0 %1706  ;;  %5603 = vmatprep.subr.bf16.mxu0 %v5602_v27 }
 0x1a8   :  { %v1809_v60 = vsel %vm1804_vm12, %v7181_v2, %v1797_v54  ;;  %v1718_v48 = vsel %vm1712_vm13, %v1705_v1, %v7452_v53  ;;  %5605 = vmatpush1.bf16.msra.mxu0 %v5604_v42 }
 0x1a9   :  { %1825 = vst [vmem:[#allocation2 + $0x120] sm:$0xc0] %v1809_v60  ;;  %1734 = vst [vmem:[#allocation2 + $0x128] sm:$0x30] %v1718_v48  ;;  %2310 = vperm.xlu0 %6146, %v2302_v56  }
 0x1ab   :  { %v1942_v32 = vpop.permute.xlu1 %1941  ;;  %v7458_v35 = vpop.permute.xlu0 %1798 }
 0x1ac   :  { %v1953_v28 = vsel %vm165_vm2, %v7195_v57, %v1942_v32  ;;  %v1810_v59 = vsel %vm1804_vm12, %v1797_v54, %v7458_v35 }
 0x1ad   :  { %1969 = vst [vmem:[#allocation2 + $0x160] sm:$0xc] %v1953_v28  ;;  %1826 = vst [vmem:[#allocation2 + $0x128] sm:$0xc0] %v1810_v59 }
 0x1af   :  { %v2032_v47 = vpop.permute.xlu1 %2031  ;;  %v7464_v2 = vpop.permute.xlu0 %1943 }
 0x1b0   :  { %v2043_v44 = vsel %vm256_vm0, %v7208_v38, %v2032_v47  ;;  %v1954_v31 = vsel %vm165_vm2, %v1942_v32, %v7464_v2  ;;  %v2281_v41 = vld [vmem:[#allocation2 + $0x120] sm:$0xff] }
 0x1b1   :  { %2059 = vst [vmem:[#allocation2 + $0x160] sm:$0x30] %v2043_v44  ;;  %1970 = vst [vmem:[#allocation2 + $0x168] sm:$0xc] %v1954_v31 }
 0x1b3   :  { %v2123_v6 = vpop.permute.xlu1 %2122  ;;  %v7470_v11 = vpop.permute.xlu0 %2033 }
 0x1b4   :  { %v2134_v57 = vsel %vm348_vm1, %v7222_v36, %v2123_v6  ;;  %v2044_v4 = vsel %vm256_vm0, %v2032_v47, %v7470_v11  ;;  %v2282_v49 = vld [vmem:[#allocation2 + $0x128] sm:$0xff] }
 0x1b5   :  { %2150 = vst [vmem:[#allocation2 + $0x160] sm:$0xc0] %v2134_v57  ;;  %2060 = vst [vmem:[#allocation2 + $0x168] sm:$0x30] %v2044_v4 }
 0x1b7   :  { %v2212_v63 = vpop.permute.xlu1 %2211  ;;  %v7476_v30 = vpop.permute.xlu0 %2124 }
 0x1b8   :  { %v2223_v38 = vsel %vm438_vm3, %v7232_v23, %v2212_v63  ;;  %v2135_v15 = vsel %vm348_vm1, %v2123_v6, %v7476_v30 }
 0x1b9   :  { %2239 = vst [vmem:[#allocation2 + $0x1a0] sm:$0x3] %v2223_v38  ;;  %2151 = vst [vmem:[#allocation2 + $0x168] sm:$0xc0] %v2135_v15 }
 0x1bb   :  { %v162_v5 = vpop.permute.xlu1 %161  ;;  %v7482_v22 = vpop.permute.xlu0 %2213 }
 0x1bc   :  { %v172_v36 = vsel %vm165_vm2, %v7242_v62, %v162_v5  ;;  %v2224_v7 = vsel %vm438_vm3, %v2212_v63, %v7482_v22  ;;  %v2289_v23 = vld [vmem:[#allocation2 + $0x160] sm:$0xff] }
 0x1bd   :  { %188 = vst [vmem:[#allocation2 + $0x30] sm:$0xc] %v172_v36  ;;  %2240 = vst [vmem:[#allocation2 + $0x1a8] sm:$0x3] %v2224_v7  ;;  %v5608_v62 = vpack.c.bf16 %v2289_v23, %v2281_v41 }
 0x1bf   :  { %v253_v9 = vpop.permute.xlu1 %252  ;;  %v164_v46 = vpop.permute.xlu0 %163 }
 0x1c0   :  { %v263_v12 = vsel %vm256_vm0, %v7254_v13, %v253_v9  ;;  %v173_v61 = vsel %vm165_vm2, %v162_v5, %v164_v46  ;;  %v2290_v26 = vld [vmem:[#allocation2 + $0x168] sm:$0xff]  ;;  %v2297_v27 = vld [vmem:[#allocation2 + $0x1a0] sm:$0x3] }
 0x1c1   :  { %279 = vst [vmem:[#allocation2 + $0x30] sm:$0x30] %v263_v12  ;;  %189 = vst [vmem:[#allocation2 + $0x38] sm:$0xc] %v173_v61  ;;  %v5606_v21 = vpack.c.bf16 %v2290_v26, %v2282_v49 }
 0x1c3   :  { %v345_v1 = vpop.permute.xlu1 %344  ;;  %v255_v24 = vpop.permute.xlu0 %254  ;;  %5607 = vmatprep.subr.bf16.mxu0 %v5606_v21 }
 0x1c4   :  { %v355_v34 = vsel %vm348_vm1, %v7269_v45, %v345_v1  ;;  %v264_v29 = vsel %vm256_vm0, %v253_v9, %v255_v24  ;;  %5609 = vmatpush1.bf16.msra.mxu0 %v5608_v62  ;;  %v2298_v43 = vld [vmem:[#allocation2 + $0x1a8] sm:$0x3] }
 0x1c5   :  { %371 = vst [vmem:[#allocation2 + $0x30] sm:$0xc0] %v355_v34  ;;  %280 = vst [vmem:[#allocation2 + $0x38] sm:$0x30] %v264_v29  ;;  %5344 = vmatprep.subr.msk.mxu0 %vm2320_vm6, %v2298_v43 }
 0x1c7   :  { %v435_v13 = vpop.permute.xlu1 %434  ;;  %v347_v14 = vpop.permute.xlu0 %346 }
 0x1c8   :  { %v445_v16 = vsel %vm438_vm3, %v7282_v52, %v435_v13  ;;  %v356_v42 = vsel %vm348_vm1, %v345_v1, %v347_v14  ;;  %5345 = vmatpush1.msk.msra.mxu0 %vm2320_vm6, %v2297_v27 }
 0x1c9   :  { %461 = vst [vmem:[#allocation2 + $0x70] sm:$0x3] %v445_v16  ;;  %372 = vst [vmem:[#allocation2 + $0x38] sm:$0xc0] %v356_v42  ;;  %5346 = vmatmul.mubr.msk.f32.vlgmr.msra.gmra.mrb[8].mxu0 %vm9384_vm7, %v7036_v33 }
 0x1ca   :  { %2569 = vmatprep.mubr.f32.mxu0 %v6323_v19 }
 0x1cb   :  { %v526_v45 = vpop.permute.xlu1 %525  ;;  %v437_v56 = vpop.permute.xlu0 %436 }
 0x1cc   :  { %v536_v54 = vsel %vm9385_vm4, %v7295_v40, %v526_v45  ;;  %v446_v60 = vsel %vm438_vm3, %v435_v13, %v437_v56  ;;  %v2251_v9 = vld [vmem:[#allocation2 + $0x30] sm:$0xff] }
 0x1cd   :  { %552 = vst [vmem:[#allocation2 + $0x70] sm:$0xc] %v536_v54  ;;  %462 = vst [vmem:[#allocation2 + $0x78] sm:$0x3] %v446_v60  ;;  %5347 = vmatmul.mubr.msk.f32.gmra.mrb[10].mxu0 %vm9384_vm7, %v7055_v37 }
 0x1ce   :  { %vm9425_vm7 = vmmov %vm9423_vm11 }
 0x1cf   :  { %v617_v52 = vpop.permute.xlu1 %616  ;;  %v528_v48 = vpop.permute.xlu0 %527 }
 0x1d0   :  { %v627_v32 = vsel %vm620_vm5, %v7308_v51, %v617_v52  ;;  %v537_v33 = vsel %vm9385_vm4, %v526_v45, %v528_v48  ;;  %vm9426_vm4 = vmmov %vm9424_vm9  ;;  %v2252_v63 = vld [vmem:[#allocation2 + $0x38] sm:$0xff] }
 0x1d1   :  { %643 = vst [vmem:[#allocation2 + $0x70] sm:$0x30] %v627_v32  ;;  %553 = vst [vmem:[#allocation2 + $0x78] sm:$0xc] %v537_v33 }
 0x1d3   :  { %v709_v28 = vpop.permute.xlu1 %708  ;;  %v619_v59 = vpop.permute.xlu0 %618 }
 0x1d4   :  { %v719_v40 = vsel %vm9423_vm11, %v7322_v18, %v709_v28  ;;  %v628_v47 = vsel %vm620_vm5, %v617_v52, %v619_v59  ;;  %vm9427_vm5 = vcmask 523264  }
 0x1d5   :  { %735 = vst [vmem:[#allocation2 + $0x70] sm:$0xc0] %v719_v40  ;;  %644 = vst [vmem:[#allocation2 + $0x78] sm:$0x30] %v628_v47 }
 0x1d7   :  { %v799_v44 = vpop.permute.xlu1 %798  ;;  %v711_v37 = vpop.permute.xlu0 %710 }
 0x1d8   :  { %v809_v31 = vsel %vm9424_vm9, %v7332_v25, %v799_v44  ;;  %v720_v51 = vsel %vm9425_vm7, %v709_v28, %v711_v37  ;;  %vm9429_vm7 = vcmask 506880   ;;  %vm9432_vm9 = vcmask 490496  }
 0x1d9   :  { %825 = vst [vmem:[#allocation2 + $0xb0] sm:$0x3] %v809_v31  ;;  %736 = vst [vmem:[#allocation2 + $0x78] sm:$0xc0] %v720_v51 }
 0x1da   :  { %vm9431_vm11 = vmmov %vm9429_vm7 }
 0x1db   :  { %v890_v6 = vpop.permute.xlu1 %889  ;;  %v801_v57 = vpop.permute.xlu0 %800 }
 0x1dc   :  { %v900_v4 = vsel %vm893_vm8, %v7342_v39, %v890_v6  ;;  %v810_v18 = vsel %vm9426_vm4, %v799_v44, %v801_v57  ;;  %v2259_v5 = vld [vmem:[#allocation2 + $0x70] sm:$0xff]  ;;  %vm9428_vm4 = vmmov %vm9427_vm5 }
 0x1dd   :  { %916 = vst [vmem:[#allocation2 + $0xb0] sm:$0xc] %v900_v4  ;;  %826 = vst [vmem:[#allocation2 + $0xb8] sm:$0x3] %v810_v18  ;;  %v5612_v46 = vpack.c.bf16 %v2259_v5, %v2251_v9 }
 0x1df   :  { %v981_v38 = vpop.permute.xlu1 %980  ;;  %v892_v15 = vpop.permute.xlu0 %891 }
 0x1e0   :  { %v991_v25 = vsel %vm9427_vm5, %v7354_v20, %v981_v38  ;;  %v901_v36 = vsel %vm893_vm8, %v890_v6, %v892_v15  ;;  %v2260_v7 = vld [vmem:[#allocation2 + $0x78] sm:$0xff]  ;;  %vm9430_vm8 = vcmask 498688  }
 0x1e1   :  { %1007 = vst [vmem:[#allocation2 + $0xb0] sm:$0x30] %v991_v25  ;;  %917 = vst [vmem:[#allocation2 + $0xb8] sm:$0xc] %v901_v36  ;;  %v5610_v49 = vpack.c.bf16 %v2260_v7, %v2252_v63 }
 0x1e2   :  { %vm9433_vm5 = vmmov %vm9430_vm8 }
 0x1e3   :  { %v1073_v39 = vpop.permute.xlu1 %1072  ;;  %v983_v23 = vpop.permute.xlu0 %982  ;;  %5611 = vmatprep.subr.bf16.mxu1 %v5610_v49 }
 0x1e4   :  { %v1083_v12 = vsel %vm1076_vm10, %v7368_v10, %v1073_v39  ;;  %v992_v61 = vsel %vm9428_vm4, %v981_v38, %v983_v23  ;;  %5613 = vmatpush1.bf16.msra.mxu1 %v5612_v46  ;;  %vm9435_vm4 = vmmov %vm9432_vm9 }
 0x1e5   :  { %1099 = vst [vmem:[#allocation2 + $0xb0] sm:$0xc0] %v1083_v12  ;;  %1008 = vst [vmem:[#allocation2 + $0xb8] sm:$0x30] %v992_v61 }
 0x1e7   :  { %v1163_v20 = vpop.permute.xlu1 %1162  ;;  %v1075_v26 = vpop.permute.xlu0 %1074 }
 0x1e8   :  { %v1173_v21 = vsel %vm9429_vm7, %v7378_v55, %v1163_v20  ;;  %v1084_v41 = vsel %vm1076_vm10, %v1073_v39, %v1075_v26  ;;  %vm9434_vm10 = vcmask 261120  }
 0x1e9   :  { %1189 = vst [vmem:[#allocation2 + $0xf0] sm:$0x3] %v1173_v21  ;;  %1100 = vst [vmem:[#allocation2 + $0xb8] sm:$0xc0] %v1084_v41 }
 0x1ea   :  { %vm9436_vm7 = vmmov %vm9434_vm10 }
 0x1eb   :  { %v1254_v62 = vpop.permute.xlu1 %1253  ;;  %v1165_v1 = vpop.permute.xlu0 %1164 }
 0x1ec   :  { %v1264_v24 = vsel %vm9430_vm8, %v7394_v58, %v1254_v62  ;;  %v1174_v10 = vsel %vm9431_vm11, %v1163_v20, %v1165_v1  ;;  %v2267_v44 = vld [vmem:[#allocation2 + $0xb0] sm:$0xff] }
 0x1ed   :  { %1280 = vst [vmem:[#allocation2 + $0xf0] sm:$0xc] %v1264_v24  ;;  %1190 = vst [vmem:[#allocation2 + $0xf8] sm:$0x3] %v1174_v10  ;;  %v6277_v10 = vld [vmem:[%s9334_s1] sm:$0xff] }
 0x1ef   :  { %v1345_v34 = vpop.permute.xlu1 %1344  ;;  %v1256_v29 = vpop.permute.xlu0 %1255 }
 0x1f0   :  { %v1355_v43 = vsel %vm9432_vm9, %v7410_v0, %v1345_v34  ;;  %v1265_v55 = vsel %vm9433_vm5, %v1254_v62, %v1256_v29  ;;  %v2268_v59 = vld [vmem:[#allocation2 + $0xb8] sm:$0xff] }
 0x1f1   :  { %1371 = vst [vmem:[#allocation2 + $0xf0] sm:$0x30] %v1355_v43  ;;  %1281 = vst [vmem:[#allocation2 + $0xf8] sm:$0xc] %v1265_v55 }
 0x1f3   :  { %v1437_v13 = vpop.permute.xlu1 %1436  ;;  %v1347_v14 = vpop.permute.xlu0 %1346 }
 0x1f4   :  { %v1447_v27 = vsel %vm9434_vm10, %v7420_v3, %v1437_v13  ;;  %v1356_v58 = vsel %vm9435_vm4, %v1345_v34, %v1347_v14  ;;  %v6278_v14 = vld [vmem:[%s9334_s1 + $0x8] sm:$0xf]  ;;  %s6326_s1 = smov 111  }
 0x1f5   :  { %1463 = vst [vmem:[#allocation2 + $0xf0] sm:$0xc0] %v1447_v27  ;;  %1372 = vst [vmem:[#allocation2 + $0xf8] sm:$0x30] %v1356_v58 }
 0x1f7   :  { %v1527_v16 = vpop.permute.xlu1 %1526  ;;  %v1439_v42 = vpop.permute.xlu0 %1438 }
 0x1f8   :  { %v1537_v45 = vsel %vm1530_vm15, %v7431_v50, %v1527_v16  ;;  %v1448_v0 = vsel %vm9436_vm7, %v1437_v13, %v1439_v42 }
 0x1f9   :  { %1553 = vst [vmem:[#allocation2 + $0x130] sm:$0x3] %v1537_v45  ;;  %1464 = vst [vmem:[#allocation2 + $0xf8] sm:$0xc0] %v1448_v0 }
 0x1fb   :  { %v1618_v56 = vpop.permute.xlu1 %1617  ;;  %v1529_v54 = vpop.permute.xlu0 %1528 }
 0x1fc   :  { %v1628_v60 = vsel %vm1621_vm14, %v7442_v17, %v1618_v56  ;;  %v1538_v3 = vsel %vm1530_vm15, %v1527_v16, %v1529_v54  ;;  %v2275_v33 = vld [vmem:[#allocation2 + $0xf0] sm:$0xff] }
 0x1fd   :  { %1644 = vst [vmem:[#allocation2 + $0x130] sm:$0xc] %v1628_v60  ;;  %1554 = vst [vmem:[#allocation2 + $0x138] sm:$0x3] %v1538_v3  ;;  %v5616_v37 = vpack.c.bf16 %v2275_v33, %v2267_v44 }
 0x1fe   :  { %v7543_v52 = vpop.f32.mrb[0].mxu0 }
 0x1ff   :  { %v1709_v48 = vpop.permute.xlu1 %1708  ;;  %v1620_v32 = vpop.permute.xlu0 %1619 }
 0x200   :  { %v1719_v50 = vsel %vm1712_vm13, %v7452_v53, %v1709_v48  ;;  %v1629_v28 = vsel %vm1621_vm14, %v1618_v56, %v1620_v32  ;;  %v2276_v40 = vld [vmem:[#allocation2 + $0xf8] sm:$0xff]  ;;  %v2413_v47 = vpop.f32.mrb[1].mxu0 }
 0x201   :  { %1735 = vst [vmem:[#allocation2 + $0x130] sm:$0x30] %v1719_v50  ;;  %1645 = vst [vmem:[#allocation2 + $0x138] sm:$0xc] %v1629_v28  ;;  %v5614_v17 = vpack.c.bf16 %v2276_v40, %v2268_v59 }
 0x202   :  { %v2417_v31 = vpop.f32.mrb[2].mxu0 }
 0x203   :  { %v1801_v51 = vpop.permute.xlu1 %1800  ;;  %v1711_v6 = vpop.permute.xlu0 %1710  ;;  %5615 = vmatprep.subr.bf16.mxu1 %v5614_v17 }
 0x204   :  { %v1811_v57 = vsel %vm1804_vm12, %v7458_v35, %v1801_v51  ;;  %v1720_v4 = vsel %vm1712_vm13, %v1709_v48, %v1711_v6  ;;  %5617 = vmatpush1.bf16.msra.mxu1 %v5616_v37  ;;  %v2419_v53 = vpop.f32.mrb[3].mxu0  ;;  %v2886_v6 = vld [vmem:[%s9338_s5 + $0x8] sm:$0xff]  ;;  %vm9439_vm13 = vcmask 785408  }
 0x205   :  { %1827 = vst [vmem:[#allocation2 + $0x130] sm:$0xc0] %v1811_v57  ;;  %1736 = vst [vmem:[#allocation2 + $0x138] sm:$0x30] %v1720_v4  ;;  %v2888_v57 = vld [vmem:[%s9338_s5 + $0x18] sm:$0xff] }
 0x206   :  { %v5622_v4 = vpack.c.bf16 %v2888_v57, %v2886_v6  ;;  %v2920_v6 = vld [vmem:[%s9338_s5 + $0x118] sm:$0xff]  ;;  %vm9440_vm14 = vmmov %vm9439_vm13 }
 0x207   :  { %v1946_v18 = vpop.permute.xlu1 %1945  ;;  %v1803_v63 = vpop.permute.xlu0 %1802  ;;  %vm9441_vm15 = vmmov %vm9439_vm13 }
 0x208   :  { %v1955_v38 = vsel %vm165_vm2, %v7464_v2, %v1946_v18  ;;  %v1812_v15 = vsel %vm1804_vm12, %v1801_v51, %v1803_v63  ;;  %vm9437_vm12 = vcmask 408576   ;;  %5623 = vmatprep.subr.bf16.mxu0 %v5622_v4  ;;  %vm9442_vm8 = vmmov %vm9439_vm13 }
 0x209   :  { %1971 = vst [vmem:[#allocation2 + $0x170] sm:$0xc] %v1955_v38  ;;  %1828 = vst [vmem:[#allocation2 + $0x138] sm:$0xc0] %v1812_v15  ;;  %v2890_v38 = vld [vmem:[%s9338_s5 + $0x28] sm:$0xff]  ;;  %v2892_v15 = vld [vmem:[%s9338_s5 + $0x38] sm:$0xff] }
 0x20a   :  { %vm9443_vm11 = vmmov %vm9442_vm8 }
 0x20b   :  { %v2036_v5 = vpop.permute.xlu1 %2035  ;;  %v1948_v25 = vpop.permute.xlu0 %1947  ;;  %vm9444_vm9 = vmmov %vm9442_vm8 }
 0x20c   :  { %v2045_v35 = vsel %vm256_vm0, %v7470_v11, %v2036_v5  ;;  %v1956_v36 = vsel %vm165_vm2, %v1946_v18, %v1948_v25  ;;  %v2283_v41 = vld [vmem:[#allocation2 + $0x130] sm:$0xff]  ;;  %v2889_v25 = vld [vmem:[%s9338_s5 + $0x20] sm:$0xff]  ;;  %vm9445_vm5 = vmmov %vm9442_vm8 }
 0x20d   :  { %2061 = vst [vmem:[#allocation2 + $0x170] sm:$0x30] %v2045_v35  ;;  %1972 = vst [vmem:[#allocation2 + $0x178] sm:$0xc] %v1956_v36  ;;  %v2887_v18 = vld [vmem:[%s9338_s5 + $0x10] sm:$0xff] }
 0x20e   :  { %v2891_v35 = vld [vmem:[%s9338_s5 + $0x30] sm:$0xff]  ;;  %vm9446_vm10 = vmmov %vm9445_vm5 }
 0x20f   :  { %v2127_v7 = vpop.permute.xlu1 %2126  ;;  %v2038_v49 = vpop.permute.xlu0 %2037  ;;  %v5628_v36 = vpack.c.bf16 %v2891_v35, %v2889_v25  ;;  %vm9447_vm4 = vmmov %vm9445_vm5 }
 0x210   :  { %v2136_v9 = vsel %vm348_vm1, %v7476_v30, %v2127_v7  ;;  %v2046_v2 = vsel %vm256_vm0, %v2036_v5, %v2038_v49  ;;  %v2284_v20 = vld [vmem:[#allocation2 + $0x138] sm:$0xff]  ;;  %v5626_v5 = vpack.c.bf16 %v2892_v15, %v2890_v38  ;;  %vm9448_vm7 = vmmov %vm9447_vm4 }
 0x211   :  { %2152 = vst [vmem:[#allocation2 + $0x170] sm:$0xc0] %v2136_v9  ;;  %2062 = vst [vmem:[#allocation2 + $0x178] sm:$0x30] %v2046_v2  ;;  %v2896_v49 = vld [vmem:[%s9338_s5 + $0x58] sm:$0xff]  ;;  %v2893_v9 = vld [vmem:[%s9338_s5 + $0x40] sm:$0xff] }
 0x212   :  { %v2924_v38 = vld [vmem:[%s9338_s5 + $0x138] sm:$0xff] }
 0x213   :  { %v2216_v46 = vpop.permute.xlu1 %2215  ;;  %v2129_v39 = vpop.permute.xlu0 %2128 }
 0x214   :  { %v2225_v23 = vsel %vm438_vm3, %v7482_v22, %v2216_v46  ;;  %v2137_v11 = vsel %vm348_vm1, %v2127_v7, %v2129_v39  ;;  %v2894_v7 = vld [vmem:[%s9338_s5 + $0x48] sm:$0xff] }
 0x215   :  { %2241 = vst [vmem:[#allocation2 + $0x1b0] sm:$0x3] %v2225_v23  ;;  %2153 = vst [vmem:[#allocation2 + $0x178] sm:$0xc0] %v2137_v11  ;;  %v5630_v2 = vpack.c.bf16 %v2896_v49, %v2894_v7  ;;  %v2898_v39 = vld [vmem:[%s9338_s5 + $0x68] sm:$0xff]  ;;  %v2900_v23 = vld [vmem:[%s9338_s5 + $0x78] sm:$0xff] }
 0x216   :  { %v2921_v7 = vld [vmem:[%s9338_s5 + $0x120] sm:$0xff]  ;;  %v2923_v49 = vld [vmem:[%s9338_s5 + $0x130] sm:$0xff] }
 0x217   :  { %v2218_v12 = vpop.permute.xlu0 %2217 }
 0x218   :  { %v2226_v61 = vsel %vm438_vm3, %v2216_v46, %v2218_v12  ;;  %v2291_v26 = vld [vmem:[#allocation2 + $0x170] sm:$0xff]  ;;  %v5634_v12 = vpack.c.bf16 %v2900_v23, %v2898_v39 }
 0x219   :  { %2242 = vst [vmem:[#allocation2 + $0x1b8] sm:$0x3] %v2226_v61  ;;  %v5620_v62 = vpack.c.bf16 %v2291_v26, %v2283_v41  ;;  %v2895_v46 = vld [vmem:[%s9338_s5 + $0x50] sm:$0xff]  ;;  %v2897_v61 = vld [vmem:[%s9338_s5 + $0x60] sm:$0xff]  ;;  %v2902_v26 = vld [vmem:[%s9338_s5 + $0x88] sm:$0xff] }
 0x21a   :  { %v5632_v11 = vpack.c.bf16 %v2895_v46, %v2893_v9  ;;  %v2928_v46 = vld [vmem:[%s9338_s5 + $0x158] sm:$0xff] }
 0x21c   :  { %v2292_v30 = vld [vmem:[#allocation2 + $0x178] sm:$0xff]  ;;  %v2299_v22 = vld [vmem:[#allocation2 + $0x1b0] sm:$0x3] }
 0x21d   :  { %v5618_v21 = vpack.c.bf16 %v2292_v30, %v2284_v20  ;;  %v2899_v20 = vld [vmem:[%s9338_s5 + $0x70] sm:$0xff]  ;;  %v2904_v30 = vld [vmem:[%s9338_s5 + $0x98] sm:$0xff] }
 0x21e   :  { %v5638_v41 = vpack.c.bf16 %v2904_v30, %v2902_v26  ;;  %v2925_v30 = vld [vmem:[%s9338_s5 + $0x140] sm:$0xff] }
 0x21f   :  { %5619 = vmatprep.subr.bf16.mxu1 %v5618_v21  ;;  %v5636_v21 = vpack.c.bf16 %v2899_v20, %v2897_v61 }
 0x220   :  { %5621 = vmatpush1.bf16.msra.mxu1 %v5620_v62  ;;  %v2300_v1 = vld [vmem:[#allocation2 + $0x1b8] sm:$0x3]  ;;  %v2901_v62 = vld [vmem:[%s9338_s5 + $0x80] sm:$0xff] }
 0x221   :  { %5348 = vmatprep.subr.msk.mxu1 %vm2320_vm6, %v2300_v1  ;;  %v2903_v1 = vld [vmem:[%s9338_s5 + $0x90] sm:$0xff] }
 0x224   :  { %5349 = vmatpush1.msk.msra.mxu1 %vm2320_vm6, %v2299_v22  ;;  %v7566_v24 = vpop.permute.xlu1 %2305  ;;  %vm9438_vm6 = vmmov %vm9437_vm12  ;;  %v2906_v22 = vld [vmem:[%s9338_s5 + $0xa8] sm:$0xff] }
 0x225   :  { %5350 = vmatmul.mubr.msk.f32.vlgmr.msra.gmra.mrb[0].mxu1 %vm9437_vm12, %v6277_v10  ;;  %v7574_v34 = vadd.f32 %v7543_v52, %v7566_v24  ;;  %v7577_v29 = vadd.f32 %v2413_v47, %v7566_v24  ;;  %v2908_v10 = vld [vmem:[%s9338_s5 + $0xb8] sm:$0xff]  ;;  %vm9449_vm12 = vmmov %vm9447_vm4 }
 0x226   :  { %2646 = vmatprep.mubr.f32.mxu1 %v6323_v19 }
 0x227   :  { %v2653_v43 = vmax.f32 %v7574_v34, 0.0  ;;  %v2654_v55 = vmax.f32 %v7577_v29, 0.0 }
 0x228   :  { %v7582_v13 = vpop.permute.xlu0 %2310 }
 0x229   :  { %5351 = vmatmul.mubr.msk.f32.gmra.mrb[2].mxu1 %vm9438_vm6, %v6278_v14  ;;  %v2418_v27 = vadd.f32 %v2417_v31, %v7582_v13  ;;  %v2420_v58 = vadd.f32 %v2419_v53, %v7582_v13  ;;  %v2885_v53 = vld [vmem:[%s9338_s5] sm:$0xff]  ;;  %v5640_v14 = vpack.c.bf16 %v2903_v1, %v2901_v62  ;;  %v2930_v62 = vld [vmem:[%s9338_s5 + $0x168] sm:$0xff]  ;;  %v2932_v1 = vld [vmem:[%s9338_s5 + $0x178] sm:$0xff] }
 0x22a   :  { %v5624_v63 = vpack.c.bf16 %v2887_v18, %v2885_v53  ;;  %v2917_v53 = vld [vmem:[%s9338_s5 + $0x100] sm:$0xff]  ;;  %v2919_v18 = vld [vmem:[%s9338_s5 + $0x110] sm:$0xff]  ;;  %vm9450_vm6 = vmmov %vm9447_vm4 }
 0x22b   :  { %v2661_v16 = vmax.f32 %v2418_v27, 0.0  ;;  %v2662_v42 = vmax.f32 %v2420_v58, 0.0  ;;  %v5642_v27 = vpack.c.bf16 %v2908_v10, %v2906_v22  ;;  %v2905_v58 = vld [vmem:[%s9338_s5 + $0xa0] sm:$0xff] }
 0x22c   :  { %5625 = vmatpush1.bf16.msra.mxu0 %v5624_v63  ;;  %v2922_v63 = vld [vmem:[%s9338_s5 + $0x128] sm:$0xff] }
 0x22d   :  { %2677 = vst [vmem:[#allocation3 + $0x40] sm:$0xf] %v2661_v16  ;;  %2678 = vst [vmem:[#allocation3 + $0x48] sm:$0xf] %v2662_v42  ;;  %5627 = vmatprep.subr.bf16.mxu0 %v5626_v5  ;;  %v2907_v16 = vld [vmem:[%s9338_s5 + $0xb0] sm:$0xff]  ;;  %v2910_v42 = vld [vmem:[%s9338_s5 + $0xc8] sm:$0xff]  ;;  %v5656_v5 = vpack.c.bf16 %v2919_v18, %v2917_v53 }
 0x22e   :  { %v2941_v53 = vld [vmem:[%s9338_s5 + $0x1c0] sm:$0xff]  ;;  %v2943_v18 = vld [vmem:[%s9338_s5 + $0x1d0] sm:$0xff] }
 0x230   :  { %5629 = vmatpush1.bf16.msra.mxu0 %v5628_v36  ;;  %v5658_v36 = vpack.c.bf16 %v2924_v38, %v2922_v63  ;;  %v5680_v63 = vpack.c.bf16 %v2943_v18, %v2941_v53  ;;  %v2946_v38 = vld [vmem:[%s9338_s5 + $0x1e8] sm:$0xff] }
 0x231   :  { %5631 = vmatprep.subr.bf16.mxu0 %v5630_v2  ;;  %v2926_v2 = vld [vmem:[%s9338_s5 + $0x148] sm:$0xff] }
 0x232   :  { %v5662_v26 = vpack.c.bf16 %v2928_v46, %v2926_v2 }
 0x234   :  { %v7610_v47 = vld [vmem:[#allocation3 + $0x48] sm:$0xf]  ;;  %v7616_v37 = vld [vmem:[#allocation3 + $0x40] sm:$0xf]  ;;  %5633 = vmatpush1.bf16.msra.mxu0 %v5632_v11 }
 0x235   :  { %5635 = vmatprep.subr.bf16.mxu0 %v5634_v12  ;;  %v5660_v12 = vpack.c.bf16 %v2923_v49, %v2921_v7 }
 0x238   :  { %5637 = vmatpush1.bf16.msra.mxu0 %v5636_v21  ;;  %v2927_v21 = vld [vmem:[%s9338_s5 + $0x150] sm:$0xff] }
 0x239   :  { %5639 = vmatprep.subr.bf16.mxu0 %v5638_v41 }
 0x23c   :  { %5641 = vmatpush1.bf16.msra.mxu0 %v5640_v14  ;;  %v5664_v14 = vpack.c.bf16 %v2927_v21, %v2925_v30 }
 0x23d   :  { %5643 = vmatprep.subr.bf16.mxu0 %v5642_v27  ;;  %v5666_v27 = vpack.c.bf16 %v2932_v1, %v2930_v62 }
 0x241   :  { %v2488_v45 = vpop.f32.mrb[4].mxu0 }
 0x242   :  { %v7591_v0 = vadd.f32 %v2488_v45, %v7566_v24  ;;  %v2490_v56 = vpop.f32.mrb[5].mxu0  ;;  %v2912_v45 = vld [vmem:[%s9338_s5 + $0xd8] sm:$0xff] }
 0x243   :  { %v7594_v54 = vadd.f32 %v2490_v56, %v7566_v24  ;;  %v5644_v56 = vpack.c.bf16 %v2907_v16, %v2905_v58  ;;  %v2929_v58 = vld [vmem:[%s9338_s5 + $0x160] sm:$0xff]  ;;  %v2931_v16 = vld [vmem:[%s9338_s5 + $0x170] sm:$0xff] }
 0x244   :  { %v2655_v60 = vmax.f32 %v7591_v0, 0.0 }
 0x245   :  { %v2656_v3 = vmax.f32 %v7594_v54, 0.0  ;;  %v2494_v52 = vpop.f32.mrb[6].mxu0  ;;  %5645 = vmatpush1.bf16.msra.mxu0 %v5644_v56  ;;  %v5668_v56 = vpack.c.bf16 %v2931_v16, %v2929_v58 }
 0x246   :  { %v2495_v48 = vadd.f32 %v2494_v52, %v7582_v13  ;;  %v2496_v32 = vpop.f32.mrb[7].mxu0  ;;  %v6147_v33 = vpack.i.bf16 %v2655_v60, %v2654_v55  ;;  %v5646_v52 = vpack.c.bf16 %v2912_v45, %v2910_v42  ;;  %v2934_v42 = vld [vmem:[%s9338_s5 + $0x188] sm:$0xff]  ;;  %v2936_v45 = vld [vmem:[%s9338_s5 + $0x198] sm:$0xff] }
 0x247   :  { %v2497_v50 = vadd.f32 %v2496_v32, %v7582_v13  ;;  %v6152_v40 = vpack.i.bf16 %v2653_v43, %v2656_v3  ;;  %v2911_v32 = vld [vmem:[%s9338_s5 + $0xd0] sm:$0xff] }
 0x248   :  { %v2663_v28 = vmax.f32 %v2495_v48, 0.0  ;;  %6148 = vrot.lane.b32.xlu1 %v6147_v33, %s6305_s30  ;;  %v2909_v48 = vld [vmem:[%s9338_s5 + $0xc0] sm:$0xff]  ;;  %v2914_v33 = vld [vmem:[%s9338_s5 + $0xe8] sm:$0xff]  ;;  %5647 = vmatprep.subr.bf16.mxu0 %v5646_v52  ;;  %v5670_v52 = vpack.c.bf16 %v2936_v45, %v2934_v42 }
 0x249   :  { %v2664_v59 = vmax.f32 %v2497_v50, 0.0  ;;  %v2916_v50 = vld [vmem:[%s9338_s5 + $0xf8] sm:$0xff] }
 0x24a   :  { %2679 = vst [vmem:[#allocation3 + $0x50] sm:$0xf] %v2663_v28  ;;  %v5648_v28 = vpack.c.bf16 %v2911_v32, %v2909_v48  ;;  %v2933_v48 = vld [vmem:[%s9338_s5 + $0x180] sm:$0xff]  ;;  %v2935_v32 = vld [vmem:[%s9338_s5 + $0x190] sm:$0xff] }
 0x24b   :  { %2680 = vst [vmem:[#allocation3 + $0x58] sm:$0xf] %v2664_v59  ;;  %v5650_v59 = vpack.c.bf16 %v2916_v50, %v2914_v33  ;;  %v2938_v33 = vld [vmem:[%s9338_s5 + $0x1a8] sm:$0xff]  ;;  %v2940_v50 = vld [vmem:[%s9338_s5 + $0x1b8] sm:$0xff] }
 0x24c   :  { %6153 = vrot.lane.b32.xlu1 %v6152_v40, %s6305_s30  ;;  %v2913_v40 = vld [vmem:[%s9338_s5 + $0xe0] sm:$0xff]  ;;  %5649 = vmatpush1.bf16.msra.mxu0 %v5648_v28  ;;  %v5672_v28 = vpack.c.bf16 %v2935_v32, %v2933_v48  ;;  %v2950_v48 = vld [vmem:[%s9338_s5 + $0x208] sm:$0xff]  ;;  %v2952_v32 = vld [vmem:[%s9338_s5 + $0x218] sm:$0xff] }
 0x24d   :  { %5651 = vmatprep.subr.bf16.mxu0 %v5650_v59  ;;  %v5674_v59 = vpack.c.bf16 %v2940_v50, %v2938_v33  ;;  %v5686_v50 = vpack.c.bf16 %v2952_v32, %v2950_v48 }
 0x251   :  { %v7612_v17 = vld [vmem:[#allocation3 + $0x50] sm:$0xf] }
 0x252   :  { %v6157_v44 = vpack.i.bf16 %v7612_v17, %v7610_v47  ;;  %v7618_v31 = vld [vmem:[#allocation3 + $0x58] sm:$0xf] }
 0x253   :  { %v6162_v51 = vpack.i.bf16 %v7616_v37, %v7618_v31 }
 0x254   :  { %6158 = vrot.lane.b32.xlu0 %v6157_v44, %s6305_s30  ;;  %v2915_v44 = vld [vmem:[%s9338_s5 + $0xf0] sm:$0xff] }
 0x255   :  { %6163 = vrot.lane.b32.xlu1 %v6162_v51, %s6305_s30  ;;  %v2918_v51 = vld [vmem:[%s9338_s5 + $0x108] sm:$0xff]  ;;  %v5652_v57 = vpack.c.bf16 %v2915_v44, %v2913_v40  ;;  %v2937_v40 = vld [vmem:[%s9338_s5 + $0x1a0] sm:$0xff]  ;;  %v2939_v44 = vld [vmem:[%s9338_s5 + $0x1b0] sm:$0xff] }
 0x256   :  { %v5654_v4 = vpack.c.bf16 %v2920_v6, %v2918_v51  ;;  %v5676_v51 = vpack.c.bf16 %v2939_v44, %v2937_v40  ;;  %v2942_v6 = vld [vmem:[%s9338_s5 + $0x1c8] sm:$0xff] }
 0x257   :  { %5653 = vmatpush1.bf16.msra.mxu0 %v5652_v57  ;;  %v2944_v57 = vld [vmem:[%s9338_s5 + $0x1d8] sm:$0xff] }
 0x258   :  { %5655 = vmatprep.subr.bf16.mxu0 %v5654_v4  ;;  %v5678_v4 = vpack.c.bf16 %v2944_v57, %v2942_v6 }
 0x25b   :  { %5657 = vmatpush1.bf16.msra.mxu0 %v5656_v5 }
 0x25c   :  { %5659 = vmatprep.subr.bf16.mxu0 %v5658_v36  ;;  %v2947_v36 = vld [vmem:[%s9338_s5 + $0x1f0] sm:$0xff] }
 0x25f   :  { %5661 = vmatpush1.bf16.msra.mxu0 %v5660_v12 }
 0x260   :  { %5663 = vmatprep.subr.bf16.mxu0 %v5662_v26 }
 0x263   :  { %5665 = vmatpush1.bf16.msra.mxu0 %v5664_v14 }
 0x264   :  { %5667 = vmatprep.subr.bf16.mxu0 %v5666_v27 }
 0x267   :  { %5669 = vmatpush1.bf16.msra.mxu0 %v5668_v56 }
 0x268   :  { %5671 = vmatprep.subr.bf16.mxu0 %v5670_v52 }
 0x26b   :  { %5673 = vmatpush1.bf16.msra.mxu0 %v5672_v28 }
 0x26c   :  { %5675 = vmatprep.subr.bf16.mxu0 %v5674_v59 }
 0x26f   :  { %5677 = vmatpush1.bf16.msra.mxu0 %v5676_v51 }
 0x270   :  { %5679 = vmatprep.subr.bf16.mxu0 %v5678_v4 }
 0x273   :  { %5681 = vmatpush1.bf16.msra.mxu0 %v5680_v63 }
 0x29c   :  { %v2565_v15 = vpop.f32.mrb[8].mxu0 }
 0x29d   :  { %v7739_v25 = vadd.f32 %v2565_v15, %v7566_v24  ;;  %v2567_v35 = vpop.f32.mrb[9].mxu0  ;;  %v2948_v15 = vld [vmem:[%s9338_s5 + $0x1f8] sm:$0xff] }
 0x29e   :  { %v7748_v9 = vadd.f32 %v2567_v35, %v7566_v24  ;;  %v5682_v5 = vpack.c.bf16 %v2948_v15, %v2946_v38  ;;  %v2945_v35 = vld [vmem:[%s9338_s5 + $0x1e0] sm:$0xff]  ;;  %v2951_v38 = vld [vmem:[%s9338_s5 + $0x210] sm:$0xff] }
 0x29f   :  { %v2657_v39 = vmax.f32 %v7739_v25, 0.0  ;;  %v5684_v49 = vpack.c.bf16 %v2947_v36, %v2945_v35  ;;  %v2956_v35 = vld [vmem:[%s9338_s5 + $0x238] sm:$0xff] }
 0x2a0   :  { %v2658_v23 = vmax.f32 %v7748_v9, 0.0  ;;  %v2571_v11 = vpop.f32.mrb[10].mxu0  ;;  %5683 = vmatprep.subr.bf16.mxu0 %v5682_v5  ;;  %v2954_v5 = vld [vmem:[%s9338_s5 + $0x228] sm:$0xff] }
 0x2a1   :  { %v2572_v61 = vadd.f32 %v2571_v11, %v7582_v13  ;;  %v2573_v20 = vpop.f32.mrb[11].mxu0  ;;  %5685 = vmatpush1.bf16.msra.mxu0 %v5684_v49 }
 0x2a2   :  { %v2574_v41 = vadd.f32 %v2573_v20, %v7582_v13  ;;  %v6172_v34 = vpack.i.bf16 %v2658_v23, %v2657_v39  ;;  %5687 = vmatprep.subr.bf16.mxu0 %v5686_v50 }
 0x2a3   :  { %v2665_v22 = vmax.f32 %v2572_v61, 0.0 }
 0x2a4   :  { %v2666_v10 = vmax.f32 %v2574_v41, 0.0 }
 0x2a5   :  { %2681 = vst [vmem:[#allocation3 + $0x60] sm:$0xf] %v2665_v22 }
 0x2a6   :  { %2682 = vst [vmem:[#allocation3 + $0x68] sm:$0xf] %v2666_v10 }
 0x2ac   :  { %v7872_v16 = vld [vmem:[#allocation3 + $0x60] sm:$0xf] }
 0x2ad   :  { %v7874_v42 = vld [vmem:[#allocation3 + $0x68] sm:$0xf] }
 0x2ba   :  { %v6149_v7 = vpop.permute.xlu1 %6148 }
 0x2bb   :  { %v6151_v2 = vunpack.i.h.bf16 %v6149_v7  ;;  %v6150_v46 = vunpack.i.l.bf16 %v6149_v7 }
 0x2bd   :  { %v2750_v12 = vsel %vm165_vm2, %v6150_v46, %v6151_v2 }
 0x2be   :  { %v7826_v11 = vpop.permute.xlu1 %6153  ;;  %v7837_v21 = vmax.f32 %v2654_v55, %v2750_v12 }
 0x2bf   :  { %v6156_v61 = vunpack.i.h.bf16 %v7826_v11  ;;  %v6155_v20 = vunpack.i.l.bf16 %v7826_v11  ;;  %v2957_v11 = vld [vmem:[%s9338_s5 + $0x240] sm:$0xff] }
 0x2c1   :  { %v2749_v26 = vsel %vm165_vm2, %v6156_v61, %v6150_v46  ;;  %v2751_v30 = vsel %vm165_vm2, %v6151_v2, %v6155_v20 }
 0x2c2   :  { %v7841_v41 = vmax.f32 %v2655_v60, %v2751_v30  ;;  %v7845_v62 = vmax.f32 %v2653_v43, %v2749_v26  ;;  %v5690_v30 = vpack.c.bf16 %v2956_v35, %v2954_v5 }
 0x2c4   :  { %2811 = vrot.lane.b32.xlu1 %v7845_v62, %s9406_s16  ;;  %v6167_v1 = vpack.i.bf16 %v7841_v41, %v7837_v21 }
 0x2c6   :  { %v6159_v22 = vpop.permute.xlu0 %6158  ;;  %6168 = vrot.lane.b32.xlu0 %v6167_v1, %s9406_s16  ;;  %v2953_v1 = vld [vmem:[%s9338_s5 + $0x220] sm:$0xff] }
 0x2c7   :  { %v6161_v29 = vunpack.i.h.bf16 %v6159_v22  ;;  %v6160_v55 = vunpack.i.l.bf16 %v6159_v22  ;;  %v7852_v10 = vpop.permute.xlu1 %6163  ;;  %v2955_v22 = vld [vmem:[%s9338_s5 + $0x230] sm:$0xff] }
 0x2c8   :  { %v6165_v0 = vunpack.i.l.bf16 %v7852_v10  ;;  %v6166_v53 = vunpack.i.h.bf16 %v7852_v10  ;;  %v2965_v10 = vld [vmem:[%s9338_s5 + $0x280] sm:$0xff] }
 0x2c9   :  { %v2757_v43 = vsel %vm165_vm2, %v6160_v55, %v6161_v29 }
 0x2ca   :  { %v7861_v60 = vmax.f32 %v7610_v47, %v2757_v43  ;;  %v2758_v14 = vsel %vm165_vm2, %v6161_v29, %v6165_v0  ;;  %6173 = vrot.lane.b32.xlu0 %v6172_v34, %s6305_s30  ;;  %v6182_v47 = vpack.i.bf16 %v7874_v42, %v7872_v16  ;;  %v2756_v61 = vsel %vm165_vm2, %v6166_v53, %v6160_v55 }
 0x2cb   :  { %v7868_v27 = vmax.f32 %v7612_v17, %v2758_v14  ;;  %v7945_v34 = vmax.f32 %v7616_v37, %v2756_v61  ;;  %v5692_v14 = vpack.c.bf16 %v2955_v22, %v2953_v1  ;;  %v2969_v61 = vld [vmem:[%s9338_s5 + $0x2a0] sm:$0xff]  ;;  %v2976_v1 = vld [vmem:[%s9338_s5 + $0x2d8] sm:$0xff] }
 0x2cd   :  { %v6177_v58 = vpack.i.bf16 %v7868_v27, %v7861_v60 }
 0x2cf   :  { %6178 = vrot.lane.b32.xlu1 %v6177_v58, %s9406_s16 }
 0x2d3   :  { %6183 = vrot.lane.b32.xlu1 %v6182_v47, %s6305_s30 }
 0x2f8   :  { %v2642_v45 = vpop.f32.mrb[0].mxu1 }
 0x2f9   :  { %v7881_v56 = vadd.f32 %v2642_v45, %v7566_v24  ;;  %v2644_v17 = vpop.f32.mrb[1].mxu1  ;;  %v2962_v45 = vld [vmem:[%s9338_s5 + $0x268] sm:$0xff] }
 0x2fa   :  { %v7884_v52 = vadd.f32 %v2644_v17, %v7566_v24  ;;  %v2964_v17 = vld [vmem:[%s9338_s5 + $0x278] sm:$0xff] }
 0x2fb   :  { %v2659_v33 = vmax.f32 %v7881_v56, 0.0 }
 0x2fc   :  { %v2660_v28 = vmax.f32 %v7884_v52, 0.0  ;;  %v2648_v59 = vpop.f32.mrb[2].mxu1  ;;  %v3013_v52 = vld [vmem:[%s9338_s5 + $0x400] sm:$0xff] }
 0x2fd   :  { %v2649_v40 = vadd.f32 %v2648_v59, %v7582_v13  ;;  %v2650_v44 = vpop.f32.mrb[3].mxu1 }
 0x2fe   :  { %v2651_v24 = vadd.f32 %v2650_v44, %v7582_v13  ;;  %v6192_v51 = vpack.i.bf16 %v2660_v28, %v2659_v33  ;;  %v2949_v13 = vld [vmem:[%s9338_s5 + $0x200] sm:$0xff]  ;;  %v5698_v44 = vpack.c.bf16 %v2964_v17, %v2962_v45  ;;  %v2979_v45 = vld [vmem:[%s9338_s5 + $0x2f0] sm:$0xff]  ;;  %v2982_v17 = vld [vmem:[%s9338_s5 + $0x308] sm:$0xff] }
 0x2ff   :  { %v2667_v6 = vmax.f32 %v2649_v40, 0.0  ;;  %v5688_v12 = vpack.c.bf16 %v2951_v38, %v2949_v13 }
 0x300   :  { %v2668_v57 = vmax.f32 %v2651_v24, 0.0  ;;  %6193 = vrot.lane.b32.xlu1 %v6192_v51, %s6305_s30  ;;  %v2961_v24 = vld [vmem:[%s9338_s5 + $0x260] sm:$0xff]  ;;  %v2963_v51 = vld [vmem:[%s9338_s5 + $0x270] sm:$0xff] }
 0x301   :  { %2683 = vst [vmem:[#allocation3 + $0x70] sm:$0xf] %v2667_v6 }
 0x302   :  { %2684 = vst [vmem:[#allocation3 + $0x78] sm:$0xf] %v2668_v57 }
 0x308   :  { %v7999_v13 = vld [vmem:[#allocation3 + $0x70] sm:$0xf] }
 0x309   :  { %v8001_v38 = vld [vmem:[#allocation3 + $0x78] sm:$0xf] }
 0x336   :  { %v2812_v15 = vpop.permute.xlu1 %2811 }
 0x338   :  { %v7901_v4 = vpop.permute.xlu0 %6168 }
 0x339   :  { %v6171_v18 = vunpack.i.h.bf16 %v7901_v4  ;;  %v6170_v63 = vunpack.i.l.bf16 %v7901_v4 }
 0x33b   :  { %v2843_v36 = vsel %vm9439_vm13, %v2812_v15, %v6170_v63  ;;  %v2844_v7 = vsel %vm9440_vm14, %v6170_v63, %v6171_v18  ;;  %v2968_v63 = vld [vmem:[%s9338_s5 + $0x298] sm:$0xff]  ;;  %vm9451_vm13 = vmmov %vm9447_vm4 }
 0x33c   :  { %v2871_v49 = vmax.f32 %v7845_v62, %v2843_v36  ;;  %v7923_v2 = vpop.permute.xlu0 %6173  ;;  %v2872_v46 = vmax.f32 %v7837_v21, %v2844_v7  ;;  %v2958_v62 = vld [vmem:[%s9338_s5 + $0x248] sm:$0xff]  ;;  %v2960_v21 = vld [vmem:[%s9338_s5 + $0x258] sm:$0xff]  ;;  %v6197_v7 = vpack.i.bf16 %v8001_v38, %v7999_v13  ;;  %vm9452_vm14 = vmmov %vm9447_vm4 }
 0x33d   :  { %v6175_v26 = vunpack.i.l.bf16 %v7923_v2  ;;  %v6176_v29 = vunpack.i.h.bf16 %v7923_v2  ;;  %v5694_v47 = vpack.c.bf16 %v2960_v21, %v2958_v62  ;;  %v2973_v21 = vld [vmem:[%s9338_s5 + $0x2c0] sm:$0xff] }
 0x33e   :  { %3173 = vmatprep.mubr.f32.mxu0 %v2872_v46 }
 0x33f   :  { %v2752_v55 = vsel %vm165_vm2, %v6155_v20, %v6175_v26  ;;  %3174 = vmatmul.mubr.f32.vlgmr.msra.gmra.mrb[12].mxu0 %v2871_v49  ;;  %v2959_v20 = vld [vmem:[%s9338_s5 + $0x250] sm:$0xff]  ;;  %v2753_v48 = vsel %vm165_vm2, %v6175_v26, %v6176_v29 }
 0x340   :  { %v7949_v43 = vmax.f32 %v2656_v3, %v2752_v55  ;;  %5689 = vmatpush1.bf16.msra.mxu0 %v5688_v12  ;;  %v5696_v50 = vpack.c.bf16 %v2959_v20, %v2957_v11  ;;  %v7991_v53 = vmax.f32 %v2657_v39, %v2753_v48  ;;  %v5700_v39 = vpack.c.bf16 %v2963_v51, %v2961_v24  ;;  %v2971_v26 = vld [vmem:[%s9338_s5 + $0x2b0] sm:$0xff]  ;;  %v2984_v48 = vld [vmem:[%s9338_s5 + $0x318] sm:$0xff]  ;;  %v2986_v24 = vld [vmem:[%s9338_s5 + $0x328] sm:$0xff] }
 0x341   :  { %v7951_v58 = vpop.permute.xlu1 %6178  ;;  %5691 = vmatprep.subr.bf16.mxu0 %v5690_v30  ;;  %v2974_v30 = vld [vmem:[%s9338_s5 + $0x2c8] sm:$0xff]  ;;  %v5708_v22 = vpack.c.bf16 %v2971_v26, %v2969_v61  ;;  %v2975_v55 = vld [vmem:[%s9338_s5 + $0x2d0] sm:$0xff]  ;;  %v2988_v51 = vld [vmem:[%s9338_s5 + $0x338] sm:$0xff] }
 0x342   :  { %v6181_v37 = vunpack.i.h.bf16 %v7951_v58  ;;  %v6180_v54 = vunpack.i.l.bf16 %v7951_v58  ;;  %v6187_v3 = vpack.i.bf16 %v7949_v43, %v7945_v34  ;;  %v5710_v62 = vpack.c.bf16 %v2976_v1, %v2974_v30  ;;  %v2995_v61 = vld [vmem:[%s9338_s5 + $0x370] sm:$0xff]  ;;  %v2998_v26 = vld [vmem:[%s9338_s5 + $0x388] sm:$0xff]  ;;  %v3000_v30 = vld [vmem:[%s9338_s5 + $0x398] sm:$0xff] }
 0x343   :  { %v5712_v11 = vpack.c.bf16 %v2975_v55, %v2973_v21  ;;  %v2999_v21 = vld [vmem:[%s9338_s5 + $0x390] sm:$0xff]  ;;  %v3002_v55 = vld [vmem:[%s9338_s5 + $0x3a8] sm:$0xff]  ;;  %v3028_v58 = vld [vmem:[%s9338_s5 + $0x478] sm:$0xff] }
 0x344   :  { %v2851_v32 = vsel %vm9441_vm15, %v6180_v54, %v6181_v37  ;;  %6188 = vrot.lane.b32.xlu0 %v6187_v3, %s9406_s16  ;;  %5693 = vmatpush1.bf16.msra.mxu0 %v5692_v14  ;;  %v2978_v14 = vld [vmem:[%s9338_s5 + $0x2e8] sm:$0xff]  ;;  %v2977_v3 = vld [vmem:[%s9338_s5 + $0x2e0] sm:$0xff]  ;;  %vm3426_vm15 = vcmask 556032  }
 0x345   :  { %v7978_v59 = vpop.permute.xlu1 %6183  ;;  %v2879_v40 = vmax.f32 %v7861_v60, %v2851_v32  ;;  %5695 = vmatprep.subr.bf16.mxu0 %v5694_v47  ;;  %v2966_v60 = vld [vmem:[%s9338_s5 + $0x288] sm:$0xff]  ;;  %v2980_v47 = vld [vmem:[%s9338_s5 + $0x2f8] sm:$0xff]  ;;  %v5716_v32 = vpack.c.bf16 %v2979_v45, %v2977_v3  ;;  %v3003_v3 = vld [vmem:[%s9338_s5 + $0x3b0] sm:$0xff] }
 0x346   :  { %v6186_v6 = vunpack.i.h.bf16 %v7978_v59  ;;  %v6185_v57 = vunpack.i.l.bf16 %v7978_v59  ;;  %v5702_v36 = vpack.c.bf16 %v2968_v63, %v2966_v60  ;;  %v5714_v20 = vpack.c.bf16 %v2980_v47, %v2978_v14  ;;  %v2985_v63 = vld [vmem:[%s9338_s5 + $0x320] sm:$0xff]  ;;  %v3004_v14 = vld [vmem:[%s9338_s5 + $0x3b8] sm:$0xff]  ;;  %v3006_v45 = vld [vmem:[%s9338_s5 + $0x3c8] sm:$0xff] }
 0x347   :  { %3179 = vmatprep.mubr.f32.mxu0 %v2879_v40  ;;  %v2981_v40 = vld [vmem:[%s9338_s5 + $0x300] sm:$0xff]  ;;  %v5722_v60 = vpack.c.bf16 %v2988_v51, %v2986_v24  ;;  %v3010_v24 = vld [vmem:[%s9338_s5 + $0x3e8] sm:$0xff]  ;;  %v3012_v51 = vld [vmem:[%s9338_s5 + $0x3f8] sm:$0xff] }
 0x348   :  { %v2759_v15 = vsel %vm165_vm2, %v6165_v0, %v6185_v57  ;;  %v2760_v25 = vsel %vm165_vm2, %v6185_v57, %v6186_v6  ;;  %2819 = vrot.lane.b32.xlu0 %v7991_v53, %s9406_s16  ;;  %5697 = vmatpush1.bf16.msra.mxu0 %v5696_v50  ;;  %v2967_v0 = vld [vmem:[%s9338_s5 + $0x290] sm:$0xff]  ;;  %v5718_v50 = vpack.c.bf16 %v2984_v48, %v2982_v17  ;;  %v3008_v17 = vld [vmem:[%s9338_s5 + $0x3d8] sm:$0xff] }
 0x349   :  { %v8012_v5 = vmax.f32 %v7618_v31, %v2759_v15  ;;  %v8015_v35 = vmax.f32 %v7872_v16, %v2760_v25  ;;  %5699 = vmatprep.subr.bf16.mxu0 %v5698_v44  ;;  %v2970_v31 = vld [vmem:[%s9338_s5 + $0x2a8] sm:$0xff]  ;;  %v2972_v16 = vld [vmem:[%s9338_s5 + $0x2b8] sm:$0xff]  ;;  %v5704_v46 = vpack.c.bf16 %v2967_v0, %v2965_v10  ;;  %v2983_v44 = vld [vmem:[%s9338_s5 + $0x310] sm:$0xff] }
 0x34a   :  { %v5706_v12 = vpack.c.bf16 %v2972_v16, %v2970_v31  ;;  %v5720_v57 = vpack.c.bf16 %v2983_v44, %v2981_v40  ;;  %v2987_v15 = vld [vmem:[%s9338_s5 + $0x330] sm:$0xff]  ;;  %v2990_v25 = vld [vmem:[%s9338_s5 + $0x348] sm:$0xff]  ;;  %v2989_v0 = vld [vmem:[%s9338_s5 + $0x340] sm:$0xff] }
 0x34b   :  { %v6202_v49 = vpack.i.bf16 %v8015_v35, %v8012_v5  ;;  %v2994_v31 = vld [vmem:[%s9338_s5 + $0x368] sm:$0xff]  ;;  %v2996_v16 = vld [vmem:[%s9338_s5 + $0x378] sm:$0xff]  ;;  %v3007_v40 = vld [vmem:[%s9338_s5 + $0x3d0] sm:$0xff] }
 0x34c   :  { %6198 = vrot.lane.b32.xlu0 %v6197_v7, %s6305_s30  ;;  %5701 = vmatpush1.bf16.msra.mxu0 %v5700_v39  ;;  %v2992_v39 = vld [vmem:[%s9338_s5 + $0x358] sm:$0xff]  ;;  %v2991_v7 = vld [vmem:[%s9338_s5 + $0x350] sm:$0xff] }
 0x34d   :  { %6203 = vrot.lane.b32.xlu1 %v6202_v49, %s9406_s16  ;;  %5703 = vmatprep.subr.bf16.mxu0 %v5702_v36  ;;  %v5724_v36 = vpack.c.bf16 %v2987_v15, %v2985_v63  ;;  %v5726_v10 = vpack.c.bf16 %v2992_v39, %v2990_v25  ;;  %v5728_v49 = vpack.c.bf16 %v2991_v7, %v2989_v0  ;;  %v3016_v7 = vld [vmem:[%s9338_s5 + $0x418] sm:$0xff] }
 0x34e   :  { %v5746_v39 = vpack.c.bf16 %v3012_v51, %v3010_v24  ;;  %v3026_v51 = vld [vmem:[%s9338_s5 + $0x468] sm:$0xff] }
 0x350   :  { %5705 = vmatpush1.bf16.msra.mxu0 %v5704_v46  ;;  %v5730_v46 = vpack.c.bf16 %v2996_v16, %v2994_v31 }
 0x351   :  { %5707 = vmatprep.subr.bf16.mxu0 %v5706_v12  ;;  %v2993_v12 = vld [vmem:[%s9338_s5 + $0x360] sm:$0xff] }
 0x352   :  { %v5732_v1 = vpack.c.bf16 %v2995_v61, %v2993_v12 }
 0x354   :  { %5709 = vmatpush1.bf16.msra.mxu0 %v5708_v22  ;;  %v5734_v22 = vpack.c.bf16 %v3000_v30, %v2998_v26 }
 0x355   :  { %5711 = vmatprep.subr.bf16.mxu0 %v5710_v62  ;;  %v2997_v62 = vld [vmem:[%s9338_s5 + $0x380] sm:$0xff] }
 0x356   :  { %v5736_v47 = vpack.c.bf16 %v2999_v21, %v2997_v62  ;;  %v3017_v21 = vld [vmem:[%s9338_s5 + $0x420] sm:$0xff] }
 0x358   :  { %5713 = vmatpush1.bf16.msra.mxu0 %v5712_v11  ;;  %v5738_v11 = vpack.c.bf16 %v3004_v14, %v3002_v55  ;;  %v3019_v55 = vld [vmem:[%s9338_s5 + $0x430] sm:$0xff] }
 0x359   :  { %5715 = vmatprep.subr.bf16.mxu0 %v5714_v20  ;;  %v3001_v20 = vld [vmem:[%s9338_s5 + $0x3a0] sm:$0xff] }
 0x35a   :  { %v5740_v48 = vpack.c.bf16 %v3003_v3, %v3001_v20  ;;  %v3024_v3 = vld [vmem:[%s9338_s5 + $0x458] sm:$0xff] }
 0x35c   :  { %5717 = vmatpush1.bf16.msra.mxu0 %v5716_v32  ;;  %v5742_v32 = vpack.c.bf16 %v3008_v17, %v3006_v45 }
 0x35d   :  { %5719 = vmatprep.subr.bf16.mxu0 %v5718_v50  ;;  %v3005_v50 = vld [vmem:[%s9338_s5 + $0x3c0] sm:$0xff] }
 0x35e   :  { %v5744_v63 = vpack.c.bf16 %v3007_v40, %v3005_v50 }
 0x360   :  { %5721 = vmatpush1.bf16.msra.mxu0 %v5720_v57 }
 0x361   :  { %5723 = vmatprep.subr.bf16.mxu0 %v5722_v60 }
 0x364   :  { %5725 = vmatpush1.bf16.msra.mxu0 %v5724_v36  ;;  %v3009_v36 = vld [vmem:[%s9338_s5 + $0x3e0] sm:$0xff] }
 0x365   :  { %5727 = vmatprep.subr.bf16.mxu0 %v5726_v10  ;;  %v3011_v10 = vld [vmem:[%s9338_s5 + $0x3f0] sm:$0xff] }
 0x366   :  { %v5748_v16 = vpack.c.bf16 %v3011_v10, %v3009_v36  ;;  %v3029_v10 = vld [vmem:[%s9338_s5 + $0x480] sm:$0xff] }
 0x368   :  { %5729 = vmatpush1.bf16.msra.mxu0 %v5728_v49 }
 0x369   :  { %5731 = vmatprep.subr.bf16.mxu0 %v5730_v46 }
 0x36c   :  { %5733 = vmatpush1.bf16.msra.mxu0 %v5732_v1 }
 0x36d   :  { %5735 = vmatprep.subr.bf16.mxu0 %v5734_v22 }
 0x370   :  { %5737 = vmatpush1.bf16.msra.mxu0 %v5736_v47 }
 0x371   :  { %5739 = vmatprep.subr.bf16.mxu0 %v5738_v11 }
 0x372   :  { %v6194_v44 = vpop.permute.xlu1 %6193 }
 0x373   :  { %v6196_v57 = vunpack.i.h.bf16 %v6194_v44  ;;  %v6195_v60 = vunpack.i.l.bf16 %v6194_v44 }
 0x374   :  { %5741 = vmatpush1.bf16.msra.mxu0 %v5740_v48  ;;  %v5756_v48 = vpack.c.bf16 %v3019_v55, %v3017_v21  ;;  %v3045_v21 = vld [vmem:[%s9338_s5 + $0x500] sm:$0xff]  ;;  %v3047_v55 = vld [vmem:[%s9338_s5 + $0x510] sm:$0xff] }
 0x375   :  { %v2754_v15 = vsel %vm165_vm2, %v6176_v29, %v6195_v60  ;;  %v2755_v25 = vsel %vm165_vm2, %v6195_v60, %v6196_v57  ;;  %5743 = vmatprep.subr.bf16.mxu0 %v5742_v32  ;;  %v3014_v29 = vld [vmem:[%s9338_s5 + $0x408] sm:$0xff]  ;;  %v3027_v60 = vld [vmem:[%s9338_s5 + $0x470] sm:$0xff] }
 0x376   :  { %v8167_v0 = vmax.f32 %v2658_v23, %v2754_v15  ;;  %v8171_v2 = vmax.f32 %v2659_v33, %v2755_v25  ;;  %v5750_v9 = vpack.c.bf16 %v3016_v7, %v3014_v29  ;;  %v2793_v23 = vmax.f32 %v2660_v28, %v6196_v57  ;;  %v3015_v28 = vld [vmem:[%s9338_s5 + $0x410] sm:$0xff]  ;;  %v3032_v15 = vld [vmem:[%s9338_s5 + $0x498] sm:$0xff]  ;;  %v3034_v7 = vld [vmem:[%s9338_s5 + $0x4a8] sm:$0xff] }
 0x377   :  { %v5752_v22 = vpack.c.bf16 %v3015_v28, %v3013_v52  ;;  %v3031_v29 = vld [vmem:[%s9338_s5 + $0x490] sm:$0xff]  ;;  %v3042_v28 = vld [vmem:[%s9338_s5 + $0x4e8] sm:$0xff] }
 0x378   :  { %v6207_v31 = vpack.i.bf16 %v8171_v2, %v8167_v0  ;;  %5745 = vmatpush1.bf16.msra.mxu0 %v5744_v63  ;;  %v3030_v63 = vld [vmem:[%s9338_s5 + $0x488] sm:$0xff]  ;;  %v3039_v52 = vld [vmem:[%s9338_s5 + $0x4d0] sm:$0xff] }
 0x379   :  { %5747 = vmatprep.subr.bf16.mxu0 %v5746_v39  ;;  %v5766_v36 = vpack.c.bf16 %v3032_v15, %v3030_v63  ;;  %v3061_v63 = vld [vmem:[%s9338_s5 + $0x580] sm:$0xff]  ;;  %v3063_v15 = vld [vmem:[%s9338_s5 + $0x590] sm:$0xff] }
 0x37a   :  { %6208 = vrot.lane.b32.xlu0 %v6207_v31, %s9406_s16  ;;  %v5768_v31 = vpack.c.bf16 %v3031_v29, %v3029_v10 }
 0x37c   :  { %5749 = vmatpush1.bf16.msra.mxu0 %v5748_v16 }
 0x37d   :  { %5751 = vmatprep.subr.bf16.mxu0 %v5750_v9  ;;  %v3033_v9 = vld [vmem:[%s9338_s5 + $0x4a0] sm:$0xff] }
 0x37e   :  { %2825 = vrot.lane.b32.xlu0 %v2793_v23, %s9406_s16  ;;  %v3035_v23 = vld [vmem:[%s9338_s5 + $0x4b0] sm:$0xff] }
 0x3b6   :  { %v6189_v56 = vpop.permute.xlu0 %6188 }
 0x3b7   :  { %v6191_v33 = vunpack.i.h.bf16 %v6189_v56  ;;  %v6190_v49 = vunpack.i.l.bf16 %v6189_v56  ;;  %v3038_v56 = vld [vmem:[%s9338_s5 + $0x4c8] sm:$0xff] }
 0x3b9   :  { %v2850_v46 = vsel %vm9442_vm8, %v6190_v49, %v6180_v54  ;;  %v2845_v26 = vsel %vm9443_vm11, %v6171_v18, %v6191_v33  ;;  %v3018_v54 = vld [vmem:[%s9338_s5 + $0x428] sm:$0xff]  ;;  %v5772_v49 = vpack.c.bf16 %v3035_v23, %v3033_v9  ;;  %vm3429_vm8 = vcmask 551936  }
 0x3ba   :  { %v8188_v12 = vpop.permute.xlu0 %2819  ;;  %v2878_v61 = vmax.f32 %v7945_v34, %v2850_v46  ;;  %v3020_v34 = vld [vmem:[%s9338_s5 + $0x438] sm:$0xff]  ;;  %v2873_v62 = vmax.f32 %v7841_v41, %v2845_v26  ;;  %v3022_v41 = vld [vmem:[%s9338_s5 + $0x448] sm:$0xff]  ;;  %vm3439_vm11 = vcmask 1043456  }
 0x3bb   :  { %v2846_v30 = vsel %vm9444_vm9, %v6191_v33, %v8188_v12  ;;  %v5754_v18 = vpack.c.bf16 %v3020_v34, %v3018_v54  ;;  %v5758_v24 = vpack.c.bf16 %v3024_v3, %v3022_v41  ;;  %v3040_v33 = vld [vmem:[%s9338_s5 + $0x4d8] sm:$0xff]  ;;  %v3041_v34 = vld [vmem:[%s9338_s5 + $0x4e0] sm:$0xff]  ;;  %v3070_v23 = vld [vmem:[%s9338_s5 + $0x5c8] sm:$0xff]  ;;  %vm3598_vm9 = vcmask 924672  }
 0x3bc   :  { %3180 = vmatmul.mubr.f32.gmra.mrb[14].mxu0 %v2878_v61  ;;  %v2874_v1 = vmax.f32 %v7949_v43, %v2846_v30  ;;  %v5774_v46 = vpack.c.bf16 %v3040_v33, %v3038_v56  ;;  %v3037_v61 = vld [vmem:[%s9338_s5 + $0x4c0] sm:$0xff]  ;;  %v3044_v26 = vld [vmem:[%s9338_s5 + $0x4f8] sm:$0xff] }
 0x3bd   :  { %v5776_v30 = vpack.c.bf16 %v3039_v52, %v3037_v61  ;;  %v5778_v54 = vpack.c.bf16 %v3044_v26, %v3042_v28  ;;  %v3049_v3 = vld [vmem:[%s9338_s5 + $0x520] sm:$0xff]  ;;  %v3072_v56 = vld [vmem:[%s9338_s5 + $0x5d8] sm:$0xff]  ;;  %v3071_v52 = vld [vmem:[%s9338_s5 + $0x5d0] sm:$0xff] }
 0x3be   :  { %v6199_v4 = vpop.permute.xlu0 %6198  ;;  %3250 = vmatprep.mubr.f32.mxu0 %v2874_v1  ;;  %v3043_v1 = vld [vmem:[%s9338_s5 + $0x4f0] sm:$0xff]  ;;  %v3069_v61 = vld [vmem:[%s9338_s5 + $0x5c0] sm:$0xff]  ;;  %v3074_v28 = vld [vmem:[%s9338_s5 + $0x5e8] sm:$0xff] }
 0x3bf   :  { %v8216_v14 = vpop.permute.xlu1 %6203  ;;  %v6201_v47 = vunpack.i.h.bf16 %v6199_v4  ;;  %v6200_v11 = vunpack.i.l.bf16 %v6199_v4  ;;  %v5780_v4 = vpack.c.bf16 %v3043_v1, %v3041_v34  ;;  %v5808_v26 = vpack.c.bf16 %v3071_v52, %v3069_v61  ;;  %v3075_v34 = vld [vmem:[%s9338_s5 + $0x5f0] sm:$0xff]  ;;  %v3078_v1 = vld [vmem:[%s9338_s5 + $0x608] sm:$0xff] }
 0x3c0   :  { %v6206_v43 = vunpack.i.h.bf16 %v8216_v14  ;;  %v6205_v20 = vunpack.i.l.bf16 %v8216_v14  ;;  %3251 = vmatmul.mubr.f32.vlgmr.msra.gmra.mrb[12].mxu0 %v2873_v62  ;;  %v3048_v62 = vld [vmem:[%s9338_s5 + $0x518] sm:$0xff] }
 0x3c1   :  { %v2761_v45 = vsel %vm165_vm2, %v6186_v6, %v6200_v11  ;;  %v2762_v17 = vsel %vm165_vm2, %v6200_v11, %v6201_v47  ;;  %5753 = vmatpush1.bf16.msra.mxu0 %v5752_v22  ;;  %v3021_v6 = vld [vmem:[%s9338_s5 + $0x440] sm:$0xff]  ;;  %v2794_v25 = vmax.f32 %v8001_v38, %v6201_v47  ;;  %v3036_v38 = vld [vmem:[%s9338_s5 + $0x4b8] sm:$0xff]  ;;  %v3046_v22 = vld [vmem:[%s9338_s5 + $0x508] sm:$0xff] }
 0x3c2   :  { %v8231_v32 = vmax.f32 %v7874_v42, %v2761_v45  ;;  %v8234_v50 = vmax.f32 %v7999_v13, %v2762_v17  ;;  %v2853_v40 = vsel %vm9445_vm5, %v6205_v20, %v6206_v43  ;;  %5755 = vmatprep.subr.bf16.mxu0 %v5754_v18  ;;  %v2852_v59 = vsel %vm9446_vm10, %v6181_v37, %v6205_v20  ;;  %v3023_v42 = vld [vmem:[%s9338_s5 + $0x450] sm:$0xff]  ;;  %v3050_v47 = vld [vmem:[%s9338_s5 + $0x528] sm:$0xff]  ;;  %v3052_v11 = vld [vmem:[%s9338_s5 + $0x538] sm:$0xff] }
 0x3c3   :  { %v2881_v13 = vmax.f32 %v8012_v5, %v2853_v40  ;;  %v2880_v44 = vmax.f32 %v7868_v27, %v2852_v59  ;;  %v5760_v57 = vpack.c.bf16 %v3023_v42, %v3021_v6  ;;  %v5762_v5 = vpack.c.bf16 %v3028_v58, %v3026_v51  ;;  %v3025_v27 = vld [vmem:[%s9338_s5 + $0x460] sm:$0xff]  ;;  %v3051_v45 = vld [vmem:[%s9338_s5 + $0x530] sm:$0xff]  ;;  %v3054_v17 = vld [vmem:[%s9338_s5 + $0x548] sm:$0xff] }
 0x3c4   :  { %v6212_v37 = vpack.i.bf16 %v8234_v50, %v8231_v32  ;;  %v5764_v39 = vpack.c.bf16 %v3027_v60, %v3025_v27  ;;  %v5770_v16 = vpack.c.bf16 %v3036_v38, %v3034_v7  ;;  %v5782_v18 = vpack.c.bf16 %v3048_v62, %v3046_v22  ;;  %v3053_v6 = vld [vmem:[%s9338_s5 + $0x540] sm:$0xff]  ;;  %v3055_v42 = vld [vmem:[%s9338_s5 + $0x550] sm:$0xff]  ;;  %v3080_v22 = vld [vmem:[%s9338_s5 + $0x618] sm:$0xff] }
 0x3c5   :  { %3256 = vmatprep.mubr.f32.mxu0 %v2881_v13  ;;  %5757 = vmatpush1.bf16.msra.mxu0 %v5756_v48  ;;  %v5784_v20 = vpack.c.bf16 %v3047_v55, %v3045_v21  ;;  %v5786_v41 = vpack.c.bf16 %v3052_v11, %v3050_v47  ;;  %v3056_v48 = vld [vmem:[%s9338_s5 + $0x558] sm:$0xff]  ;;  %v5788_v40 = vpack.c.bf16 %v3051_v45, %v3049_v3  ;;  %v3058_v13 = vld [vmem:[%s9338_s5 + $0x568] sm:$0xff]  ;;  %v3057_v58 = vld [vmem:[%s9338_s5 + $0x560] sm:$0xff]  ;;  %vm3658_vm5 = vcmask 908288  }
 0x3c6   :  { %3257 = vmatmul.mubr.f32.gmra.mrb[14].mxu0 %v2880_v44  ;;  %6213 = vrot.lane.b32.xlu1 %v6212_v37, %s9406_s16  ;;  %v5790_v59 = vpack.c.bf16 %v3056_v48, %v3054_v17  ;;  %v3060_v44 = vld [vmem:[%s9338_s5 + $0x578] sm:$0xff]  ;;  %v3059_v37 = vld [vmem:[%s9338_s5 + $0x570] sm:$0xff]  ;;  %v5800_v7 = vpack.c.bf16 %v3063_v15, %v3061_v63  ;;  %v3082_v47 = vld [vmem:[%s9338_s5 + $0x628] sm:$0xff]  ;;  %vm3718_vm10 = vcmask 818176  }
 0x3c7   :  { %5759 = vmatprep.subr.bf16.mxu0 %v5758_v24  ;;  %v5792_v24 = vpack.c.bf16 %v3055_v42, %v3053_v6  ;;  %v5794_v51 = vpack.c.bf16 %v3060_v44, %v3058_v13  ;;  %v5796_v27 = vpack.c.bf16 %v3059_v37, %v3057_v58  ;;  %v3079_v21 = vld [vmem:[%s9338_s5 + $0x610] sm:$0xff]  ;;  %v3084_v11 = vld [vmem:[%s9338_s5 + $0x638] sm:$0xff]  ;;  %v3081_v45 = vld [vmem:[%s9338_s5 + $0x620] sm:$0xff] }
 0x3c8   :  { %v5818_v3 = vpack.c.bf16 %v3084_v11, %v3082_v47  ;;  %v3086_v17 = vld [vmem:[%s9338_s5 + $0x648] sm:$0xff]  ;;  %v3088_v48 = vld [vmem:[%s9338_s5 + $0x658] sm:$0xff]  ;;  %v3087_v6 = vld [vmem:[%s9338_s5 + $0x650] sm:$0xff] }
 0x3c9   :  { %5761 = vmatpush1.bf16.msra.mxu0 %v5760_v57  ;;  %v3062_v57 = vld [vmem:[%s9338_s5 + $0x588] sm:$0xff]  ;;  %v3092_v13 = vld [vmem:[%s9338_s5 + $0x678] sm:$0xff]  ;;  %v3091_v58 = vld [vmem:[%s9338_s5 + $0x670] sm:$0xff] }
 0x3ca   :  { %2841 = vrot.lane.b32.xlu1 %v2794_v25, %s9406_s16  ;;  %5763 = vmatprep.subr.bf16.mxu0 %v5762_v5  ;;  %v3064_v5 = vld [vmem:[%s9338_s5 + $0x598] sm:$0xff]  ;;  %v3066_v25 = vld [vmem:[%s9338_s5 + $0x5a8] sm:$0xff]  ;;  %v3095_v63 = vld [vmem:[%s9338_s5 + $0x690] sm:$0xff] }
 0x3cb   :  { %v5798_v60 = vpack.c.bf16 %v3064_v5, %v3062_v57  ;;  %v3090_v42 = vld [vmem:[%s9338_s5 + $0x668] sm:$0xff]  ;;  %v3096_v57 = vld [vmem:[%s9338_s5 + $0x698] sm:$0xff] }
 0x3cc   :  { %v3094_v37 = vld [vmem:[%s9338_s5 + $0x688] sm:$0xff] }
 0x3cd   :  { %5765 = vmatpush1.bf16.msra.mxu0 %v5764_v39  ;;  %v3068_v39 = vld [vmem:[%s9338_s5 + $0x5b8] sm:$0xff]  ;;  %v3098_v15 = vld [vmem:[%s9338_s5 + $0x6a8] sm:$0xff] }
 0x3ce   :  { %5767 = vmatprep.subr.bf16.mxu0 %v5766_v36  ;;  %v5802_v38 = vpack.c.bf16 %v3068_v39, %v3066_v25  ;;  %v3100_v25 = vld [vmem:[%s9338_s5 + $0x6b8] sm:$0xff] }
 0x3d1   :  { %5769 = vmatpush1.bf16.msra.mxu0 %v5768_v31  ;;  %v3065_v31 = vld [vmem:[%s9338_s5 + $0x5a0] sm:$0xff] }
 0x3d2   :  { %5771 = vmatprep.subr.bf16.mxu0 %v5770_v16  ;;  %v3067_v16 = vld [vmem:[%s9338_s5 + $0x5b0] sm:$0xff] }
 0x3d5   :  { %5773 = vmatpush1.bf16.msra.mxu0 %v5772_v49  ;;  %v5804_v49 = vpack.c.bf16 %v3067_v16, %v3065_v31  ;;  %v3102_v31 = vld [vmem:[%s9338_s5 + $0x6c8] sm:$0xff]  ;;  %v3104_v16 = vld [vmem:[%s9338_s5 + $0x6d8] sm:$0xff] }
 0x3d6   :  { %5775 = vmatprep.subr.bf16.mxu0 %v5774_v46  ;;  %v5806_v46 = vpack.c.bf16 %v3072_v56, %v3070_v23  ;;  %v5838_v23 = vpack.c.bf16 %v3104_v16, %v3102_v31  ;;  %v3101_v56 = vld [vmem:[%s9338_s5 + $0x6c0] sm:$0xff] }
 0x3d9   :  { %5777 = vmatpush1.bf16.msra.mxu0 %v5776_v30 }
 0x3da   :  { %5779 = vmatprep.subr.bf16.mxu0 %v5778_v54  ;;  %v3073_v54 = vld [vmem:[%s9338_s5 + $0x5e0] sm:$0xff] }
 0x3db   :  { %v5812_v62 = vpack.c.bf16 %v3075_v34, %v3073_v54 }
 0x3dd   :  { %5781 = vmatpush1.bf16.msra.mxu0 %v5780_v4  ;;  %v5814_v4 = vpack.c.bf16 %v3080_v22, %v3078_v1 }
 0x3de   :  { %5783 = vmatprep.subr.bf16.mxu0 %v5782_v18  ;;  %v3077_v18 = vld [vmem:[%s9338_s5 + $0x600] sm:$0xff] }
 0x3e1   :  { %5785 = vmatpush1.bf16.msra.mxu0 %v5784_v20  ;;  %v5816_v20 = vpack.c.bf16 %v3079_v21, %v3077_v18 }
 0x3e2   :  { %5787 = vmatprep.subr.bf16.mxu0 %v5786_v41 }
 0x3e5   :  { %5789 = vmatpush1.bf16.msra.mxu0 %v5788_v40  ;;  %v5822_v40 = vpack.c.bf16 %v3088_v48, %v3086_v17 }
 0x3e6   :  { %5791 = vmatprep.subr.bf16.mxu0 %v5790_v59  ;;  %v3085_v59 = vld [vmem:[%s9338_s5 + $0x640] sm:$0xff] }
 0x3e7   :  { %v5824_v44 = vpack.c.bf16 %v3087_v6, %v3085_v59 }
 0x3e9   :  { %5793 = vmatpush1.bf16.msra.mxu0 %v5792_v24  ;;  %v5826_v24 = vpack.c.bf16 %v3092_v13, %v3090_v42 }
 0x3ea   :  { %5795 = vmatprep.subr.bf16.mxu0 %v5794_v51  ;;  %v3089_v51 = vld [vmem:[%s9338_s5 + $0x660] sm:$0xff] }
 0x3eb   :  { %v5828_v5 = vpack.c.bf16 %v3091_v58, %v3089_v51 }
 0x3ec   :  { %v8381_v36 = vpop.permute.xlu0 %6208 }
 0x3ed   :  { %5797 = vmatpush1.bf16.msra.mxu0 %v5796_v27  ;;  %v6211_v10 = vunpack.i.h.bf16 %v8381_v36  ;;  %v6210_v29 = vunpack.i.l.bf16 %v8381_v36  ;;  %v5830_v27 = vpack.c.bf16 %v3096_v57, %v3094_v37 }
 0x3ee   :  { %5799 = vmatprep.subr.bf16.mxu0 %v5798_v60  ;;  %v3093_v60 = vld [vmem:[%s9338_s5 + $0x680] sm:$0xff] }
 0x3ef   :  { %v2848_v9 = vsel %vm9447_vm4, %v6210_v29, %v6211_v10  ;;  %v2847_v55 = vsel %vm9448_vm7, %v8188_v12, %v6210_v29  ;;  %v3083_v12 = vld [vmem:[%s9338_s5 + $0x630] sm:$0xff]  ;;  %v5832_v39 = vpack.c.bf16 %v3095_v63, %v3093_v60  ;;  %v5834_v29 = vpack.c.bf16 %v3100_v25, %v3098_v15  ;;  %vm9453_vm7 = vmmov %vm9450_vm6 }
 0x3f0   :  { %v2876_v33 = vmax.f32 %v8167_v0, %v2848_v9  ;;  %v3076_v0 = vld [vmem:[%s9338_s5 + $0x5f8] sm:$0xff]  ;;  %v2875_v41 = vmax.f32 %v7991_v53, %v2847_v55  ;;  %v5820_v53 = vpack.c.bf16 %v3083_v12, %v3081_v45  ;;  %v2826_v1 = vpop.permute.xlu0 %2825  ;;  %vm3778_vm4 = vcmask 801792  }
 0x3f1   :  { %5801 = vmatpush1.bf16.msra.mxu0 %v5800_v7  ;;  %v5810_v30 = vpack.c.bf16 %v3076_v0, %v3074_v28  ;;  %v3097_v7 = vld [vmem:[%s9338_s5 + $0x6a0] sm:$0xff]  ;;  %v3107_v0 = vld [vmem:[%s9338_s5 + $0x6f0] sm:$0xff]  ;;  %v2849_v21 = vsel %vm9451_vm13, %v6211_v10, %v2826_v1  ;;  %vm9386_vm13 = vcmask 588800  }
 0x3f2   :  { %5803 = vmatprep.subr.bf16.mxu0 %v5802_v38  ;;  %3327 = vmatprep.mubr.f32.mxu0 %v2876_v33  ;;  %v3099_v38 = vld [vmem:[%s9338_s5 + $0x6b0] sm:$0xff]  ;;  %v3105_v28 = vld [vmem:[%s9338_s5 + $0x6e0] sm:$0xff]  ;;  %v2877_v47 = vmax.f32 %v8171_v2, %v2849_v21 }
 0x3f3   :  { %v5836_v9 = vpack.c.bf16 %v3099_v38, %v3097_v7  ;;  %v3103_v33 = vld [vmem:[%s9338_s5 + $0x6d0] sm:$0xff] }
 0x3f4   :  { %v5840_v61 = vpack.c.bf16 %v3103_v33, %v3101_v56 }
 0x3f5   :  { %5805 = vmatpush1.bf16.msra.mxu0 %v5804_v49  ;;  %v3106_v49 = vld [vmem:[%s9338_s5 + $0x6e8] sm:$0xff] }
 0x3f6   :  { %5807 = vmatprep.subr.bf16.mxu0 %v5806_v46  ;;  %v3108_v46 = vld [vmem:[%s9338_s5 + $0x6f8] sm:$0xff]  ;;  %s6325_s5 = smov 113  }
 0x3f7   :  { %v5842_v52 = vpack.c.bf16 %v3108_v46, %v3106_v49 }
 0x3f9   :  { %5809 = vmatpush1.bf16.msra.mxu0 %v5808_v26  ;;  %v5844_v26 = vpack.c.bf16 %v3107_v0, %v3105_v28 }
 0x3fa   :  { %5811 = vmatprep.subr.bf16.mxu0 %v5810_v30 }
 0x3fd   :  { %5813 = vmatpush1.bf16.msra.mxu0 %v5812_v62 }
 0x3fe   :  { %5815 = vmatprep.subr.bf16.mxu0 %v5814_v4 }
 0x400   :  { %3328 = vmatmul.mubr.f32.vlgmr.msra.gmra.mrb[12].mxu0 %v2875_v41 }
 0x401   :  { %5817 = vmatpush1.bf16.msra.mxu0 %v5816_v20 }
 0x402   :  { %5819 = vmatprep.subr.bf16.mxu0 %v5818_v3 }
 0x405   :  { %5821 = vmatpush1.bf16.msra.mxu0 %v5820_v53 }
 0x406   :  { %5823 = vmatprep.subr.bf16.mxu0 %v5822_v40 }
 0x409   :  { %5825 = vmatpush1.bf16.msra.mxu0 %v5824_v44 }
 0x40a   :  { %5827 = vmatprep.subr.bf16.mxu0 %v5826_v24 }
 0x40d   :  { %5829 = vmatpush1.bf16.msra.mxu0 %v5828_v5 }
 0x40e   :  { %5831 = vmatprep.subr.bf16.mxu0 %v5830_v27 }
 0x411   :  { %5833 = vmatpush1.bf16.msra.mxu0 %v5832_v39 }
 0x412   :  { %5835 = vmatprep.subr.bf16.mxu0 %v5834_v29 }
 0x415   :  { %5837 = vmatpush1.bf16.msra.mxu0 %v5836_v9 }
 0x416   :  { %5839 = vmatprep.subr.bf16.mxu0 %v5838_v23 }
 0x419   :  { %5841 = vmatpush1.bf16.msra.mxu0 %v5840_v61 }
 0x41a   :  { %5843 = vmatprep.subr.bf16.mxu0 %v5842_v52 }
 0x41d   :  { %5845 = vmatpush1.bf16.msra.mxu0 %v5844_v26 }
 0x438   :  { %v6214_v30 = vpop.permute.xlu1 %6213 }
 0x439   :  { %v6216_v54 = vunpack.i.h.bf16 %v6214_v30  ;;  %v6215_v34 = vunpack.i.l.bf16 %v6214_v30 }
 0x43b   :  { %v2855_v22 = vsel %vm9449_vm12, %v6215_v34, %v6216_v54  ;;  %v2854_v62 = vsel %vm9450_vm6, %v6206_v43, %v6215_v34  ;;  %vm3897_vm12 = vcmask 695296   ;;  %vm3957_vm6 = vcmask 678912  }
 0x43c   :  { %v2883_v4 = vmax.f32 %v8231_v32, %v2855_v22  ;;  %v2882_v18 = vmax.f32 %v8015_v35, %v2854_v62  ;;  %v2842_v55 = vpop.permute.xlu1 %2841 }
 0x43d   :  { %v2856_v11 = vsel %vm9452_vm14, %v6216_v54, %v2842_v55  ;;  %vm3461_vm14 = vcmask 556036  }
 0x43e   :  { %3333 = vmatprep.mubr.f32.mxu0 %v2883_v4  ;;  %v2884_v14 = vmax.f32 %v8234_v50, %v2856_v11 }
 0x43f   :  { %3334 = vmatmul.mubr.f32.gmra.mrb[14].mxu0 %v2882_v18 }
 0x440   :  { %3404 = vmatprep.mubr.f32.mxu0 %v6323_v19 }
 0x443   :  { %3405 = vmatmul.mubr.f32.vlgmr.msra.gmra.mrb[12].mxu0 %v2877_v47 }
 0x444   :  { %3410 = vmatprep.mubr.f32.mxu0 %v6323_v19 }
 0x447   :  { %3411 = vmatmul.mubr.f32.gmra.mrb[14].mxu0 %v2884_v14 }
 0x516   :  { %v8532_v35 = vpop.f32.mrb[12].mxu0 }
 0x517   :  { %v8534_v43 = vpop.f32.mrb[13].mxu0  ;;  %3473 = vrot.lane.b32.xlu0 %v8532_v35, %s6304_s29  ;;  %v8580_v10 = vrot.slane %v8532_v35, 4 }
 0x518   :  { %3427 = vst.msk [vmem:[#allocation5 + $0x8] sm:$0xff] %vm3426_vm15, %v8534_v43  ;;  %3475 = vrot.lane.b32.xlu1 %v8534_v43, %s6304_s29  ;;  %v8583_v20 = vrot.slane %v8534_v43, 4 }
 0x51a   :  { %v3412_v2 = vpop.f32.mrb[14].mxu0 }
 0x51b   :  { %3419 = vst [vmem:[#allocation4 + $0x10] sm:$0xf] %v3412_v2  ;;  %v3414_v32 = vpop.f32.mrb[15].mxu0  ;;  %3531 = vrot.lane.b32.xlu0 %v8532_v35, %s9422_s0 }
 0x51c   :  { %3420 = vst [vmem:[#allocation4 + $0x18] sm:$0xf] %v3414_v32  ;;  %3533 = vrot.lane.b32.xlu1 %v8534_v43, %s9422_s0 }
 0x51f   :  { %3590 = vrot.lane.b32.xlu0 %v8532_v35, %s6325_s5 }
 0x520   :  { %3592 = vrot.lane.b32.xlu1 %v8534_v43, %s6325_s5 }
 0x522   :  { %v3423_v50 = vld [vmem:[#allocation4 + $0x10] sm:$0xf] }
 0x523   :  { %3428 = vst [vmem:[#allocation5 + $0x10] sm:$0xf] %v3423_v50  ;;  %v3424_v36 = vld [vmem:[#allocation4 + $0x18] sm:$0xf]  ;;  %3650 = vrot.lane.b32.xlu0 %v8532_v35, %s6326_s1  ;;  %v3467_v41 = vld [vmem:[#allocation4 + $0x10] sm:$0xf] }
 0x524   :  { %3430 = vst.msk [vmem:[#allocation5 + $0x18] sm:$0xf] %vm3429_vm8, %v3424_v36  ;;  %3652 = vrot.lane.b32.xlu1 %v8534_v43, %s6326_s1  ;;  %v3468_v3 = vld [vmem:[#allocation4 + $0x18] sm:$0xf]  ;;  %v3525_v45 = vld [vmem:[#allocation4 + $0x10] sm:$0xf] }
 0x525   :  { %v3526_v12 = vld [vmem:[#allocation4 + $0x18] sm:$0xf]  ;;  %v3584_v17 = vld [vmem:[#allocation4 + $0x10] sm:$0xf] }
 0x526   :  { %v3585_v48 = vld [vmem:[#allocation4 + $0x18] sm:$0xf]  ;;  %v3644_v53 = vld [vmem:[#allocation4 + $0x10] sm:$0xf] }
 0x527   :  { %3710 = vrot.lane.b32.xlu0 %v8532_v35, %s6327_s25  ;;  %v3645_v40 = vld [vmem:[#allocation4 + $0x18] sm:$0xf]  ;;  %v3704_v59 = vld [vmem:[#allocation4 + $0x10] sm:$0xf] }
 0x528   :  { %3712 = vrot.lane.b32.xlu1 %v8534_v43, %s6327_s25  ;;  %v3705_v6 = vld [vmem:[#allocation4 + $0x18] sm:$0xf]  ;;  %v3764_v42 = vld [vmem:[#allocation4 + $0x10] sm:$0xf] }
 0x529   :  { %v3765_v13 = vld [vmem:[#allocation4 + $0x18] sm:$0xf]  ;;  %v3824_v44 = vld [vmem:[#allocation4 + $0x10] sm:$0xf] }
 0x52a   :  { %v3825_v24 = vld [vmem:[#allocation4 + $0x18] sm:$0xf]  ;;  %v3883_v51 = vld [vmem:[#allocation4 + $0x10] sm:$0xf] }
 0x52b   :  { %3770 = vrot.lane.b32.xlu0 %v8532_v35, %s6328_s20  ;;  %v3884_v58 = vld [vmem:[#allocation4 + $0x18] sm:$0xf]  ;;  %v3433_v37 = vld [vmem:[#allocation4 + $0x10] sm:$0xf] }
 0x52c   :  { %3772 = vrot.lane.b32.xlu1 %v8534_v43, %s6328_s20  ;;  %v3434_v57 = vld [vmem:[#allocation4 + $0x18] sm:$0xf]  ;;  %v3943_v5 = vld [vmem:[#allocation4 + $0x10] sm:$0xf]  ;;  %v3442_v27 = vrot.slane %v3433_v37, 4 }
 0x52d   :  { %v3944_v60 = vld [vmem:[#allocation4 + $0x18] sm:$0xf]  ;;  %v3444_v63 = vrot.slane %v3434_v57, 4  ;;  %v3493_v15 = vld [vmem:[#allocation4 + $0x10] sm:$0xf] }
 0x52e   :  { %v3494_v25 = vld [vmem:[#allocation4 + $0x18] sm:$0xf]  ;;  %v3443_v7 = vsel %vm3439_vm11, %v8580_v10, %v3442_v27  ;;  %v3501_v38 = vrot.slane %v3493_v15, 4  ;;  %v3551_v61 = vld [vmem:[#allocation4 + $0x10] sm:$0xf] }
 0x52f   :  { %3830 = vrot.lane.b32.xlu0 %v8532_v35, %s9406_s16  ;;  %v3445_v16 = vsel %vm3439_vm11, %v8583_v20, %v3444_v63  ;;  %v3503_v9 = vrot.slane %v3494_v25, 4  ;;  %v3552_v52 = vld [vmem:[#allocation4 + $0x18] sm:$0xf]  ;;  %v4003_v26 = vld [vmem:[#allocation4 + $0x10] sm:$0xf]  ;;  %v3559_v30 = vrot.slane %v3551_v61, 4 }
 0x530   :  { %3832 = vrot.lane.b32.xlu1 %v8534_v43, %s9406_s16  ;;  %v3502_v33 = vsel %vm3439_vm11, %v8580_v10, %v3501_v38  ;;  %v4004_v34 = vld [vmem:[#allocation4 + $0x18] sm:$0xf]  ;;  %v3561_v1 = vrot.slane %v3552_v52, 4  ;;  %v3611_v22 = vld [vmem:[#allocation4 + $0x10] sm:$0xf] }
 0x531   :  { %v3504_v46 = vsel %vm3439_vm11, %v8583_v20, %v3503_v9  ;;  %v3612_v62 = vld [vmem:[#allocation4 + $0x18] sm:$0xf]  ;;  %v3560_v21 = vsel %vm3439_vm11, %v8580_v10, %v3559_v30  ;;  %v3619_v55 = vrot.slane %v3611_v22, 4  ;;  %v3671_v2 = vld [vmem:[#allocation4 + $0x10] sm:$0xf] }
 0x532   :  { %v3562_v11 = vsel %vm3439_vm11, %v8583_v20, %v3561_v1  ;;  %v3621_v14 = vrot.slane %v3612_v62, 4  ;;  %v3910_v38 = vld [vmem:[#allocation4 + $0x10] sm:$0xf] }
 0x533   :  { %3889 = vrot.lane.b32.xlu0 %v8532_v35, %s6329_s21  ;;  %v3620_v36 = vsel %vm3439_vm11, %v8580_v10, %v3619_v55  ;;  %v3970_v52 = vld [vmem:[#allocation4 + $0x10] sm:$0xf] }
 0x534   :  { %3891 = vrot.lane.b32.xlu1 %v8534_v43, %s6329_s21 }
 0x537   :  { %3949 = vrot.lane.b32.xlu0 %v8532_v35, %s6330_s19 }
 0x538   :  { %3951 = vrot.lane.b32.xlu1 %v8534_v43, %s6330_s19 }
 0x53b   :  { %4009 = vrot.lane.b32.xlu0 %v8532_v35, %s6331_s24 }
 0x53c   :  { %4011 = vrot.lane.b32.xlu1 %v8534_v43, %s6331_s24 }
 0x53f   :  { %3446 = vrot.lane.b32.xlu0 %v8580_v10, %s6305_s30 }
 0x540   :  { %3448 = vrot.lane.b32.xlu1 %v8583_v20, %s6305_s30 }
 0x543   :  { %3505 = vrot.lane.b32.xlu0 %v8580_v10, %s6306_s14 }
 0x544   :  { %3507 = vrot.lane.b32.xlu1 %v8583_v20, %s6306_s14 }
 0x547   :  { %3563 = vrot.lane.b32.xlu0 %v8580_v10, %s6332_s18 }
 0x548   :  { %3565 = vrot.lane.b32.xlu1 %v8583_v20, %s6332_s18 }
 0x54b   :  { %3623 = vrot.lane.b32.xlu0 %v8580_v10, %s6333_s26 }
 0x54c   :  { %3625 = vrot.lane.b32.xlu1 %v8583_v20, %s6333_s26 }
 0x54f   :  { %3683 = vrot.lane.b32.xlu0 %v8580_v10, %s6334_s23 }
 0x550   :  { %3685 = vrot.lane.b32.xlu1 %v8583_v20, %s6334_s23 }
 0x553   :  { %3743 = vrot.lane.b32.xlu0 %v8580_v10, %s6335_s27 }
 0x554   :  { %3745 = vrot.lane.b32.xlu1 %v8583_v20, %s6335_s27 }
 0x557   :  { %3803 = vrot.lane.b32.xlu0 %v8580_v10, %s6336_s2 }
 0x558   :  { %3805 = vrot.lane.b32.xlu1 %v8583_v20, %s6336_s2 }
 0x55b   :  { %3862 = vrot.lane.b32.xlu0 %v8580_v10, %s6337_s15 }
 0x55c   :  { %3864 = vrot.lane.b32.xlu1 %v8583_v20, %s6337_s15 }
 0x55f   :  { %3922 = vrot.lane.b32.xlu0 %v8580_v10, %s6338_s22 }
 0x560   :  { %3924 = vrot.lane.b32.xlu1 %v8583_v20, %s6338_s22 }
 0x563   :  { %3982 = vrot.lane.b32.xlu0 %v8580_v10, %s6339_s28 }
 0x564   :  { %3984 = vrot.lane.b32.xlu1 %v8583_v20, %s6339_s28 }
 0x567   :  { %3477 = vrot.lane.b32.xlu0 %v3467_v41, %s6304_s29  ;;  %v3679_v41 = vrot.slane %v3671_v2, 4  ;;  %v3911_v2 = vld [vmem:[#allocation4 + $0x18] sm:$0xf] }
 0x568   :  { %3479 = vrot.lane.b32.xlu1 %v3468_v3, %s6304_s29  ;;  %s6340_s29 = smov 71  }
 0x56b   :  { %3535 = vrot.lane.b32.xlu0 %v3525_v45, %s9422_s0  ;;  %v3622_v45 = vsel %vm3439_vm11, %v8583_v20, %v3621_v14  ;;  %v4030_v14 = vld [vmem:[#allocation4 + $0x10] sm:$0xf] }
 0x56c   :  { %3537 = vrot.lane.b32.xlu1 %v3526_v12, %s9422_s0  ;;  %v3731_v12 = vld [vmem:[#allocation4 + $0x10] sm:$0xf]  ;;  %s6342_s0 = smov 69  }
 0x56f   :  { %3594 = vrot.lane.b32.xlu0 %v3584_v17, %s6325_s5  ;;  %v3672_v17 = vld [vmem:[#allocation4 + $0x18] sm:$0xf] }
 0x570   :  { %3596 = vrot.lane.b32.xlu1 %v3585_v48, %s6325_s5  ;;  %s6356_s5 = smov [#allocation9]  }
 0x573   :  { %3654 = vrot.lane.b32.xlu0 %v3644_v53, %s6326_s1 }
 0x574   :  { %3656 = vrot.lane.b32.xlu1 %v3645_v40, %s6326_s1  ;;  %v3680_v40 = vsel %vm3439_vm11, %v8580_v10, %v3679_v41  ;;  %s6346_s1 = smov 50  }
 0x577   :  { %3714 = vrot.lane.b32.xlu0 %v3704_v59, %s6327_s25  ;;  %v3739_v59 = vrot.slane %v3731_v12, 4  ;;  %v3920_v12 = vrot.slane %v3911_v2, 4  ;;  %v4124_v2 = vld [vmem:[#allocation4 + $0x18] sm:$0xf] }
 0x578   :  { %3716 = vrot.lane.b32.xlu1 %v3705_v6, %s6327_s25 }
 0x57b   :  { %3774 = vrot.lane.b32.xlu0 %v3764_v42, %s6328_s20  ;;  %v3681_v42 = vrot.slane %v3672_v17, 4  ;;  %v3971_v17 = vld [vmem:[#allocation4 + $0x18] sm:$0xf] }
 0x57c   :  { %3776 = vrot.lane.b32.xlu1 %v3765_v13, %s6328_s20  ;;  %v3791_v13 = vld [vmem:[#allocation4 + $0x10] sm:$0xf]  ;;  %s6343_s20 = smov 68  }
 0x57d   :  { %v3799_v37 = vrot.slane %v3791_v13, 4 }
 0x57f   :  { %3834 = vrot.lane.b32.xlu0 %v3824_v44, %s9406_s16  ;;  %v3732_v44 = vld [vmem:[#allocation4 + $0x18] sm:$0xf]  ;;  %v3800_v25 = vsel %vm3439_vm11, %v8580_v10, %v3799_v37 }
 0x580   :  { %3836 = vrot.lane.b32.xlu1 %v3825_v24, %s9406_s16  ;;  %v3741_v27 = vrot.slane %v3732_v44, 4  ;;  %s6341_s16 = smov 70   ;;  %v3921_v44 = vsel %vm3439_vm11, %v8583_v20, %v3920_v12  ;;  %v4238_v12 = vld [vmem:[%s9337_s4 + $0x18] sm:$0xff] }
 0x583   :  { %3893 = vrot.lane.b32.xlu0 %v3883_v51, %s6329_s21 }
 0x584   :  { %3895 = vrot.lane.b32.xlu1 %v3884_v58, %s6329_s21  ;;  %v3740_v58 = vsel %vm3439_vm11, %v8580_v10, %v3739_v59  ;;  %v4160_v59 = vld [vmem:[#allocation5 + $0x8] sm:$0xff] }
 0x587   :  { %3953 = vrot.lane.b32.xlu0 %v3943_v5, %s6330_s19  ;;  %v3682_v5 = vsel %vm3439_vm11, %v8583_v20, %v3681_v42 }
 0x588   :  { %3955 = vrot.lane.b32.xlu1 %v3944_v60, %s6330_s19  ;;  %v3850_v60 = vld [vmem:[#allocation4 + $0x10] sm:$0xf]  ;;  %s6350_s19 = smov 25  }
 0x589   :  { %v3474_v39 = vpop.permute.xlu0 %3473 }
 0x58a   :  { %v3476_v29 = vpop.permute.xlu1 %3475 }
 0x58b   :  { %v8646_v31 = vsel %vm256_vm0, %v3474_v39, %v3476_v29  ;;  %3488 = vst.msk [vmem:[#allocation5 + $0x38] sm:$0xff] %vm3426_vm15, %v3476_v29  ;;  %3450 = vrot.lane.b32.xlu0 %v3443_v7, %s6305_s30  ;;  %v3858_v39 = vrot.slane %v3850_v60, 4  ;;  %v3742_v7 = vsel %vm3439_vm11, %v8583_v20, %v3741_v27 }
 0x58c   :  { %3452 = vrot.lane.b32.xlu1 %v3445_v16, %s6305_s30  ;;  %v3792_v16 = vld [vmem:[#allocation4 + $0x18] sm:$0xf] }
 0x58d   :  { %v3532_v23 = vpop.permute.xlu0 %3531  ;;  %v3801_v61 = vrot.slane %v3792_v16, 4  ;;  %v4031_v16 = vld [vmem:[#allocation4 + $0x18] sm:$0xf] }
 0x58e   :  { %v3534_v56 = vpop.permute.xlu1 %3533 }
 0x58f   :  { %v8656_v49 = vsel %vm438_vm3, %v3532_v23, %v3534_v56  ;;  %3546 = vst.msk [vmem:[#allocation5 + $0x68] sm:$0xff] %vm3426_vm15, %v3534_v56  ;;  %3509 = vrot.lane.b32.xlu0 %v3502_v33, %s6306_s14  ;;  %v3859_v56 = vsel %vm3439_vm11, %v8580_v10, %v3858_v39  ;;  %v3918_v33 = vrot.slane %v3910_v38, 4  ;;  %v3802_v22 = vsel %vm3439_vm11, %v8583_v20, %v3801_v61  ;;  %v4063_v39 = vld [vmem:[#allocation4 + $0x10] sm:$0xf] }
 0x590   :  { %3511 = vrot.lane.b32.xlu1 %v3504_v46, %s6306_s14  ;;  %v4090_v38 = vld [vmem:[#allocation4 + $0x10] sm:$0xf] }
 0x591   :  { %v3591_v28 = vpop.permute.xlu0 %3590  ;;  %v3919_v30 = vsel %vm3439_vm11, %v8580_v10, %v3918_v33  ;;  %v4098_v33 = vrot.slane %v4090_v38, 4 }
 0x592   :  { %v3593_v0 = vpop.permute.xlu1 %3592 }
 0x593   :  { %v8664_v54 = vsel %vm3598_vm9, %v3591_v28, %v3593_v0  ;;  %3606 = vst.msk [vmem:[#allocation5 + $0x98] sm:$0xff] %vm3426_vm15, %v3593_v0  ;;  %4013 = vrot.lane.b32.xlu0 %v4003_v26, %s6331_s24  ;;  %v3851_v28 = vld [vmem:[#allocation4 + $0x18] sm:$0xf] }
 0x594   :  { %4015 = vrot.lane.b32.xlu1 %v4004_v34, %s6331_s24  ;;  %v3978_v34 = vrot.slane %v3970_v52, 4  ;;  %v3860_v62 = vrot.slane %v3851_v28, 4  ;;  %v4040_v52 = vrot.slane %v4031_v16, 4  ;;  %v4091_v28 = vld [vmem:[#allocation4 + $0x18] sm:$0xf] }
 0x595   :  { %v3651_v4 = vpop.permute.xlu0 %3650 }
 0x596   :  { %v3653_v18 = vpop.permute.xlu1 %3652 }
 0x597   :  { %v8672_v47 = vsel %vm3658_vm5, %v3651_v4, %v3653_v18  ;;  %3666 = vst.msk [vmem:[#allocation5 + $0xc8] sm:$0xff] %vm3426_vm15, %v3653_v18  ;;  %3567 = vrot.lane.b32.xlu0 %v3560_v21, %s6332_s18  ;;  %v3979_v21 = vsel %vm3439_vm11, %v8580_v10, %v3978_v34 }
 0x598   :  { %3569 = vrot.lane.b32.xlu1 %v3562_v11, %s6332_s18  ;;  %v3861_v11 = vsel %vm3439_vm11, %v8583_v20, %v3860_v62  ;;  %v4100_v62 = vrot.slane %v4091_v28, 4 }
 0x599   :  { %v3711_v32 = vpop.permute.xlu0 %3710 }
 0x59a   :  { %v3713_v50 = vpop.permute.xlu1 %3712 }
 0x59b   :  { %v8682_v3 = vsel %vm3718_vm10, %v3711_v32, %v3713_v50  ;;  %3726 = vst.msk [vmem:[#allocation5 + $0xf8] sm:$0xff] %vm3426_vm15, %v3713_v50  ;;  %3627 = vrot.lane.b32.xlu0 %v3620_v36, %s6333_s26  ;;  %v4038_v36 = vrot.slane %v4030_v14, 4 }
 0x59c   :  { %3629 = vrot.lane.b32.xlu1 %v3622_v45, %s6333_s26  ;;  %v4064_v45 = vld [vmem:[#allocation4 + $0x18] sm:$0xf] }
 0x59d   :  { %v3771_v48 = vpop.permute.xlu0 %3770 }
 0x59e   :  { %v3773_v53 = vpop.permute.xlu1 %3772 }
 0x59f   :  { %v8692_v6 = vsel %vm3778_vm4, %v3771_v48, %v3773_v53  ;;  %3786 = vst.msk [vmem:[#allocation5 + $0x128] sm:$0xff] %vm3426_vm15, %v3773_v53  ;;  %3687 = vrot.lane.b32.xlu0 %v3680_v40, %s6334_s23  ;;  %v4039_v40 = vsel %vm3439_vm11, %v8580_v10, %v4038_v36 }
 0x5a0   :  { %4044 = vrot.lane.b32.xlu1 %v8583_v20, %s6340_s29 }
 0x5a1   :  { %v3831_v24 = vpop.permute.xlu0 %3830 }
 0x5a2   :  { %v3833_v51 = vpop.permute.xlu1 %3832 }
 0x5a3   :  { %v8701_v57 = vsel %vm9453_vm7, %v3831_v24, %v3833_v51  ;;  %3845 = vst.msk [vmem:[#allocation5 + $0x158] sm:$0xff] %vm3426_vm15, %v3833_v51  ;;  %3747 = vrot.lane.b32.xlu0 %v3740_v58, %s6335_s27  ;;  %vm9387_vm7 = vcmask 932864   ;;  %v3980_v58 = vrot.slane %v3971_v17, 4 }
 0x5a4   :  { %3689 = vrot.lane.b32.xlu1 %v3682_v5, %s6334_s23 }
 0x5a5   :  { %v3890_v63 = vpop.permute.xlu0 %3889 }
 0x5a6   :  { %v3892_v15 = vpop.permute.xlu1 %3891 }
 0x5a7   :  { %v8711_v29 = vsel %vm3897_vm12, %v3890_v63, %v3892_v15  ;;  %3905 = vst.msk [vmem:[#allocation5 + $0x188] sm:$0xff] %vm3426_vm15, %v3892_v15  ;;  %3807 = vrot.lane.b32.xlu0 %v3800_v25, %s6336_s2  ;;  %v3981_v63 = vsel %vm3439_vm11, %v8583_v20, %v3980_v58 }
 0x5a8   :  { %3749 = vrot.lane.b32.xlu1 %v3742_v7, %s6335_s27 }
 0x5a9   :  { %v3950_v9 = vpop.permute.xlu0 %3949 }
 0x5aa   :  { %v3952_v23 = vpop.permute.xlu1 %3951 }
 0x5ab   :  { %v8721_v46 = vsel %vm3957_vm6, %v3950_v9, %v3952_v23  ;;  %3965 = vst.msk [vmem:[#allocation5 + $0x1b8] sm:$0xff] %vm3426_vm15, %v3952_v23  ;;  %3866 = vrot.lane.b32.xlu0 %v3859_v56, %s6337_s15  ;;  %v4148_v9 = vld [vmem:[%s9336_s3 + $0x8] sm:$0xff] }
 0x5ac   :  { %4071 = vrot.lane.b32.xlu1 %v8534_v43, %s6341_s16  ;;  %4342 = vmatprep.mubr.f32.mxu1 %v4148_v9 }
 0x5ad   :  { %v4010_v0 = vpop.permute.xlu0 %4009 }
 0x5ae   :  { %v4012_v26 = vpop.permute.xlu1 %4011 }
 0x5af   :  { %v8730_v1 = vsel %vm9386_vm13, %v4010_v0, %v4012_v26  ;;  %4025 = vst.msk [vmem:[#allocation5 + $0x1e8] sm:$0xff] %vm3426_vm15, %v4012_v26  ;;  %3926 = vrot.lane.b32.xlu0 %v3919_v30, %s6338_s22  ;;  %vm9388_vm13 = vcmask 916480   ;;  %v4099_v30 = vsel %vm3439_vm11, %v8580_v10, %v4098_v33 }
 0x5b0   :  { %3809 = vrot.lane.b32.xlu1 %v3802_v22, %s6336_s2  ;;  %v4041_v22 = vsel %vm3439_vm11, %v8583_v20, %v4040_v52 }
 0x5b1   :  { %v3447_v4 = vpop.permute.xlu0 %3446 }
 0x5b2   :  { %v3449_v18 = vpop.permute.xlu1 %3448 }
 0x5b3   :  { %v3454_v55 = vsel %vm165_vm2, %v3447_v4, %v3449_v18  ;;  %3462 = vst.msk [vmem:[#allocation5 + $0x18] sm:$0xf0] %vm3461_vm14, %v3449_v18  ;;  %3986 = vrot.lane.b32.xlu0 %v3979_v21, %s6339_s28 }
 0x5b4   :  { %3460 = vst [vmem:[#allocation5 + $0x10] sm:$0xf0] %v3454_v55  ;;  %3868 = vrot.lane.b32.xlu1 %v3861_v11, %s6337_s15  ;;  %v4123_v11 = vld [vmem:[#allocation4 + $0x10] sm:$0xf] }
 0x5b5   :  { %v3506_v32 = vpop.permute.xlu0 %3505 }
 0x5b6   :  { %v3508_v50 = vpop.permute.xlu1 %3507 }
 0x5b7   :  { %v3513_v41 = vsel %vm348_vm1, %v3506_v32, %v3508_v50  ;;  %3520 = vst.msk [vmem:[#allocation5 + $0x48] sm:$0xf0] %vm3461_vm14, %v3508_v50  ;;  %4042 = vrot.lane.b32.xlu0 %v8580_v10, %s6340_s29  ;;  %v4236_v32 = vld [vmem:[%s9337_s4 + $0x8] sm:$0xff] }
 0x5b8   :  { %3519 = vst [vmem:[#allocation5 + $0x40] sm:$0xf0] %v3513_v41  ;;  %4075 = vrot.lane.b32.xlu1 %v4064_v45, %s6341_s16  ;;  %v4237_v41 = vld [vmem:[%s9337_s4 + $0x10] sm:$0xff] }
 0x5b9   :  { %v3564_v48 = vpop.permute.xlu0 %3563 }
 0x5ba   :  { %v3566_v53 = vpop.permute.xlu1 %3565  ;;  %v4162_v42 = vld [vmem:[#allocation5 + $0x18] sm:$0xff] }
 0x5bb   :  { %v3572_v13 = vsel %vm9387_vm7, %v3564_v48, %v3566_v53  ;;  %3579 = vst.msk [vmem:[#allocation5 + $0x78] sm:$0xf0] %vm3461_vm14, %v3566_v53  ;;  %4046 = vrot.lane.b32.xlu0 %v4039_v40, %s6340_s29  ;;  %v5846_v24 = vpack.c.bf16 %v4162_v42, %v4160_v59  ;;  %v4161_v51 = vld [vmem:[#allocation5 + $0x10] sm:$0xff]  ;;  %vm9389_vm7 = vcmask 900096  }
 0x5bc   :  { %3578 = vst [vmem:[#allocation5 + $0x70] sm:$0xf0] %v3572_v13  ;;  %3928 = vrot.lane.b32.xlu1 %v3921_v44, %s6338_s22  ;;  %v5848_v37 = vpack.c.bf16 %v4161_v51, %v8532_v35  ;;  %s6348_s22 = smov 47  }
 0x5bd   :  { %v3624_v5 = vpop.permute.xlu0 %3623  ;;  %5847 = vmatprep.subr.bf16.mxu1 %v5846_v24 }
 0x5be   :  { %v3626_v27 = vpop.permute.xlu1 %3625  ;;  %5849 = vmatpush1.bf16.msra.mxu1 %v5848_v37 }
 0x5bf   :  { %v3632_v60 = vsel %vm9388_vm13, %v3624_v5, %v3626_v27  ;;  %3639 = vst.msk [vmem:[#allocation5 + $0xa8] sm:$0xf0] %vm3461_vm14, %v3626_v27  ;;  %4069 = vrot.lane.b32.xlu0 %v8532_v35, %s6341_s16  ;;  %vm9390_vm13 = vcmask 809984  }
 0x5c0   :  { %3638 = vst [vmem:[#allocation5 + $0xa0] sm:$0xf0] %v3632_v60  ;;  %3988 = vrot.lane.b32.xlu1 %v3981_v63, %s6339_s28  ;;  %s6345_s28 = smov 22  }
 0x5c1   :  { %v3684_v15 = vpop.permute.xlu0 %3683 }
 0x5c2   :  { %v3686_v25 = vpop.permute.xlu1 %3685 }
 0x5c3   :  { %v3692_v7 = vsel %vm9389_vm7, %v3684_v15, %v3686_v25  ;;  %3699 = vst.msk [vmem:[#allocation5 + $0xd8] sm:$0xf0] %vm3461_vm14, %v3686_v25  ;;  %4073 = vrot.lane.b32.xlu0 %v4063_v39, %s6341_s16  ;;  %vm9391_vm7 = vcmask 793600  }
 0x5c4   :  { %3698 = vst [vmem:[#allocation5 + $0xd0] sm:$0xf0] %v3692_v7  ;;  %4104 = vrot.lane.b32.xlu1 %v8583_v20, %s6342_s0 }
 0x5c5   :  { %v3744_v23 = vpop.permute.xlu0 %3743 }
 0x5c6   :  { %v3746_v56 = vpop.permute.xlu1 %3745 }
 0x5c7   :  { %v3752_v61 = vsel %vm9390_vm13, %v3744_v23, %v3746_v56  ;;  %3759 = vst.msk [vmem:[#allocation5 + $0x108] sm:$0xf0] %vm3461_vm14, %v3746_v56  ;;  %4102 = vrot.lane.b32.xlu0 %v8580_v10, %s6342_s0  ;;  %vm9392_vm13 = vcmask 703488   ;;  %v4101_v10 = vsel %vm3439_vm11, %v8583_v20, %v4100_v62 }
 0x5c8   :  { %3758 = vst [vmem:[#allocation5 + $0x100] sm:$0xf0] %v3752_v61  ;;  %4131 = vrot.lane.b32.xlu1 %v8534_v43, %s6343_s20 }
 0x5c9   :  { %v3804_v0 = vpop.permute.xlu0 %3803 }
 0x5ca   :  { %v3806_v26 = vpop.permute.xlu1 %3805 }
 0x5cb   :  { %v3812_v34 = vsel %vm9391_vm7, %v3804_v0, %v3806_v26  ;;  %3819 = vst.msk [vmem:[#allocation5 + $0x138] sm:$0xf0] %vm3461_vm14, %v3806_v26  ;;  %4106 = vrot.lane.b32.xlu0 %v4099_v30, %s6342_s0  ;;  %vm3930_vm7 = vcmask 687104  }
 0x5cc   :  { %3818 = vst [vmem:[#allocation5 + $0x130] sm:$0xf0] %v3812_v34  ;;  %4048 = vrot.lane.b32.xlu1 %v4041_v22, %s6340_s29  ;;  %s6353_s29 = smov 19  }
 0x5cd   :  { %v3863_v43 = vpop.permute.xlu0 %3862 }
 0x5ce   :  { %v3865_v4 = vpop.permute.xlu1 %3864 }
 0x5cf   :  { %v3871_v18 = vsel %vm9392_vm13, %v3863_v43, %v3865_v4  ;;  %3878 = vst.msk [vmem:[#allocation5 + $0x168] sm:$0xf0] %vm3461_vm14, %v3865_v4  ;;  %4129 = vrot.lane.b32.xlu0 %v8532_v35, %s6343_s20  ;;  %vm3990_vm13 = vcmask 670720   ;;  %v4235_v35 = vld [vmem:[%s9337_s4] sm:$0xff]  ;;  %v4166_v43 = vld [vmem:[#allocation5 + $0x38] sm:$0xff] }
 0x5d0   :  { %3877 = vst [vmem:[#allocation5 + $0x160] sm:$0xf0] %v3871_v18  ;;  %4108 = vrot.lane.b32.xlu1 %v4101_v10, %s6342_s0 }
 0x5d1   :  { %v3923_v21 = vpop.permute.xlu0 %3922 }
 0x5d2   :  { %v3925_v55 = vpop.permute.xlu1 %3924 }
 0x5d3   :  { %v3931_v14 = vsel %vm3930_vm7, %v3923_v21, %v3925_v55  ;;  %3938 = vst.msk [vmem:[#allocation5 + $0x198] sm:$0xf0] %vm3461_vm14, %v3925_v55  ;;  %4133 = vrot.lane.b32.xlu0 %v4123_v11, %s6343_s20 }
 0x5d4   :  { %3937 = vst [vmem:[#allocation5 + $0x190] sm:$0xf0] %v3931_v14  ;;  %4135 = vrot.lane.b32.xlu1 %v4124_v2, %s6343_s20 }
 0x5d5   :  { %v3983_v20 = vpop.permute.xlu0 %3982 }
 0x5d6   :  { %v3985_v50 = vpop.permute.xlu1 %3984 }
 0x5d7   :  { %v3991_v36 = vsel %vm3990_vm13, %v3983_v20, %v3985_v50  ;;  %3998 = vst.msk [vmem:[#allocation5 + $0x1c8] sm:$0xf0] %vm3461_vm14, %v3985_v50  ;;  %4241 = vperm.xlu0 %6146, %v4235_v35  }
 0x5d8   :  { %3997 = vst [vmem:[#allocation5 + $0x1c0] sm:$0xf0] %v3991_v36  ;;  %4246 = vperm.xlu1 %6145, %v4236_v32   ;;  %v4172_v36 = vld [vmem:[#allocation5 + $0x68] sm:$0xff] }
 0x5d9   :  { %v3478_v45 = vpop.permute.xlu0 %3477 }
 0x5da   :  { %v3480_v17 = vpop.permute.xlu1 %3479 }
 0x5db   :  { %v3482_v48 = vsel %vm256_vm0, %v3478_v45, %v3480_v17  ;;  %3490 = vst.msk [vmem:[#allocation5 + $0x48] sm:$0xf] %vm3429_vm8, %v3480_v17  ;;  %4251 = vperm.xlu0 %6146, %v4237_v41   ;;  %vm9454_vm0 = vcmask 785408  }
 0x5dc   :  { %3489 = vst [vmem:[#allocation5 + $0x40] sm:$0xf] %v3482_v48  ;;  %4256 = vperm.xlu1 %6145, %v4238_v12  }
 0x5dd   :  { %v3536_v53 = vpop.permute.xlu0 %3535 }
 0x5de   :  { %v3538_v40 = vpop.permute.xlu1 %3537 }
 0x5df   :  { %v3540_v59 = vsel %vm438_vm3, %v3536_v53, %v3538_v40  ;;  %3548 = vst.msk [vmem:[#allocation5 + $0x78] sm:$0xf] %vm3429_vm8, %v3538_v40  ;;  %vm9455_vm3 = vcmask 588800  }
 0x5e0   :  { %3547 = vst [vmem:[#allocation5 + $0x70] sm:$0xf] %v3540_v59 }
 0x5e1   :  { %v3595_v42 = vpop.permute.xlu0 %3594 }
 0x5e2   :  { %v3597_v13 = vpop.permute.xlu1 %3596  ;;  %v4168_v11 = vld [vmem:[#allocation5 + $0x48] sm:$0xff] }
 0x5e3   :  { %v3600_v44 = vsel %vm3598_vm9, %v3595_v42, %v3597_v13  ;;  %3608 = vst.msk [vmem:[#allocation5 + $0xa8] sm:$0xf] %vm3429_vm8, %v3597_v13  ;;  %vm9456_vm9 = vcmask 932864   ;;  %v4167_v32 = vld [vmem:[#allocation5 + $0x40] sm:$0xff]  ;;  %v4178_v42 = vld [vmem:[#allocation5 + $0x98] sm:$0xff] }
 0x5e4   :  { %3607 = vst [vmem:[#allocation5 + $0xa0] sm:$0xf] %v3600_v44 }
 0x5e5   :  { %v3655_v24 = vpop.permute.xlu0 %3654 }
 0x5e6   :  { %v3657_v51 = vpop.permute.xlu1 %3656  ;;  %v4174_v2 = vld [vmem:[#allocation5 + $0x78] sm:$0xff] }
 0x5e7   :  { %v3660_v58 = vsel %vm3658_vm5, %v3655_v24, %v3657_v51  ;;  %3668 = vst.msk [vmem:[#allocation5 + $0xd8] sm:$0xf] %vm3429_vm8, %v3657_v51  ;;  %v5858_v45 = vpack.c.bf16 %v4174_v2, %v4172_v36  ;;  %v4173_v12 = vld [vmem:[#allocation5 + $0x70] sm:$0xff]  ;;  %vm9457_vm5 = vcmask 916480  }
 0x5e8   :  { %3667 = vst [vmem:[#allocation5 + $0xd0] sm:$0xf] %v3660_v58  ;;  %v5860_v48 = vpack.c.bf16 %v4173_v12, %v8656_v49 }
 0x5e9   :  { %v3715_v37 = vpop.permute.xlu0 %3714 }
 0x5ea   :  { %v3717_v5 = vpop.permute.xlu1 %3716  ;;  %v4180_v58 = vld [vmem:[#allocation5 + $0xa8] sm:$0xff] }
 0x5eb   :  { %v3720_v27 = vsel %vm3718_vm10, %v3715_v37, %v3717_v5  ;;  %3728 = vst.msk [vmem:[#allocation5 + $0x108] sm:$0xf] %vm3429_vm8, %v3717_v5  ;;  %vm9458_vm10 = vcmask 900096  }
 0x5ec   :  { %3727 = vst [vmem:[#allocation5 + $0x100] sm:$0xf] %v3720_v27 }
 0x5ed   :  { %v3775_v60 = vpop.permute.xlu0 %3774 }
 0x5ee   :  { %v3777_v63 = vpop.permute.xlu1 %3776  ;;  %v4186_v5 = vld [vmem:[#allocation5 + $0xd8] sm:$0xff] }
 0x5ef   :  { %v3780_v15 = vsel %vm3778_vm4, %v3775_v60, %v3777_v63  ;;  %3788 = vst.msk [vmem:[#allocation5 + $0x138] sm:$0xf] %vm3429_vm8, %v3777_v63  ;;  %v4179_v60 = vld [vmem:[#allocation5 + $0xa0] sm:$0xff]  ;;  %vm9459_vm4 = vcmask 809984  }
 0x5f0   :  { %3787 = vst [vmem:[#allocation5 + $0x130] sm:$0xf] %v3780_v15  ;;  %v4184_v15 = vld [vmem:[#allocation5 + $0xc8] sm:$0xff] }
 0x5f1   :  { %v3835_v25 = vpop.permute.xlu0 %3834 }
 0x5f2   :  { %v3837_v39 = vpop.permute.xlu1 %3836 }
 0x5f3   :  { %v3839_v7 = vsel %vm9454_vm0, %v3835_v25, %v3837_v39  ;;  %3847 = vst.msk [vmem:[#allocation5 + $0x168] sm:$0xf] %vm3429_vm8, %v3837_v39  ;;  %v5870_v39 = vpack.c.bf16 %v4186_v5, %v4184_v15  ;;  %vm4050_vm0 = vcmask 580608  }
 0x5f4   :  { %3846 = vst [vmem:[#allocation5 + $0x160] sm:$0xf] %v3839_v7  ;;  %v4185_v7 = vld [vmem:[#allocation5 + $0xd0] sm:$0xff] }
 0x5f5   :  { %v3894_v38 = vpop.permute.xlu0 %3893 }
 0x5f6   :  { %v3896_v16 = vpop.permute.xlu1 %3895 }
 0x5f7   :  { %v3899_v9 = vsel %vm3897_vm12, %v3894_v38, %v3896_v16  ;;  %3907 = vst.msk [vmem:[#allocation5 + $0x198] sm:$0xf] %vm3429_vm8, %v3896_v16  ;;  %v5872_v16 = vpack.c.bf16 %v4185_v7, %v8672_v47  ;;  %vm9460_vm12 = vcmask 793600  }
 0x5f8   :  { %3906 = vst [vmem:[#allocation5 + $0x190] sm:$0xf] %v3899_v9 }
 0x5f9   :  { %v3954_v23 = vpop.permute.xlu0 %3953 }
 0x5fa   :  { %v3956_v56 = vpop.permute.xlu1 %3955  ;;  %v4204_v12 = vld [vmem:[#allocation5 + $0x168] sm:$0xff] }
 0x5fb   :  { %v3959_v33 = vsel %vm3957_vm6, %v3954_v23, %v3956_v56  ;;  %3967 = vst.msk [vmem:[#allocation5 + $0x1c8] sm:$0xf] %vm3429_vm8, %v3956_v56  ;;  %vm9461_vm6 = vcmask 703488  }
 0x5fc   :  { %3966 = vst [vmem:[#allocation5 + $0x1c0] sm:$0xf] %v3959_v33  ;;  %v4190_v33 = vld [vmem:[#allocation5 + $0xf8] sm:$0xff] }
 0x5fd   :  { %v3451_v61 = vpop.permute.xlu0 %3450 }
 0x5fe   :  { %v3453_v52 = vpop.permute.xlu1 %3452 }
 0x5ff   :  { %v3455_v28 = vsel %vm165_vm2, %v3451_v61, %v3453_v52  ;;  %3464 = vst.msk [vmem:[#allocation5 + $0x28] sm:$0xff] %vm3426_vm15, %v3453_v52 }
 0x600   :  { %v5852_v10 = vpack.c.bf16 %v8646_v31, %v3455_v28 }
 0x601   :  { %v3510_v0 = vpop.permute.xlu0 %3509 }
 0x602   :  { %v3512_v26 = vpop.permute.xlu1 %3511 }
 0x603   :  { %v3514_v30 = vsel %vm348_vm1, %v3510_v0, %v3512_v26  ;;  %3522 = vst.msk [vmem:[#allocation5 + $0x58] sm:$0xff] %vm3426_vm15, %v3512_v26  ;;  %v4192_v26 = vld [vmem:[#allocation5 + $0x108] sm:$0xff] }
 0x604   :  { %v5856_v50 = vpack.c.bf16 %v3514_v30, %v4167_v32  ;;  %v4202_v32 = vld [vmem:[#allocation5 + $0x158] sm:$0xff] }
 0x605   :  { %v4014_v34 = vpop.permute.xlu0 %4013 }
 0x606   :  { %v4016_v22 = vpop.permute.xlu1 %4015  ;;  %v4164_v62 = vld [vmem:[#allocation5 + $0x28] sm:$0xff] }
 0x607   :  { %v4019_v4 = vsel %vm9455_vm3, %v4014_v34, %v4016_v22  ;;  %4027 = vst.msk [vmem:[#allocation5 + $0x1f8] sm:$0xf] %vm3429_vm8, %v4016_v22  ;;  %v5850_v18 = vpack.c.bf16 %v4166_v43, %v4164_v62  ;;  %v4198_v34 = vld [vmem:[#allocation5 + $0x138] sm:$0xff]  ;;  %v4191_v62 = vld [vmem:[#allocation5 + $0x100] sm:$0xff]  ;;  %vm4077_vm3 = vcmask 572416  }
 0x608   :  { %4026 = vst [vmem:[#allocation5 + $0x1f0] sm:$0xf] %v4019_v4  ;;  %v4196_v4 = vld [vmem:[#allocation5 + $0x128] sm:$0xff] }
 0x609   :  { %v3568_v21 = vpop.permute.xlu0 %3567  ;;  %5851 = vmatprep.subr.bf16.mxu1 %v5850_v18 }
 0x60a   :  { %v3570_v55 = vpop.permute.xlu1 %3569  ;;  %5853 = vmatpush1.bf16.msra.mxu1 %v5852_v10  ;;  %v4170_v14 = vld [vmem:[#allocation5 + $0x58] sm:$0xff]  ;;  %v5882_v10 = vpack.c.bf16 %v4198_v34, %v4196_v4 }
 0x60b   :  { %v3573_v35 = vsel %vm9456_vm9, %v3568_v21, %v3570_v55  ;;  %3581 = vst.msk [vmem:[#allocation5 + $0x88] sm:$0xff] %vm3426_vm15, %v3570_v55  ;;  %v5854_v20 = vpack.c.bf16 %v4170_v14, %v4168_v11  ;;  %v4197_v21 = vld [vmem:[#allocation5 + $0x130] sm:$0xff]  ;;  %v4150_v4 = vld [vmem:[%s9336_s3 + $0x18] sm:$0xff] }
 0x60c   :  { %v5864_v44 = vpack.c.bf16 %v8664_v54, %v3573_v35  ;;  %v5884_v11 = vpack.c.bf16 %v4197_v21, %v8692_v6 }
 0x60d   :  { %v3628_v41 = vpop.permute.xlu0 %3627  ;;  %5855 = vmatprep.subr.bf16.mxu1 %v5854_v20 }
 0x60e   :  { %v3630_v31 = vpop.permute.xlu1 %3629  ;;  %5857 = vmatpush1.bf16.msra.mxu1 %v5856_v50 }
 0x60f   :  { %v3633_v17 = vsel %vm9457_vm5, %v3628_v41, %v3630_v31  ;;  %3641 = vst.msk [vmem:[#allocation5 + $0xb8] sm:$0xff] %vm3426_vm15, %v3630_v31  ;;  %5859 = vmatprep.subr.bf16.mxu1 %v5858_v45  ;;  %v4210_v31 = vld [vmem:[#allocation5 + $0x198] sm:$0xff]  ;;  %vm4661_vm5 = vcmask 203776  }
 0x610   :  { %v5868_v63 = vpack.c.bf16 %v3633_v17, %v4179_v60  ;;  %v4214_v60 = vld [vmem:[#allocation5 + $0x1b8] sm:$0xff] }
 0x611   :  { %v3688_v53 = vpop.permute.xlu0 %3687 }
 0x612   :  { %v8843_v40 = vpop.permute.xlu1 %4044  ;;  %5861 = vmatpush1.bf16.msra.mxu1 %v5860_v48  ;;  %v4176_v59 = vld [vmem:[#allocation5 + $0x88] sm:$0xff] }
 0x613   :  { %4058 = vst.msk [vmem:[#allocation5 + $0x1f8] sm:$0xf0] %vm3461_vm14, %v8843_v40  ;;  %v5862_v13 = vpack.c.bf16 %v4178_v42, %v4176_v59  ;;  %v4208_v59 = vld [vmem:[#allocation5 + $0x188] sm:$0xff] }
 0x615   :  { %v3748_v24 = vpop.permute.xlu0 %3747  ;;  %5863 = vmatprep.subr.bf16.mxu1 %v5862_v13  ;;  %v5894_v13 = vpack.c.bf16 %v4210_v31, %v4208_v59  ;;  %v4158_v59 = vld [vmem:[%s9336_s3 + $0x58] sm:$0xff] }
 0x616   :  { %v3690_v51 = vpop.permute.xlu1 %3689  ;;  %5865 = vmatpush1.bf16.msra.mxu1 %v5864_v44  ;;  %v4182_v37 = vld [vmem:[#allocation5 + $0xb8] sm:$0xff] }
 0x617   :  { %v3693_v49 = vsel %vm9458_vm10, %v3688_v53, %v3690_v51  ;;  %3701 = vst.msk [vmem:[#allocation5 + $0xe8] sm:$0xff] %vm3426_vm15, %v3690_v51  ;;  %v5866_v27 = vpack.c.bf16 %v4182_v37, %v4180_v58  ;;  %v4203_v53 = vld [vmem:[#allocation5 + $0x160] sm:$0xff]  ;;  %vm4667_vm10 = vcmask 197632  }
 0x618   :  { %v5876_v52 = vpack.c.bf16 %v8682_v3, %v3693_v49 }
 0x619   :  { %v3808_v25 = vpop.permute.xlu0 %3807  ;;  %5867 = vmatprep.subr.bf16.mxu1 %v5866_v27 }
 0x61a   :  { %v3750_v54 = vpop.permute.xlu1 %3749  ;;  %5869 = vmatpush1.bf16.msra.mxu1 %v5868_v63 }
 0x61b   :  { %v3753_v38 = vsel %vm9459_vm4, %v3748_v24, %v3750_v54  ;;  %3761 = vst.msk [vmem:[#allocation5 + $0x118] sm:$0xff] %vm3426_vm15, %v3750_v54  ;;  %5871 = vmatprep.subr.bf16.mxu1 %v5870_v39  ;;  %vm4681_vm4 = vcmask 402632  }
 0x61c   :  { %v5880_v43 = vpack.c.bf16 %v3753_v38, %v4191_v62  ;;  %v4222_v38 = vld [vmem:[#allocation5 + $0x1f8] sm:$0xff]  ;;  %v4151_v62 = vld [vmem:[%s9336_s3 + $0x20] sm:$0xff] }
 0x61d   :  { %v3867_v9 = vpop.permute.xlu0 %3866 }
 0x61e   :  { %v4072_v23 = vpop.permute.xlu1 %4071  ;;  %5873 = vmatpush1.bf16.msra.mxu1 %v5872_v16  ;;  %v4188_v56 = vld [vmem:[#allocation5 + $0xe8] sm:$0xff] }
 0x61f   :  { %4085 = vst.msk [vmem:[#allocation5 + $0x218] sm:$0xff] %vm3426_vm15, %v4072_v23  ;;  %v5874_v61 = vpack.c.bf16 %v4190_v33, %v4188_v56  ;;  %v4220_v56 = vld [vmem:[#allocation5 + $0x1e8] sm:$0xff] }
 0x621   :  { %v3927_v28 = vpop.permute.xlu0 %3926  ;;  %5875 = vmatprep.subr.bf16.mxu1 %v5874_v61  ;;  %v5906_v61 = vpack.c.bf16 %v4222_v38, %v4220_v56 }
 0x622   :  { %v3810_v0 = vpop.permute.xlu1 %3809  ;;  %5877 = vmatpush1.bf16.msra.mxu1 %v5876_v52  ;;  %v4194_v30 = vld [vmem:[#allocation5 + $0x118] sm:$0xff] }
 0x623   :  { %v3813_v22 = vsel %vm9460_vm12, %v3808_v25, %v3810_v0  ;;  %3821 = vst.msk [vmem:[#allocation5 + $0x148] sm:$0xff] %vm3426_vm15, %v3810_v0  ;;  %v5878_v47 = vpack.c.bf16 %v4194_v30, %v4192_v26  ;;  %vm4695_vm12 = vcmask 607632  }
 0x624   :  { %v5888_v36 = vpack.c.bf16 %v8701_v57, %v3813_v22  ;;  %v4209_v57 = vld [vmem:[#allocation5 + $0x190] sm:$0xff]  ;;  %v4147_v22 = vld [vmem:[%s9336_s3] sm:$0xff] }
 0x625   :  { %v3987_v18 = vpop.permute.xlu0 %3986  ;;  %5879 = vmatprep.subr.bf16.mxu1 %v5878_v47  ;;  %v5896_v58 = vpack.c.bf16 %v4209_v57, %v8711_v29  ;;  %v4216_v29 = vld [vmem:[#allocation5 + $0x1c8] sm:$0xff] }
 0x626   :  { %v3869_v3 = vpop.permute.xlu1 %3868  ;;  %5881 = vmatpush1.bf16.msra.mxu1 %v5880_v43 }
 0x627   :  { %v3872_v55 = vsel %vm9461_vm6, %v3867_v9, %v3869_v3  ;;  %3880 = vst.msk [vmem:[#allocation5 + $0x178] sm:$0xff] %vm3426_vm15, %v3869_v3  ;;  %5883 = vmatprep.subr.bf16.mxu1 %v5882_v10  ;;  %v4215_v9 = vld [vmem:[#allocation5 + $0x1c0] sm:$0xff]  ;;  %v4226_v10 = vld [vmem:[#allocation5 + $0x218] sm:$0xff]  ;;  %vm4739_vm6 = vcmask 1042408  }
 0x629   :  { %v4043_v14 = vpop.permute.xlu0 %4042 }
 0x62a   :  { %v4051_v2 = vsel %vm4050_vm0, %v4043_v14, %v8843_v40  ;;  %v4076_v35 = vpop.permute.xlu1 %4075  ;;  %5885 = vmatpush1.bf16.msra.mxu1 %v5884_v11  ;;  %v4200_v20 = vld [vmem:[#allocation5 + $0x148] sm:$0xff]  ;;  %v5892_v40 = vpack.c.bf16 %v3872_v55, %v4203_v53  ;;  %v4154_v55 = vld [vmem:[%s9336_s3 + $0x38] sm:$0xff] }
 0x62b   :  { %4057 = vst [vmem:[#allocation5 + $0x1f0] sm:$0xf0] %v4051_v2  ;;  %4087 = vst.msk [vmem:[#allocation5 + $0x228] sm:$0xf] %vm3429_vm8, %v4076_v35  ;;  %v5886_v50 = vpack.c.bf16 %v4202_v32, %v4200_v20  ;;  %v4153_v2 = vld [vmem:[%s9336_s3 + $0x30] sm:$0xff]  ;;  %v4152_v53 = vld [vmem:[%s9336_s3 + $0x28] sm:$0xff] }
 0x62d   :  { %v4047_v41 = vpop.permute.xlu0 %4046  ;;  %5887 = vmatprep.subr.bf16.mxu1 %v5886_v50  ;;  %v4157_v50 = vld [vmem:[%s9336_s3 + $0x50] sm:$0xff] }
 0x62e   :  { %v3929_v45 = vpop.permute.xlu1 %3928  ;;  %5889 = vmatpush1.bf16.msra.mxu1 %v5888_v36  ;;  %v4206_v6 = vld [vmem:[#allocation5 + $0x178] sm:$0xff] }
 0x62f   :  { %v3932_v17 = vsel %vm3930_vm7, %v3927_v28, %v3929_v45  ;;  %3940 = vst.msk [vmem:[#allocation5 + $0x1a8] sm:$0xff] %vm3426_vm15, %v3929_v45  ;;  %v5890_v48 = vpack.c.bf16 %v4206_v6, %v4204_v12  ;;  %vm4110_vm7 = vcmask 564224  }
 0x630   :  { %v5900_v15 = vpack.c.bf16 %v8721_v46, %v3932_v17 }
 0x631   :  { %v4070_v42 = vpop.permute.xlu0 %4069  ;;  %5891 = vmatprep.subr.bf16.mxu1 %v5890_v48  ;;  %v4149_v48 = vld [vmem:[%s9336_s3 + $0x10] sm:$0xff] }
 0x632   :  { %v8867_v44 = vsel %vm4077_vm3, %v4070_v42, %v4072_v23  ;;  %v3989_v24 = vpop.permute.xlu1 %3988  ;;  %5893 = vmatpush1.bf16.msra.mxu1 %v5892_v40  ;;  %v4221_v46 = vld [vmem:[#allocation5 + $0x1f0] sm:$0xff]  ;;  %v4155_v40 = vld [vmem:[%s9336_s3 + $0x40] sm:$0xff] }
 0x633   :  { %v3992_v51 = vsel %vm3990_vm13, %v3987_v18, %v3989_v24  ;;  %4000 = vst.msk [vmem:[#allocation5 + $0x1d8] sm:$0xff] %vm3426_vm15, %v3989_v24  ;;  %5895 = vmatprep.subr.bf16.mxu1 %v5894_v13  ;;  %v5908_v0 = vpack.c.bf16 %v4221_v46, %v8730_v1 }
 0x634   :  { %v5904_v23 = vpack.c.bf16 %v3992_v51, %v4215_v9 }
 0x635   :  { %v4074_v37 = vpop.permute.xlu0 %4073 }
 0x636   :  { %v4079_v5 = vsel %vm4077_vm3, %v4074_v37, %v4076_v35  ;;  %v4105_v49 = vpop.permute.xlu1 %4104  ;;  %5897 = vmatpush1.bf16.msra.mxu1 %v5896_v58  ;;  %v4212_v27 = vld [vmem:[#allocation5 + $0x1a8] sm:$0xff]  ;;  %vm4709_vm3 = vcmask 812632  }
 0x637   :  { %4086 = vst [vmem:[#allocation5 + $0x220] sm:$0xf] %v4079_v5  ;;  %4118 = vst.msk [vmem:[#allocation5 + $0x228] sm:$0xf0] %vm3461_vm14, %v4105_v49  ;;  %v5898_v63 = vpack.c.bf16 %v4214_v60, %v4212_v27  ;;  %vm4259_vm14 = vcmask 359424  }
 0x639   :  { %v4103_v25 = vpop.permute.xlu0 %4102  ;;  %5899 = vmatprep.subr.bf16.mxu1 %v5898_v63 }
 0x63a   :  { %v4111_v39 = vsel %vm4110_vm7, %v4103_v25, %v4105_v49  ;;  %v4132_v7 = vpop.permute.xlu1 %4131  ;;  %5901 = vmatpush1.bf16.msra.mxu1 %v5900_v15  ;;  %v4218_v54 = vld [vmem:[#allocation5 + $0x1d8] sm:$0xff] }
 0x63b   :  { %4117 = vst [vmem:[#allocation5 + $0x220] sm:$0xf0] %v4111_v39  ;;  %4144 = vst.msk [vmem:[#allocation5 + $0x248] sm:$0xff] %vm3426_vm15, %v4132_v7  ;;  %v5902_v16 = vpack.c.bf16 %v4218_v54, %v4216_v29 }
 0x63d   :  { %v4107_v33 = vpop.permute.xlu0 %4106  ;;  %5903 = vmatprep.subr.bf16.mxu1 %v5902_v16 }
 0x63e   :  { %v4049_v52 = vpop.permute.xlu1 %4048  ;;  %5905 = vmatpush1.bf16.msra.mxu1 %v5904_v23  ;;  %v4228_v35 = vld [vmem:[#allocation5 + $0x228] sm:$0xff] }
 0x63f   :  { %v4052_v28 = vsel %vm4050_vm0, %v4047_v41, %v4049_v52  ;;  %4060 = vst.msk [vmem:[#allocation5 + $0x208] sm:$0xff] %vm3426_vm15, %v4049_v52  ;;  %5907 = vmatprep.subr.bf16.mxu1 %v5906_v61  ;;  %v4156_v41 = vld [vmem:[%s9336_s3 + $0x48] sm:$0xff]  ;;  %vm4740_vm0 = vcmask 175106  }
 0x640   :  { %v5912_v11 = vpack.c.bf16 %v8867_v44, %v4052_v28 }
 0x641   :  { %v4130_v26 = vpop.permute.xlu0 %4129 }
 0x642   :  { %v4137_v30 = vsel %vm3426_vm15, %v4130_v26, %v4132_v7  ;;  %v4109_v34 = vpop.permute.xlu1 %4108  ;;  %5909 = vmatpush1.bf16.msra.mxu1 %v5908_v0  ;;  %v4227_v14 = vld [vmem:[#allocation5 + $0x220] sm:$0xff]  ;;  %v4232_v45 = vld [vmem:[#allocation5 + $0x248] sm:$0xff] }
 0x643   :  { %v4112_v47 = vsel %vm4110_vm7, %v4107_v33, %v4109_v34  ;;  %4120 = vst.msk [vmem:[#allocation5 + $0x238] sm:$0xff] %vm3426_vm15, %v4109_v34  ;;  %vm4723_vm7 = vcmask 1017632  }
 0x644   :  { %v5916_v36 = vpack.c.bf16 %v4112_v47, %v4227_v14  ;;  %v4560_v47 = vld [vmem:[%s9339_s6] sm:$0xff]  ;;  %v4566_v14 = vld [vmem:[%s9339_s6 + $0x30] sm:$0xff] }
 0x645   :  { %v4134_v43 = vpop.permute.xlu0 %4133  ;;  %4343 = vmatmul.mubr.f32.vlgmr.msra.gmra.mrb[4].mxu1 %v4147_v22 }
 0x646   :  { %v4136_v1 = vpop.permute.xlu1 %4135  ;;  %4348 = vmatprep.mubr.f32.mxu1 %v4151_v62  ;;  %v4224_v18 = vld [vmem:[#allocation5 + $0x208] sm:$0xff] }
 0x647   :  { %v4138_v21 = vsel %vm3426_vm15, %v4134_v43, %v4136_v1  ;;  %4146 = vst.msk [vmem:[#allocation5 + $0x258] sm:$0xf] %vm3429_vm8, %v4136_v1  ;;  %v5910_v3 = vpack.c.bf16 %v4226_v10, %v4224_v18  ;;  %vm6344_vm8 = vmmov 1   ;;  %v4561_v62 = vld [vmem:[%s9339_s6 + $0x8] sm:$0xff]  ;;  %v4562_v43 = vld [vmem:[%s9339_s6 + $0x10] sm:$0xff]  ;;  %v4564_v10 = vld [vmem:[%s9339_s6 + $0x20] sm:$0xff] }
 0x648   :  { %4145 = vst [vmem:[#allocation5 + $0x250] sm:$0xf] %v4138_v21  ;;  %vm5919_vm13 = vmpackc.low %vm3439_vm11, %vm6344_vm8  ;;  %v5924_v1 = vpack.c.bf16 %v4561_v62, %v4560_v47  ;;  %v4565_v21 = vld [vmem:[%s9339_s6 + $0x28] sm:$0xff] }
 0x649   :  { %4349 = vmatmul.mubr.f32.gmra.mrb[6].mxu1 %v4150_v4  ;;  %5911 = vmatprep.subr.bf16.mxu1 %v5910_v3  ;;  %v4563_v4 = vld [vmem:[%s9339_s6 + $0x18] sm:$0xff]  ;;  %vm9463_vm11 = vmmov %vm9456_vm9 }
 0x64a   :  { %5913 = vmatpush1.bf16.msra.mxu1 %v5912_v11  ;;  %4354 = vmatprep.mubr.f32.mxu1 %v4154_v55  ;;  %v4230_v20 = vld [vmem:[#allocation5 + $0x238] sm:$0xff]  ;;  %v5928_v18 = vpack.c.bf16 %v4563_v4, %v4562_v43  ;;  %v5932_v11 = vpack.c.bf16 %v4565_v21, %v4564_v10  ;;  %vm4741_vm8 = vmor %vm4740_vm0, %vm4739_vm6  ;;  %vm4889_vm6 = vcmask 1042360   ;;  %vm4890_vm0 = vcmask 125954  }
 0x64b   :  { %v5914_v32 = vpack.c.bf16 %v4230_v20, %v4228_v35  ;;  %v4568_v20 = vld [vmem:[%s9339_s6 + $0x40] sm:$0xff] }
 0x64d   :  { %4355 = vmatmul.mubr.f32.gmra.mrb[8].mxu1 %v4153_v2  ;;  %5915 = vmatprep.subr.bf16.mxu1 %v5914_v32  ;;  %v4567_v2 = vld [vmem:[%s9339_s6 + $0x38] sm:$0xff]  ;;  %v4569_v32 = vld [vmem:[%s9339_s6 + $0x48] sm:$0xff] }
 0x64e   :  { %5917 = vmatpush1.bf16.msra.mxu1 %v5916_v36  ;;  %4360 = vmatprep.mubr.f32.mxu1 %v4157_v50  ;;  %v4234_v12 = vld [vmem:[#allocation5 + $0x258] sm:$0xf]  ;;  %v5936_v35 = vpack.c.bf16 %v4567_v2, %v4566_v14  ;;  %v5940_v50 = vpack.c.bf16 %v4569_v32, %v4568_v20  ;;  %v4570_v36 = vld [vmem:[%s9339_s6 + $0x50] sm:$0xff]  ;;  %v4910_v20 = vld [vmem:[%s9340_s7 + $0x80] sm:$0xff] }
 0x64f   :  { %v5918_v6 = vpack.c.bf16 %v4234_v12, %v4232_v45  ;;  %v4233_v31 = vld [vmem:[#allocation5 + $0x250] sm:$0xf]  ;;  %v4572_v12 = vld [vmem:[%s9339_s6 + $0x60] sm:$0xff]  ;;  %v4911_v32 = vld [vmem:[%s9340_s7 + $0x88] sm:$0xff] }
 0x650   :  { %v5921_v17 = vpack.c.bf16 %v4233_v31, %v4137_v30 }
 0x651   :  { %4361 = vmatmul.mubr.f32.gmra.mrb[10].mxu1 %v4156_v41  ;;  %5920 = vmatprep.subr.msk.bf16.mxu1 %vm5919_vm13, %v5918_v6  ;;  %v4571_v41 = vld [vmem:[%s9339_s6 + $0x58] sm:$0xff]  ;;  %v4573_v6 = vld [vmem:[%s9339_s6 + $0x68] sm:$0xff] }
 0x652   :  { %5923 = vmatpush1.bf16.msk.msra.mxu1 %vm5919_vm13, %v5921_v17  ;;  %4431 = vmatprep.mubr.f32.mxu1 %v6323_v19  ;;  %v5944_v45 = vpack.c.bf16 %v4571_v41, %v4570_v36  ;;  %v5948_v31 = vpack.c.bf16 %v4573_v6, %v4572_v12  ;;  %v5956_v36 = vpack.c.bf16 %v4911_v32, %v4910_v20  ;;  %v4895_v41 = vld [vmem:[%s9340_s7 + $0x8] sm:$0xff]  ;;  %v4908_v20 = vld [vmem:[%s9340_s7 + $0x70] sm:$0xff]  ;;  %v4909_v32 = vld [vmem:[%s9340_s7 + $0x78] sm:$0xff]  ;;  %vm4755_vm13 = vcmask 378032  }
 0x653   :  { %5925 = vmatprep.subr.bf16.mxu1 %v5924_v1 }
 0x655   :  { %5354 = vmatmul.mubr.msk.f32.vlgmr.msra.gmra.mrb[4].mxu1 %vm4259_vm14, %v4149_v48 }
 0x656   :  { %4437 = vmatprep.mubr.f32.mxu1 %v6323_v19  ;;  %v4242_v42 = vpop.permute.xlu0 %4241  ;;  %5927 = vmatpush3.bf16.msra.mxu1 %v5924_v1 }
 0x657   :  { %v4247_v58 = vpop.permute.xlu1 %4246  ;;  %5929 = vmatprep.subr.bf16.mxu1 %v5928_v18 }
 0x659   :  { %5355 = vmatmul.mubr.msk.f32.gmra.mrb[6].mxu1 %vm4259_vm14, %v4152_v53 }
 0x65a   :  { %4443 = vmatprep.mubr.f32.mxu1 %v6323_v19  ;;  %v4252_v15 = vpop.permute.xlu0 %4251  ;;  %5931 = vmatpush3.bf16.msra.mxu1 %v5928_v18 }
 0x65b   :  { %v4257_v16 = vpop.permute.xlu1 %4256  ;;  %5933 = vmatprep.subr.bf16.mxu1 %v5932_v11 }
 0x65d   :  { %5356 = vmatmul.mubr.msk.f32.gmra.mrb[8].mxu1 %vm4259_vm14, %v4155_v40  ;;  %v4574_v40 = vld [vmem:[%s9339_s6 + $0x70] sm:$0xff] }
 0x65e   :  { %4449 = vmatprep.mubr.f32.mxu1 %v6323_v19  ;;  %5935 = vmatpush3.bf16.msra.mxu1 %v5932_v11 }
 0x65f   :  { %5937 = vmatprep.subr.bf16.mxu1 %v5936_v35 }
 0x661   :  { %5357 = vmatmul.mubr.msk.f32.gmra.mrb[10].mxu1 %vm4259_vm14, %v4158_v59  ;;  %v4575_v59 = vld [vmem:[%s9339_s6 + $0x78] sm:$0xff]  ;;  %vm4769_vm14 = vcmask 583032  }
 0x662   :  { %5939 = vmatpush3.bf16.msra.mxu1 %v5936_v35 }
 0x663   :  { %5941 = vmatprep.subr.bf16.mxu1 %v5940_v50 }
 0x666   :  { %5943 = vmatpush3.bf16.msra.mxu1 %v5940_v50  ;;  %v4894_v50 = vld [vmem:[%s9340_s7] sm:$0xff] }
 0x667   :  { %5945 = vmatprep.subr.bf16.mxu1 %v5944_v45 }
 0x66a   :  { %5947 = vmatpush3.bf16.msra.mxu1 %v5944_v45  ;;  %v5958_v45 = vpack.c.bf16 %v4895_v41, %v4894_v50  ;;  %v5986_v50 = vpack.c.bf16 %v4909_v32, %v4908_v20  ;;  %v6354_v41 = vmov 0.0|0.0   ;;  %v5118_v20 = vld [vmem:[%s9342_s9 + $0x18] sm:$0xff] }
 0x66b   :  { %5949 = vmatprep.subr.bf16.mxu1 %v5948_v31 }
 0x66e   :  { %5951 = vmatpush3.bf16.msra.mxu1 %v5948_v31 }
 0x728   :  { %v4433_v13 = vpop.f32.mrb[4].mxu1 }
 0x729   :  { %v8924_v57 = vadd.f32 %v4433_v13, %v4242_v42  ;;  %v4435_v44 = vpop.f32.mrb[5].mxu1 }
 0x72a   :  { %v6064_v24 = vadd.f32 %v4435_v44, %v4242_v42  ;;  %v5952_v44 = vpack.c.bf16 %v4575_v59, %v4574_v40  ;;  %v4912_v40 = vld [vmem:[%s9340_s7 + $0x90] sm:$0xff]  ;;  %v4913_v59 = vld [vmem:[%s9340_s7 + $0x98] sm:$0xff] }
 0x72b   :  { %v4456_v51 = vmax.f32 %v8924_v57, 0.0 }
 0x72c   :  { %v4457_v37 = vmax.f32 %v6064_v24, 0.0  ;;  %v4439_v5 = vpop.f32.mrb[6].mxu1  ;;  %5953 = vmatprep.subr.bf16.mxu1 %v5952_v44 }
 0x72d   :  { %v8927_v49 = vadd.f32 %v4439_v5, %v4247_v58  ;;  %v4441_v27 = vpop.f32.mrb[7].mxu1  ;;  %5955 = vmatpush3.bf16.msra.mxu1 %v5952_v44  ;;  %v4896_v44 = vld [vmem:[%s9340_s7 + $0x10] sm:$0xff] }
 0x72e   :  { %4465 = vst.msk [vmem:[#allocation6 + $0x8] sm:$0xff] %vm3426_vm15, %v4457_v37  ;;  %v6066_v60 = vadd.f32 %v4441_v27, %v4247_v58  ;;  %5957 = vmatprep.subr.bf16.mxu1 %v5956_v36 }
 0x72f   :  { %v4458_v63 = vmax.f32 %v8927_v49, 0.0 }
 0x730   :  { %v4459_v25 = vmax.f32 %v6066_v60, 0.0  ;;  %v4445_v39 = vpop.f32.mrb[8].mxu1 }
 0x731   :  { %v8931_v7 = vadd.f32 %v4445_v39, %v4252_v15  ;;  %v4447_v29 = vpop.f32.mrb[9].mxu1 }
 0x732   :  { %4467 = vst.msk [vmem:[#allocation6 + $0x18] sm:$0xff] %vm3426_vm15, %v4459_v25  ;;  %v6068_v54 = vadd.f32 %v4447_v29, %v4252_v15 }
 0x733   :  { %v4460_v38 = vmax.f32 %v8931_v7, 0.0 }
 0x734   :  { %v4461_v9 = vmax.f32 %v6068_v54, 0.0  ;;  %v4451_v23 = vpop.f32.mrb[10].mxu1 }
 0x735   :  { %v8935_v56 = vadd.f32 %v4451_v23, %v4257_v16  ;;  %v4453_v33 = vpop.f32.mrb[11].mxu1  ;;  %v4476_v61 = vld [vmem:[#allocation6 + $0x8] sm:$0xff] }
 0x736   :  { %4469 = vst.msk [vmem:[#allocation6 + $0x28] sm:$0xff] %vm3426_vm15, %v4461_v9  ;;  %v6070_v46 = vadd.f32 %v4453_v33, %v4257_v16  ;;  %v6217_v52 = vpack.i.bf16 %v4476_v61, %v4456_v51 }
 0x737   :  { %v4462_v28 = vmax.f32 %v8935_v56, 0.0 }
 0x738   :  { %v4463_v0 = vmax.f32 %v6070_v46, 0.0  ;;  %6218 = vrot.lane.b32.xlu0 %v6217_v52, %s6305_s30 }
 0x739   :  { %v4477_v26 = vld [vmem:[#allocation6 + $0x18] sm:$0xff] }
 0x73a   :  { %4471 = vst.msk [vmem:[#allocation6 + $0x38] sm:$0xff] %vm3426_vm15, %v4463_v0  ;;  %v6222_v30 = vpack.i.bf16 %v4477_v26, %v4458_v63  ;;  %vm9462_vm15 = vmmov %vm9456_vm9 }
 0x73c   :  { %6223 = vrot.lane.b32.xlu1 %v6222_v30, %s6305_s30 }
 0x73d   :  { %v8946_v34 = vld [vmem:[#allocation6 + $0x28] sm:$0xff] }
 0x73e   :  { %v6227_v22 = vpack.i.bf16 %v8946_v34, %v4460_v38 }
 0x740   :  { %6228 = vrot.lane.b32.xlu0 %v6227_v22, %s6305_s30 }
 0x741   :  { %v4479_v3 = vld [vmem:[#allocation6 + $0x38] sm:$0xff] }
 0x742   :  { %v6232_v55 = vpack.i.bf16 %v4479_v3, %v4462_v28 }
 0x744   :  { %6233 = vrot.lane.b32.xlu1 %v6232_v55, %s6305_s30 }
 0x7aa   :  { %v6219_v17 = vpop.permute.xlu0 %6218 }
 0x7ab   :  { %v6221_v48 = vunpack.i.h.bf16 %v6219_v17  ;;  %v6220_v53 = vunpack.i.l.bf16 %v6219_v17 }
 0x7ad   :  { %v4520_v42 = vmax.f32 %v4476_v61, %v6221_v48  ;;  %v4504_v13 = vsel %vm165_vm2, %v6220_v53, %v6221_v48 }
 0x7ae   :  { %v4512_v24 = vmax.f32 %v4456_v51, %v4504_v13  ;;  %v6224_v58 = vpop.permute.xlu1 %6223  ;;  %v5960_v13 = vpack.c.bf16 %v4913_v59, %v4912_v40 }
 0x7af   :  { %v6226_v37 = vunpack.i.h.bf16 %v6224_v58  ;;  %v6225_v5 = vunpack.i.l.bf16 %v6224_v58 }
 0x7b0   :  { %v6237_v27 = vpack.i.bf16 %v4520_v42, %v4512_v24 }
 0x7b1   :  { %v4521_v60 = vmax.f32 %v4477_v26, %v6226_v37  ;;  %v4505_v15 = vsel %vm165_vm2, %v6225_v5, %v6226_v37  ;;  %v4914_v37 = vld [vmem:[%s9340_s7 + $0xa0] sm:$0xff]  ;;  %v4915_v5 = vld [vmem:[%s9340_s7 + $0xa8] sm:$0xff] }
 0x7b2   :  { %v4513_v25 = vmax.f32 %v4458_v63, %v4505_v15  ;;  %v6229_v39 = vpop.permute.xlu0 %6228  ;;  %6238 = vrot.lane.b32.xlu0 %v6237_v27, %s6332_s18  ;;  %v4898_v27 = vld [vmem:[%s9340_s7 + $0x20] sm:$0xff]  ;;  %v5964_v15 = vpack.c.bf16 %v4915_v5, %v4914_v37 }
 0x7b3   :  { %v6231_v29 = vunpack.i.h.bf16 %v6229_v39  ;;  %v6230_v54 = vunpack.i.l.bf16 %v6229_v39 }
 0x7b4   :  { %v6242_v16 = vpack.i.bf16 %v4521_v60, %v4513_v25 }
 0x7b5   :  { %v4522_v57 = vmax.f32 %v8946_v34, %v6231_v29  ;;  %v4506_v51 = vsel %vm165_vm2, %v6230_v54, %v6231_v29  ;;  %v4916_v54 = vld [vmem:[%s9340_s7 + $0xb0] sm:$0xff] }
 0x7b6   :  { %v4514_v9 = vmax.f32 %v4460_v38, %v4506_v51  ;;  %v6234_v23 = vpop.permute.xlu1 %6233  ;;  %6243 = vrot.lane.b32.xlu1 %v6242_v16, %s6332_s18  ;;  %v4917_v16 = vld [vmem:[%s9340_s7 + $0xb8] sm:$0xff] }
 0x7b7   :  { %v6236_v33 = vunpack.i.h.bf16 %v6234_v23  ;;  %v6235_v61 = vunpack.i.l.bf16 %v6234_v23  ;;  %v4901_v23 = vld [vmem:[%s9340_s7 + $0x38] sm:$0xff] }
 0x7b8   :  { %v6247_v49 = vpack.i.bf16 %v4522_v57, %v4514_v9  ;;  %v4900_v57 = vld [vmem:[%s9340_s7 + $0x30] sm:$0xff] }
 0x7b9   :  { %v4523_v63 = vmax.f32 %v4479_v3, %v6236_v33  ;;  %v4507_v46 = vsel %vm165_vm2, %v6235_v61, %v6236_v33  ;;  %vm9464_vm2 = vmmov %vm9456_vm9  ;;  %v5970_v61 = vpack.c.bf16 %v4901_v23, %v4900_v57 }
 0x7ba   :  { %v4515_v52 = vmax.f32 %v4462_v28, %v4507_v46  ;;  %6248 = vrot.lane.b32.xlu0 %v6247_v49, %s6332_s18  ;;  %vm9465_vm9 = vmmov %vm9464_vm2  ;;  %v4918_v49 = vld [vmem:[%s9340_s7 + $0xc0] sm:$0xff] }
 0x7bb   :  { %v4902_v46 = vld [vmem:[%s9340_s7 + $0x40] sm:$0xff] }
 0x7bc   :  { %v6252_v0 = vpack.i.bf16 %v4523_v63, %v4515_v52  ;;  %v4919_v63 = vld [vmem:[%s9340_s7 + $0xc8] sm:$0xff] }
 0x7be   :  { %6253 = vrot.lane.b32.xlu1 %v6252_v0, %s6332_s18  ;;  %v5972_v0 = vpack.c.bf16 %v4919_v63, %v4918_v49  ;;  %v4929_v49 = vld [vmem:[%s9340_s7 + $0x118] sm:$0xff] }
 0x824   :  { %v6239_v26 = vpop.permute.xlu0 %6238 }
 0x825   :  { %v6241_v7 = vunpack.i.h.bf16 %v6239_v26  ;;  %v6240_v38 = vunpack.i.l.bf16 %v6239_v26  ;;  %v4903_v26 = vld [vmem:[%s9340_s7 + $0x48] sm:$0xff] }
 0x827   :  { %v4548_v30 = vsel %vm9462_vm15, %v6240_v38, %v6241_v7  ;;  %v5974_v38 = vpack.c.bf16 %v4903_v26, %v4902_v46  ;;  %vm4814_vm15 = vcmask 1042384   ;;  %v4932_v26 = vld [vmem:[%s9340_s7 + $0x130] sm:$0xff] }
 0x828   :  { %v6244_v34 = vpop.permute.xlu1 %6243  ;;  %v4556_v22 = vmax.f32 %v4512_v24, %v4548_v30  ;;  %v4897_v24 = vld [vmem:[%s9340_s7 + $0x18] sm:$0xff]  ;;  %v4920_v30 = vld [vmem:[%s9340_s7 + $0xd0] sm:$0xff] }
 0x829   :  { %v6246_v47 = vunpack.i.h.bf16 %v6244_v34  ;;  %v6245_v62 = vunpack.i.l.bf16 %v6244_v34  ;;  %v5962_v58 = vpack.c.bf16 %v4897_v24, %v4896_v44  ;;  %v4921_v34 = vld [vmem:[%s9340_s7 + $0xd8] sm:$0xff] }
 0x82a   :  { %5498 = vmatprep.mubr.f32.mxu1 %v4556_v22  ;;  %v5976_v22 = vpack.c.bf16 %v4921_v34, %v4920_v30  ;;  %v4934_v30 = vld [vmem:[%s9340_s7 + $0x140] sm:$0xff]  ;;  %v4935_v34 = vld [vmem:[%s9340_s7 + $0x148] sm:$0xff] }
 0x82b   :  { %v4549_v43 = vsel %vm9463_vm11, %v6245_v62, %v6246_v47  ;;  %v4904_v47 = vld [vmem:[%s9340_s7 + $0x50] sm:$0xff]  ;;  %v4905_v62 = vld [vmem:[%s9340_s7 + $0x58] sm:$0xff]  ;;  %vm4815_vm11 = vcmask 150530  }
 0x82c   :  { %v4557_v1 = vmax.f32 %v4513_v25, %v4549_v43  ;;  %v6249_v56 = vpop.permute.xlu0 %6248  ;;  %v4899_v25 = vld [vmem:[%s9340_s7 + $0x28] sm:$0xff]  ;;  %v4922_v43 = vld [vmem:[%s9340_s7 + $0xe0] sm:$0xff] }
 0x82d   :  { %v6251_v28 = vunpack.i.h.bf16 %v6249_v56  ;;  %v6250_v4 = vunpack.i.l.bf16 %v6249_v56  ;;  %v5966_v29 = vpack.c.bf16 %v4899_v25, %v4898_v27  ;;  %v5978_v56 = vpack.c.bf16 %v4905_v62, %v4904_v47  ;;  %v4936_v47 = vld [vmem:[%s9340_s7 + $0x150] sm:$0xff]  ;;  %v4937_v62 = vld [vmem:[%s9340_s7 + $0x158] sm:$0xff] }
 0x82e   :  { %5499 = vmatmul.mubr.f32.vlgmr.msra.gmra.mrb[12].mxu1 %v4557_v1 }
 0x82f   :  { %v4550_v18 = vsel %vm9464_vm2, %v6250_v4, %v6251_v28  ;;  %5959 = vmatpush3.bf16.msra.mxu1 %v5958_v45  ;;  %v4923_v28 = vld [vmem:[%s9340_s7 + $0xe8] sm:$0xff]  ;;  %vm4783_vm2 = vcmask 788032  }
 0x830   :  { %v6254_v10 = vpop.permute.xlu1 %6253  ;;  %v4558_v21 = vmax.f32 %v4514_v9, %v4550_v18  ;;  %5961 = vmatprep.subr.bf16.mxu1 %v5960_v13  ;;  %v5968_v9 = vpack.c.bf16 %v4917_v16, %v4916_v54  ;;  %v5980_v18 = vpack.c.bf16 %v4923_v28, %v4922_v43  ;;  %v4926_v54 = vld [vmem:[%s9340_s7 + $0x100] sm:$0xff]  ;;  %v4927_v16 = vld [vmem:[%s9340_s7 + $0x108] sm:$0xff]  ;;  %v6004_v43 = vpack.c.bf16 %v4937_v62, %v4936_v47 }
 0x831   :  { %v6256_v3 = vunpack.i.h.bf16 %v6254_v10  ;;  %v6255_v55 = vunpack.i.l.bf16 %v6254_v10  ;;  %v4906_v10 = vld [vmem:[%s9340_s7 + $0x60] sm:$0xff]  ;;  %v5989_v23 = vpack.c.bf16 %v4927_v16, %v4926_v54  ;;  %v5221_v47 = vld [vmem:[%s9344_s11 + $0x68] sm:$0xff] }
 0x832   :  { %5501 = vmatprep.mubr.f32.mxu1 %v4558_v21  ;;  %v4907_v21 = vld [vmem:[%s9340_s7 + $0x68] sm:$0xff] }
 0x833   :  { %v4551_v11 = vsel %vm9465_vm9, %v6255_v55, %v6256_v3  ;;  %5963 = vmatpush3.bf16.msra.mxu1 %v5962_v58  ;;  %v4924_v3 = vld [vmem:[%s9340_s7 + $0xf0] sm:$0xff]  ;;  %v4925_v55 = vld [vmem:[%s9340_s7 + $0xf8] sm:$0xff]  ;;  %vm4811_vm9 = vcmask 998400  }
 0x834   :  { %v4559_v14 = vmax.f32 %v4515_v52, %v4551_v11  ;;  %5965 = vmatprep.subr.bf16.mxu1 %v5964_v15 }
 0x836   :  { %5502 = vmatmul.mubr.f32.gmra.mrb[14].mxu1 %v4559_v14  ;;  %v5982_v14 = vpack.c.bf16 %v4907_v21, %v4906_v10  ;;  %v4942_v21 = vld [vmem:[%s9340_s7 + $0x180] sm:$0xff] }
 0x837   :  { %5967 = vmatpush3.bf16.msra.mxu1 %v5966_v29 }
 0x838   :  { %5969 = vmatprep.subr.bf16.mxu1 %v5968_v9 }
 0x83b   :  { %5971 = vmatpush3.bf16.msra.mxu1 %v5970_v61  ;;  %v4928_v61 = vld [vmem:[%s9340_s7 + $0x110] sm:$0xff] }
 0x83c   :  { %5973 = vmatprep.subr.bf16.mxu1 %v5972_v0  ;;  %v5992_v46 = vpack.c.bf16 %v4929_v49, %v4928_v61  ;;  %v5212_v49 = vld [vmem:[%s9344_s11 + $0x20] sm:$0xff] }
 0x83f   :  { %5975 = vmatpush3.bf16.msra.mxu1 %v5974_v38 }
 0x840   :  { %5977 = vmatprep.subr.bf16.mxu1 %v5976_v22  ;;  %v6001_v22 = vpack.c.bf16 %v4935_v34, %v4934_v30  ;;  %v5219_v30 = vld [vmem:[%s9344_s11 + $0x58] sm:$0xff] }
 0x843   :  { %5979 = vmatpush3.bf16.msra.mxu1 %v5978_v56  ;;  %v4939_v56 = vld [vmem:[%s9340_s7 + $0x168] sm:$0xff] }
 0x844   :  { %5981 = vmatprep.subr.bf16.mxu1 %v5980_v18  ;;  %v4941_v18 = vld [vmem:[%s9340_s7 + $0x178] sm:$0xff] }
 0x847   :  { %5983 = vmatpush3.bf16.msra.mxu1 %v5982_v14  ;;  %v5116_v14 = vld [vmem:[%s9342_s9 + $0x8] sm:$0xff] }
 0x901   :  { %v5500_v2 = vpop.f32.mrb[12].mxu1 }
 0x902   :  { %4663 = vst.msk [vmem:[#allocation7 + $0x8] sm:$0xff] %vm4661_vm5, %v5500_v2  ;;  %v4642_v35 = vpop.f32.mrb[13].mxu1 }
 0x903   :  { %4662 = vst.msk [vmem:[#allocation7] sm:$0xff] %vm4661_vm5, %v4642_v35  ;;  %v5984_v35 = vpack.c.bf16 %v4925_v55, %v4924_v3  ;;  %v4943_v3 = vld [vmem:[%s9340_s7 + $0x188] sm:$0xff] }
 0x904   :  { %v6013_v55 = vpack.c.bf16 %v4943_v3, %v4942_v21 }
 0x905   :  { %5985 = vmatprep.subr.bf16.mxu1 %v5984_v35 }
 0x906   :  { %5987 = vmatpush3.bf16.msra.mxu1 %v5986_v50  ;;  %v5119_v50 = vld [vmem:[%s9342_s9 + $0x20] sm:$0xff] }
 0x907   :  { %5988 = vmatprep.subr.bf16.mxu1 %v6354_v41 }
 0x909   :  { %v5503_v12 = vpop.f32.mrb[14].mxu1  ;;  %v5363_v6 = vld.sshfl [vmem:[#allocation7 + $0xc] sm:$0x3 pattern:$0x76325410] }
 0x90a   :  { %4665 = vst.msk [vmem:[#allocation7 + $0x18] sm:$0xff] %vm4661_vm5, %v5503_v12  ;;  %4752 = vrot.lane.b32.xlu1 %v5363_v6, %s6345_s28  ;;  %v5362_v31 = vld.sshfl [vmem:[#allocation7 + $0xa] sm:$0x3 pattern:$0x76325410]  ;;  %v4652_v17 = vpop.f32.mrb[15].mxu1 }
 0x90b   :  { %4734 = vrot.lane.b32.xlu0 %v5362_v31, %s6306_s14  ;;  %4664 = vst.msk [vmem:[#allocation7 + $0x10] sm:$0xff] %vm4661_vm5, %v4652_v17  ;;  %v4666_v48 = vld [vmem:[#allocation7] sm:$0x3]  ;;  %s6349_s14 = smov 44   ;;  %vm4797_vm5 = vcmask 993032  }
 0x90c   :  { %4668 = vst.msk [vmem:[#allocation8] sm:$0x3] %vm4667_vm10, %v4666_v48  ;;  %v5359_v53 = vld.sshfl [vmem:[#allocation7 + $0x4] sm:$0x3 pattern:$0x76325410]  ;;  %vm4816_vm10 = vmor %vm4815_vm11, %vm4814_vm15 }
 0x90d   :  { %v5361_v42 = vld.sshfl [vmem:[#allocation7 + $0x8] sm:$0x3 pattern:$0x76325410]  ;;  %vm5301_vm15 = vcmask 74752  }
 0x90e   :  { %4692 = vrot.lane.b32.xlu1 %v5359_v53, %s6346_s1  ;;  %v5360_v60 = vld.sshfl [vmem:[#allocation7 + $0x6] sm:$0x3 pattern:$0x76325410]  ;;  %s5309_s1 = sshll.u32 %s6356_s5, 4  ;;  %s5310_s1 = int_to_ptr.vmem [resolvable:$true] %s5309_s1 }
 0x90f   :  { %4720 = vrot.lane.b32.xlu0 %v5361_v42, %s6327_s25  ;;  %v5364_v39 = vld.sshfl [vmem:[#allocation7 + $0xe] sm:$0x3 pattern:$0x76325410]  ;;  %s6347_s25 = smov 75   ;;  %p6284_p1 = scmp.lt.s32.totalorder %s5310_s1, %s5310_s1 }
 0x910   :  { %v5358_v33 = vld.sshfl [vmem:[#allocation7 + $0x2] sm:$0x3 pattern:$0x76325410] }
 0x911   :  { %v5369_v51 = vld.sshfl [vmem:[#allocation7 + $0x18] sm:$0x3 pattern:$0x76325410] }
 0x912   :  { %4706 = vrot.lane.b32.xlu1 %v5360_v60, %s6347_s25  ;;  %v5367_v52 = vld.sshfl [vmem:[#allocation7 + $0x14] sm:$0x3 pattern:$0x76325410]  ;;  %s6351_s25 = smov 122  }
 0x913   :  { %4766 = vrot.lane.b32.xlu0 %v5364_v39, %s6348_s22  ;;  %v5372_v7 = vld.sshfl [vmem:[#allocation7 + $0x1e] sm:$0x3 pattern:$0x76325410]  ;;  %s6352_s22 = smov 119  }
 0x914   :  { %v5366_v1 = vld.sshfl [vmem:[#allocation7 + $0x12] sm:$0x3 pattern:$0x76325410] }
 0x915   :  { %v5365_v4 = vld.sshfl [vmem:[#allocation7 + $0x10] sm:$0x3 pattern:$0x76325410] }
 0x916   :  { %4841 = vrot.lane.b32.xlu1 %v5369_v51, %s6349_s14  ;;  %v5370_v11 = vld.sshfl [vmem:[#allocation7 + $0x1a] sm:$0x3 pattern:$0x76325410] }
 0x917   :  { %4678 = vrot.lane.b32.xlu0 %v5358_v33, %s6350_s19  ;;  %v5368_v2 = vld.sshfl [vmem:[#allocation7 + $0x16] sm:$0x3 pattern:$0x76325410] }
 0x918   :  { %v5371_v36 = vld.sshfl [vmem:[#allocation7 + $0x1c] sm:$0x3 pattern:$0x76325410] }
 0x91a   :  { %4808 = vrot.lane.b32.xlu1 %v5367_v52, %s6351_s25  ;;  %v4931_v52 = vld [vmem:[%s9340_s7 + $0x128] sm:$0xff] }
 0x91b   :  { %4883 = vrot.lane.b32.xlu0 %v5372_v7, %s6352_s22  ;;  %v4933_v7 = vld [vmem:[%s9340_s7 + $0x138] sm:$0xff] }
 0x91c   :  { %v5998_v38 = vpack.c.bf16 %v4933_v7, %v4932_v26  ;;  %v5217_v26 = vld [vmem:[%s9344_s11 + $0x48] sm:$0xff] }
 0x91e   :  { %4794 = vrot.lane.b32.xlu1 %v5366_v1, %s6336_s2  ;;  %v4938_v1 = vld [vmem:[%s9340_s7 + $0x160] sm:$0xff] }
 0x91f   :  { %4780 = vrot.lane.b32.xlu0 %v5365_v4, %s6331_s24  ;;  %v6007_v28 = vpack.c.bf16 %v4939_v56, %v4938_v1  ;;  %v4940_v4 = vld [vmem:[%s9340_s7 + $0x170] sm:$0xff]  ;;  %v5223_v1 = vld [vmem:[%s9344_s11 + $0x78] sm:$0xff] }
 0x920   :  { %v6010_v10 = vpack.c.bf16 %v4941_v18, %v4940_v4 }
 0x922   :  { %4855 = vrot.lane.b32.xlu1 %v5370_v11, %s6342_s0  ;;  %v5115_v11 = vld [vmem:[%s9342_s9] sm:$0xff] }
 0x923   :  { %4827 = vrot.lane.b32.xlu0 %v5368_v2, %s6353_s29  ;;  %v5117_v2 = vld [vmem:[%s9342_s9 + $0x10] sm:$0xff]  ;;  %v6016_v35 = vpack.c.bf16 %v5116_v14, %v5115_v11 }
 0x924   :  { %v6019_v32 = vpack.c.bf16 %v5118_v20, %v5117_v2 }
 0x927   :  { %4869 = vrot.lane.b32.xlu0 %v5371_v36, %s9408_s17  ;;  %v5120_v36 = vld [vmem:[%s9342_s9 + $0x28] sm:$0xff] }
 0x97c   :  { %v4753_v45 = vpop.permute.xlu1 %4752 }
 0x97d   :  { %v4735_v12 = vpop.permute.xlu0 %4734 }
 0x97e   :  { %v4736_v40 = vrot.slane %v4735_v12, 6 }
 0x980   :  { %v4693_v6 = vpop.permute.xlu1 %4692  ;;  %v4737_v13 = vsel %vm348_vm1, %v4736_v40, %v4735_v12  ;;  %vm4844_vm1 = vcmask 558432   ;;  %v5121_v12 = vld [vmem:[%s9342_s9 + $0x30] sm:$0xff] }
 0x981   :  { %v4721_v31 = vpop.permute.xlu0 %4720  ;;  %v5125_v40 = vld [vmem:[%s9342_s9 + $0x50] sm:$0xff] }
 0x984   :  { %v4707_v17 = vpop.permute.xlu1 %4706 }
 0x985   :  { %v4767_v48 = vpop.permute.xlu0 %4766 }
 0x988   :  { %v4842_v53 = vpop.permute.xlu1 %4841 }
 0x989   :  { %v4679_v59 = vpop.permute.xlu0 %4678 }
 0x98a   :  { %4682 = vst.msk [vmem:[#allocation8] sm:$0x3] %vm4681_vm4, %v4679_v59  ;;  %vm4830_vm4 = vcmask 353432   ;;  %v5126_v59 = vld [vmem:[%s9342_s9 + $0x58] sm:$0xff] }
 0x98b   :  { %4696 = vst.msk [vmem:[#allocation8] sm:$0x3] %vm4695_vm12, %v4693_v6  ;;  %vm4858_vm12 = vcmask 763432   ;;  %v5122_v6 = vld [vmem:[%s9342_s9 + $0x38] sm:$0xff] }
 0x98c   :  { %4710 = vst.msk [vmem:[#allocation8] sm:$0x3] %vm4709_vm3, %v4707_v17  ;;  %v4809_v42 = vpop.permute.xlu1 %4808  ;;  %vm4886_vm3 = vcmask 973824   ;;  %v5123_v17 = vld [vmem:[%s9342_s9 + $0x40] sm:$0xff] }
 0x98d   :  { %4724 = vst.msk [vmem:[#allocation8] sm:$0x3] %vm4723_vm7, %v4721_v31  ;;  %v4884_v44 = vpop.permute.xlu0 %4883  ;;  %v4810_v24 = vrot.slane %v4809_v42, 6  ;;  %vm4872_vm7 = vcmask 968432   ;;  %v6025_v31 = vpack.c.bf16 %v5122_v6, %v5121_v12 }
 0x98e   :  { %4742 = vst.msk [vmem:[#allocation8] sm:$0xf] %vm4741_vm8, %v4737_v13  ;;  %v4885_v60 = vrot.slane %v4884_v44, 6  ;;  %vm4891_vm8 = vmor %vm4890_vm0, %vm4889_vm6  ;;  %v5127_v13 = vld [vmem:[%s9342_s9 + $0x60] sm:$0xff] }
 0x98f   :  { %4756 = vst.msk [vmem:[#allocation8 + $0x2] sm:$0x3] %vm4755_vm13, %v4753_v45  ;;  %v4812_v5 = vsel %vm4811_vm9, %v4810_v24, %v4809_v42  ;;  %vm4972_vm13 = vcmask 130048   ;;  %v6022_v45 = vpack.c.bf16 %v5120_v36, %v5119_v50  ;;  %v6031_v42 = vpack.c.bf16 %v5126_v59, %v5125_v40 }
 0x990   :  { %v4795_v58 = vpop.permute.xlu1 %4794  ;;  %4770 = vst.msk [vmem:[#allocation8 + $0x2] sm:$0x3] %vm4769_vm14, %v4767_v48  ;;  %v4887_v39 = vsel %vm4886_vm3, %v4885_v60, %v4884_v44  ;;  %v5124_v48 = vld [vmem:[%s9342_s9 + $0x48] sm:$0xff]  ;;  %vm6355_vm14 = vmmov 0  }
 0x991   :  { %v4781_v37 = vpop.permute.xlu0 %4780  ;;  %v5128_v44 = vld [vmem:[%s9342_s9 + $0x68] sm:$0xff] }
 0x992   :  { %4784 = vst.msk [vmem:[#allocation8 + $0x2] sm:$0x3] %vm4783_vm2, %v4781_v37  ;;  %v6034_v24 = vpack.c.bf16 %v5128_v44, %v5127_v13  ;;  %v5130_v37 = vld [vmem:[%s9342_s9 + $0x78] sm:$0xff] }
 0x993   :  { %4798 = vst.msk [vmem:[#allocation8 + $0x2] sm:$0x3] %vm4797_vm5, %v4795_v58  ;;  %v5129_v58 = vld [vmem:[%s9342_s9 + $0x70] sm:$0xff] }
 0x994   :  { %4817 = vst.msk [vmem:[#allocation8 + $0x2] sm:$0xf] %vm4816_vm10, %v4812_v5  ;;  %v4856_v15 = vpop.permute.xlu1 %4855  ;;  %v6037_v5 = vpack.c.bf16 %v5130_v37, %v5129_v58 }
 0x995   :  { %v4828_v27 = vpop.permute.xlu0 %4827 }
 0x996   :  { %4831 = vst.msk [vmem:[#allocation8 + $0x4] sm:$0x3] %vm4830_vm4, %v4828_v27 }
 0x997   :  { %4845 = vst.msk [vmem:[#allocation8 + $0x4] sm:$0x3] %vm4844_vm1, %v4842_v53  ;;  %v6028_v53 = vpack.c.bf16 %v5124_v48, %v5123_v17 }
 0x998   :  { %4859 = vst.msk [vmem:[#allocation8 + $0x4] sm:$0x3] %vm4858_vm12, %v4856_v15 }
 0x999   :  { %v4870_v25 = vpop.permute.xlu0 %4869 }
 0x99a   :  { %4873 = vst.msk [vmem:[#allocation8 + $0x4] sm:$0x3] %vm4872_vm7, %v4870_v25  ;;  %v5373_v25 = vld [vmem:[%s9341_s8] ss:$0 sm:$0xff] }
 0x99b   :  { %4892 = vst.msk [vmem:[#allocation8 + $0x4] sm:$0xf] %vm4891_vm8, %v4887_v39  ;;  %v5208_v39 = vld [vmem:[%s9344_s11] sm:$0xff] }
 0x9a2   :  { %v4893_v29 = vld [vmem:[#allocation8] sm:$0xff] }
 0x9a3   :  { %v4952_v57 = vcombine.high %v4893_v29, %v4893_v29  ;;  %v4959_v51 = vrot.slane %v4893_v29, %v6436_v8  ;;  %v5209_v29 = vld [vmem:[%s9344_s11 + $0x8] sm:$0xff] }
 0x9a5   :  { %v4967_v9 = vcombine.high %v4959_v51, %v4959_v51  ;;  %v4966_v33 = vrot.slane %v4952_v57, %v6436_v8  ;;  %v4930_v8 = vld [vmem:[%s9340_s7 + $0x120] sm:$0xff]  ;;  %v6040_v57 = vpack.c.bf16 %v5209_v29, %v5208_v39 }
 0x9a6   :  { %v5995_v0 = vpack.c.bf16 %v4931_v52, %v4930_v8  ;;  %v5214_v8 = vld [vmem:[%s9344_s11 + $0x30] sm:$0xff] }
 0x9a7   :  { %5039 = vmatprep.mubr.f32.mxu1 %v4967_v9  ;;  %v4968_v63 = vcombine.high %v4966_v33, %v4966_v33 }
 0x9a8   :  { %5040 = vmatmul.mubr.f32.vlgmr.msra.gmra.mrb[16].mxu1 %v4959_v51 }
 0x9a9   :  { %5990 = vmatpush1.bf16.msra.mxu1 %v5989_v23  ;;  %5374 = vmatprep.mubr.msk.f32.mxu1 %vm4972_vm13, %v4968_v63  ;;  %v5210_v23 = vld [vmem:[%s9344_s11 + $0x10] sm:$0xff]  ;;  %v5213_v63 = vld [vmem:[%s9344_s11 + $0x28] sm:$0xff] }
 0x9aa   :  { %5991 = vmatprep.subr.bf16.mxu1 %v6354_v41 }
 0x9ad   :  { %5993 = vmatpush1.bf16.msra.mxu1 %v5992_v46  ;;  %v6046_v46 = vpack.c.bf16 %v5213_v63, %v5212_v49 }
 0x9ae   :  { %5994 = vmatprep.subr.bf16.mxu1 %v6354_v41 }
 0x9b1   :  { %5996 = vmatpush1.bf16.msra.mxu1 %v5995_v0  ;;  %v5216_v0 = vld [vmem:[%s9344_s11 + $0x40] sm:$0xff] }
 0x9b2   :  { %5997 = vmatprep.subr.bf16.mxu1 %v6354_v41  ;;  %v6052_v7 = vpack.c.bf16 %v5217_v26, %v5216_v0 }
 0x9b5   :  { %5999 = vmatpush1.bf16.msra.mxu1 %v5998_v38  ;;  %v5218_v38 = vld [vmem:[%s9344_s11 + $0x50] sm:$0xff] }
 0x9b6   :  { %6000 = vmatprep.subr.bf16.mxu1 %v6354_v41  ;;  %v6055_v34 = vpack.c.bf16 %v5219_v30, %v5218_v38 }
 0x9b9   :  { %6002 = vmatpush1.bf16.msra.mxu1 %v6001_v22  ;;  %v5220_v22 = vld [vmem:[%s9344_s11 + $0x60] sm:$0xff] }
 0x9ba   :  { %6003 = vmatprep.subr.bf16.mxu1 %v6354_v41  ;;  %v6058_v62 = vpack.c.bf16 %v5221_v47, %v5220_v22 }
 0x9bd   :  { %6005 = vmatpush1.bf16.msra.mxu1 %v6004_v43  ;;  %v5222_v43 = vld [vmem:[%s9344_s11 + $0x70] sm:$0xff] }
 0x9be   :  { %6006 = vmatprep.subr.bf16.mxu1 %v6354_v41  ;;  %v6061_v56 = vpack.c.bf16 %v5223_v1, %v5222_v43 }
 0x9c1   :  { %6008 = vmatpush1.bf16.msra.mxu1 %v6007_v28  ;;  %v5375_v28 = vld [vmem:[%s9343_s10] ss:$0 sm:$0xff] }
 0x9c2   :  { %6009 = vmatprep.subr.bf16.mxu1 %v6354_v41 }
 0x9c5   :  { %6011 = vmatpush1.bf16.msra.mxu1 %v6010_v10 }
 0x9c6   :  { %6012 = vmatprep.subr.bf16.mxu1 %v6354_v41 }
 0x9c9   :  { %6014 = vmatpush1.bf16.msra.mxu1 %v6013_v55 }
 0x9ca   :  { %6015 = vmatprep.subr.bf16.mxu1 %v6354_v41 }
 0x9cc   :  { %5110 = vmatmul.mubr.f32.vlgmr.msra.gmra.mrb[18].mxu1 %v4966_v33  ;;  %v5211_v33 = vld [vmem:[%s9344_s11 + $0x18] sm:$0xff] }
 0x9cd   :  { %6017 = vmatpush3.bf16.msra.mxu1 %v6016_v35  ;;  %5536 = vmatprep.mubr.msk.f32.mxu1 %vm6355_vm14, %v6323_v19  ;;  %v6043_v61 = vpack.c.bf16 %v5211_v33, %v5210_v23 }
 0x9ce   :  { %6018 = vmatprep.subr.bf16.mxu1 %v6354_v41 }
 0x9d1   :  { %6020 = vmatpush3.bf16.msra.mxu1 %v6019_v32 }
 0x9d2   :  { %6021 = vmatprep.subr.bf16.mxu1 %v6354_v41 }
 0x9d5   :  { %6023 = vmatpush3.bf16.msra.mxu1 %v6022_v45 }
 0x9d6   :  { %6024 = vmatprep.subr.bf16.mxu1 %v6354_v41 }
 0x9d9   :  { %6026 = vmatpush3.bf16.msra.mxu1 %v6025_v31 }
 0x9da   :  { %6027 = vmatprep.subr.bf16.mxu1 %v6354_v41 }
 0x9dd   :  { %6029 = vmatpush3.bf16.msra.mxu1 %v6028_v53 }
 0x9de   :  { %6030 = vmatprep.subr.bf16.mxu1 %v6354_v41 }
 0x9e1   :  { %6032 = vmatpush3.bf16.msra.mxu1 %v6031_v42 }
 0x9e2   :  { %6033 = vmatprep.subr.bf16.mxu1 %v6354_v41 }
 0x9e5   :  { %6035 = vmatpush3.bf16.msra.mxu1 %v6034_v24 }
 0x9e6   :  { %6036 = vmatprep.subr.bf16.mxu1 %v6354_v41 }
 0x9e9   :  { %6038 = vmatpush3.bf16.msra.mxu1 %v6037_v5 }
 0x9ea   :  { %6039 = vmatprep.subr.bf16.mxu1 %v6354_v41 }
 0xa7b   :  { %v5429_v27 = vpop.f32.mrb[16].mxu1 }
 0xa7c   :  { %v5430_v60 = vpop.f32.mrb[17].mxu1 }
 0xa7d   :  { %v5431_v15 = vadd.f32 %v5430_v60, %v5429_v27 }
 0xa7f   :  { %v5042_v54 = vadd.f32 %v5431_v15, %v5373_v25 }
 0xa9f   :  { %v5111_v16 = vpop.f32.mrb[18].mxu1 }
 0xaa0   :  { %v5112_v51 = vadd.f32 %v5111_v16, %v5042_v54  ;;  %v5113_v9 = vpop.f32.mrb[19].mxu1 }
 0xaa2   :  { %5537 = vmatmul.mubr.f32.vlgmr.msra.gmra.mrb[20].mxu1 %v5112_v51 }
 0xaa3   :  { %6041 = vmatpush3.bf16.msra.mxu1 %v6040_v57  ;;  %5571 = vmatprep.mubr.msk.f32.mxu1 %vm6355_vm14, %v6323_v19  ;;  %v5215_v19 = vld [vmem:[%s9344_s11 + $0x38] sm:$0xff]  ;;  %s6279_s11 = scalar_lea.vmem %s5310_s1, 32 }
 0xaa4   :  { %6042 = vmatprep.subr.bf16.mxu1 %v6354_v41  ;;  %v6049_v52 = vpack.c.bf16 %v5215_v19, %v5214_v8  ;;  %p6280_p0 = scmp.ne.s32.totalorder %s5310_s1, %s6279_s11  ;;  %p6285_p2 = scmp.lt.s32.totalorder %s6279_s11, %s6279_s11 }
 0xaa6   :  { %p6286_p3 = por %p6285_p2, %p6284_p1 }
 0xaa7   :  { %6044 = vmatpush3.bf16.msra.mxu1 %v6043_v61 }
 0xaa8   :  { %6045 = vmatprep.subr.bf16.mxu1 %v6354_v41  ;;  %p6287_p4 = pnand %p6286_p3, %p6280_p0 }
 0xaab   :  { %6047 = vmatpush3.bf16.msra.mxu1 %v6046_v46 }
 0xaac   :  { %6048 = vmatprep.subr.bf16.mxu1 %v6354_v41 }
 0xaaf   :  { %6050 = vmatpush3.bf16.msra.mxu1 %v6049_v52 }
 0xab0   :  { %6051 = vmatprep.subr.bf16.mxu1 %v6354_v41 }
 0xab3   :  { %6053 = vmatpush3.bf16.msra.mxu1 %v6052_v7 }
 0xab4   :  { %6054 = vmatprep.subr.bf16.mxu1 %v6354_v41 }
 0xab7   :  { %6056 = vmatpush3.bf16.msra.mxu1 %v6055_v34 }
 0xab8   :  { %6057 = vmatprep.subr.bf16.mxu1 %v6354_v41 }
 0xabb   :  { %6059 = vmatpush3.bf16.msra.mxu1 %v6058_v62 }
 0xabc   :  { %6060 = vmatprep.subr.bf16.mxu1 %v6354_v41  ;;  %v5376_v41 = vld [vmem:[%s9345_s12] ss:$0 sm:$0xff] }
 0xabf   :  { %6062 = vmatpush3.bf16.msra.mxu1 %v6061_v56 }
 0xb75   :  { %v5204_v4 = vpop.f32.mrb[20].mxu1 }
 0xb76   :  { %v5205_v18 = vadd.f32 %v5375_v28, %v5204_v4  ;;  %v5538_v10 = vpop.f32.mrb[21].mxu1 }
 0xb78   :  { %5572 = vmatmul.mubr.f32.vlgmr.msra.gmra.mrb[22].mxu1 %v5205_v18 }
 0xc4b   :  { %v5297_v21 = vpop.f32.mrb[22].mxu1 }
 0xc4c   :  { %v5298_v3 = vadd.f32 %v5376_v41, %v5297_v21  ;;  %v5573_v55 = vpop.f32.mrb[23].mxu1 }
 0xc4e   :  { %5302 = vst.msk [vmem:[#allocation9] sm:$0x3] %vm5301_vm15, %v5298_v3 }
 0xc4f   :  { %6290 = shalt.err (!%p6287_p4)
}
 0xc50   :  { %s6291_s21 = scalar_lea.hbm %s9346_s13, 32 }
 0xc51   :  { %p6292_p5 = scmp.ne.s32.totalorder %s9346_s13, %s6291_s21  ;;  %p6295_p6 = scmp.lt.u32.totalorder %s6291_s21, %s9346_s13 }
 0xc53   :  { %p6297_p7 = pnand %p6295_p6, %p6292_p5 }
 0xc55   :  { %6300 = shalt.err (!%p6297_p7)
}
 0xc56   :  { %5312 = dma.vmem_to_hbm [thread:$0]  %s5310_s1, 32, %s9346_s13, [#allocation10]  }
 0xc57   :  { %6301 = dma.done.wait [#allocation10], 32  }
 0xc58   :  { %6302 = vsyncadd [#allocation10], 4294967264 }
 0xc59   :  { %5316 = vsyncpa [#allocation10], 1 }

</bundles_post_ra>
